<compile_context>
chip_gen: v7x
topology: tpu7x:2x2x1
jax: 0.10.0
libtpu: 0.0.40
codegen_flags: <defaults>
</compile_context>

<pallas_src>
import jax
import jax.numpy as jnp
from jax import lax
from jax.experimental import pallas as pl
from jax.experimental.pallas import tpu as pltpu

# ---- model dimensions (small, synthetic CLIP text transformer) ----
B, S, D, H, L = 2, 8, 32, 4, 3     # batch, seq, width, heads, layers
HD = D // H                        # head dim
DFF = 4 * D                        # MLP hidden
P = 32                             # text projection dim (== D here)
N_CTX = 2                          # compound-prompt context length
NUM_DEEP = 2                       # len(compound_prompts_deeper_text)
EPS = 1e-5
NEG = -1e30

# ---- packed-input layouts ----
# weight slab A (bf16): (L, D, 3D + D + DFF) columns = [wqkv | wo | wfc]
WQKV_C, WO_C, WFC_C = 0, 3 * D, 4 * D
# bias slab (f32): (L + 1, 8, DFF); per-layer rows:
R_G1, R_B1, R_BQKV, R_BO, R_G2, R_B2, R_BFC, R_BPR = range(8)
# (extra "layer" L holds [gf, bf] of ln_final in rows 0 and 1)
# misc slab (f32, lane width D): row offsets
POS_R = 0
PROJ_R = POS_R + S                 # text_projection, D rows x P lanes
CTX_R = PROJ_R + D                 # NUM_DEEP pre-placed deep-prompt slabs, B*S rows each
KEEP_R = CTX_R + NUM_DEEP * B * S  # 1/0 keep mask, full lane width
EOT_R = KEEP_R + B * S             # one-hot EOT row mask, full lane width
MISC_ROWS = EOT_R + B * S          # = 104


def _ln(x, g, b):
    mu = jnp.mean(x, axis=-1, keepdims=True)
    var = jnp.mean((x - mu) ** 2, axis=-1, keepdims=True)
    return (x - mu) * lax.rsqrt(var + EPS) * g + b


def encoder_kernel(prompts_ref, wa_ref, wpr_ref, bias_ref, misc_ref, o_ref):
    f32, bf16 = jnp.float32, jnp.bfloat16

    # x = prompts + positional_embedding, batch folded into sublanes: (B*S, D)
    pos = misc_ref[POS_R:POS_R + S, :]
    x = (prompts_ref[...] + pos[None]).reshape(B * S, D)

    keep = misc_ref[KEEP_R:KEEP_R + B * S, :]        # 1.0 everywhere except deep-ctx rows

    # causal (CLIP text) mask, built ONCE at the exact consumed shape (H*B*S, S)
    rq = lax.broadcasted_iota(jnp.int32, (H * B, S, S), 1)
    ck = lax.broadcasted_iota(jnp.int32, (H * B, S, S), 2)
    neg_mask = jnp.where(ck <= rq, 0.0, NEG).reshape(H * B * S, S)

    # per-head lane masks, built ONCE at the consumed shape (B*S, D)
    lane = lax.broadcasted_iota(jnp.int32, (B * S, D), 1)
    head_masks = [(lane >= h * HD) & (lane < (h + 1) * HD) for h in range(H)]

    scale = 1.0 / (HD ** 0.5)
    counter = 0
    for layer in range(L):                            # static unroll, L = 3
        if layer > 0 and counter < NUM_DEEP:
            # MaPLe deep-prompt replacement: pure VPU blend with a pre-placed ctx slab.
            lo = CTX_R + counter * B * S
            x = x * keep + misc_ref[lo:lo + B * S, :]
            counter += 1

        bv = bias_ref[layer]                          # (8, DFF) f32
        g1, b1 = bv[R_G1:R_G1 + 1, :D], bv[R_B1:R_B1 + 1, :D]
        bqkv = bv[R_BQKV:R_BQKV + 1, :3 * D]
        bo = bv[R_BO:R_BO + 1, :D]
        g2, b2 = bv[R_G2:R_G2 + 1, :D], bv[R_B2:R_B2 + 1, :D]
        bfc = bv[R_BFC:R_BFC + 1, :]
        bpr = bv[R_BPR:R_BPR + 1, :D]

        wa = wa_ref[layer]                            # (D, 3D + D + DFF) bf16
        wqkv = wa[:, WQKV_C:WO_C]
        wo = wa[:, WO_C:WFC_C]
        wfc = wa[:, WFC_C:]
        wpr = wpr_ref[layer]                          # (DFF, D) bf16

        # ---- pre-LN + fused QKV projection (bf16 operands, f32 accumulate) ----
        xn = _ln(x, g1, b1)
        qkv = jnp.dot(xn.astype(bf16), wqkv,
                      preferred_element_type=f32) + bqkv                  # (B*S, 3D) f32
        q = qkv[:, :D].astype(bf16)                                       # (B*S, D)
        k = qkv[:, D:2 * D].astype(bf16).reshape(B, S, D)
        v = qkv[:, 2 * D:].astype(bf16)

        # ---- scores for all heads; ONE softmax over the (H*B*S, S) slab ----
        srows = []
        for h in range(H):                            # static unroll, H = 4
            qm = jnp.where(head_masks[h], q, 0).reshape(B, S, D)
            sh = jnp.einsum('bqd,bkd->bqk', qm, k,
                            preferred_element_type=f32)                   # (B, S, S)
            srows.append(sh.reshape(B * S, S))
        s = jnp.concatenate(srows, axis=0) * scale + neg_mask             # (H*B*S, S)
        s = s - jnp.max(s, axis=-1, keepdims=True)
        p = jnp.exp(s)
        p = (p * pl.reciprocal(jnp.sum(p, axis=-1, keepdims=True),
                               approx=True)).astype(bf16)

        # ---- per-head AV at full lane width (head-masked V), summed, then a SINGLE
        #      output-projection matmul against the whole wo ----
        o = None
        for h in range(H):
            vm = jnp.where(head_masks[h], v, 0).reshape(B, S, D)
            ph = p[h * B * S:(h + 1) * B * S, :].reshape(B, S, S)
            oh = jnp.einsum('bqk,bkd->bqd', ph, vm,
                            preferred_element_type=f32).reshape(B * S, D)
            o = oh if o is None else o + oh
        x = x + jnp.dot(o.astype(bf16), wo, preferred_element_type=f32) + bo

        # ---- MLP: Linear -> QuickGELU -> Linear ----
        xn2 = _ln(x, g2, b2)
        h1 = jnp.dot(xn2.astype(bf16), wfc,
                     preferred_element_type=f32) + bfc                    # (B*S, DFF)
        h1 = h1 * pl.reciprocal(1.0 + jnp.exp(-1.702 * h1), approx=True)  # QuickGELU (EUP)
        x = x + jnp.dot(h1.astype(bf16), wpr,
                        preferred_element_type=f32) + bpr

    # ---- EOT gather (VPU masked row-sum) + ln_final + text projection ----
    emask = misc_ref[EOT_R:EOT_R + B * S, :]          # one-hot EOT rows, full lane width
    masked = x * emask
    fin = bias_ref[L]
    gf, bfin = fin[0:1, :D], fin[1:2, :D]
    proj_bf = misc_ref[PROJ_R:PROJ_R + D, :P].astype(bf16)
    for b in range(B):                                # static unroll, B = 2
        exb = jnp.sum(masked[b * S:(b + 1) * S, :], axis=0, keepdims=True)   # (1, D)
        exbn = _ln(exb, gf, bfin)
        o_ref[b:b + 1, :] = jnp.dot(exbn.astype(bf16), proj_bf,
                                    preferred_element_type=f32)


def _pad_row(v, width):
    v = v.reshape(1, -1)
    return jnp.pad(v, ((0, 0), (0, width - v.shape[-1])))


def text_encoder_forward(prompts, tokenized_prompts, compound_prompts, params):
    f32, bf16 = jnp.float32, jnp.bfloat16

    # ---- bf16 weight slabs (MXU-native): 2 DMAs for all L layers' matrices ----
    w_a = jnp.concatenate([params["wqkv"], params["wo"], params["wfc"]],
                          axis=-1).astype(bf16)                    # (L, D, 3D + D + DFF)
    w_pr = params["wpr"].astype(bf16)                              # (L, DFF, D)

    # ---- per-layer bias / LN slab + final-LN rows: 1 DMA ----
    def layer_rows(l):
        return jnp.concatenate([
            _pad_row(params["g1"][l], DFF), _pad_row(params["b1"][l], DFF),
            _pad_row(params["bqkv"][l], DFF), _pad_row(params["bo"][l], DFF),
            _pad_row(params["g2"][l], DFF), _pad_row(params["b2"][l], DFF),
            _pad_row(params["bfc"][l], DFF), _pad_row(params["bpr"][l], DFF)], axis=0)
    final_rows = jnp.concatenate([_pad_row(params["gf"], DFF),
                                  _pad_row(params["bf"], DFF),
                                  jnp.zeros((6, DFF), f32)], axis=0)
    bias_slab = jnp.stack([layer_rows(l) for l in range(L)] + [final_rows])  # (L+1, 8, DFF)

    # ---- misc slab (pos / proj / deep-ctx slabs / keep mask / EOT mask): 1 DMA ----
    ctx_stack = jnp.stack(compound_prompts).astype(f32)            # (NUM_DEEP, N_CTX, D)
    ctx_pad = jnp.zeros((NUM_DEEP, S, D), f32).at[:, 1:1 + N_CTX, :].set(ctx_stack)
    ctx_flat = jnp.broadcast_to(ctx_pad[:, None],
                                (NUM_DEEP, B, S, D)).reshape(NUM_DEEP * B * S, D)

    tok = jnp.arange(S)
    keep = ((tok < 1) | (tok >= 1 + N_CTX)).astype(f32)            # (S,)
    keep = jnp.broadcast_to(keep[None, :, None], (B, S, D)).reshape(B * S, D)

    eot = jnp.argmax(tokenized_prompts, axis=-1)                   # (B,)
    emask = (jnp.arange(S)[None, :] == eot[:, None]).astype(f32)   # (B, S)
    emask = jnp.broadcast_to(emask[:, :, None], (B, S, D)).reshape(B * S, D)

    misc = jnp.concatenate([params["pos"].astype(f32), params["proj"].astype(f32),
                            ctx_flat, keep, emask], axis=0)        # (MISC_ROWS, D)

    args = (prompts.astype(f32), w_a, w_pr, bias_slab, misc)
    vmem = pl.BlockSpec(memory_space=pltpu.MemorySpace.VMEM)

    # Single fused, grid-less kernel: all weights + activations (~150 KiB) stay resident
    # in VMEM for the whole forward pass.  (No grid -> single TensorCore; fine at B=2.)
    return pl.pallas_call(
        encoder_kernel,
        out_shape=jax.ShapeDtypeStruct((B, P), jnp.float32),
        in_specs=[vmem] * len(args),
        out_specs=vmem,
    )(*args)


def init_params(key):
    def nrm(k, shape, scale=0.02):
        return (scale * jax.random.normal(k, shape)).astype(jnp.float32)

    ks = jax.random.split(key, 6)
    return {
        "pos": nrm(ks[0], (S, D)),
        "proj": nrm(ks[1], (D, P), scale=D ** -0.5),
        "gf": jnp.ones((1, D), jnp.float32),
        "bf": jnp.zeros((1, D), jnp.float32),
        "g1": jnp.ones((L, 1, D), jnp.float32),
        "b1": jnp.zeros((L, 1, D), jnp.float32),
        "wqkv": nrm(ks[2], (L, D, 3 * D)),
        "bqkv": jnp.zeros((L, 1, 3 * D), jnp.float32),
        "wo": nrm(ks[3], (L, D, D)),
        "bo": jnp.zeros((L, 1, D), jnp.float32),
        "g2": jnp.ones((L, 1, D), jnp.float32),
        "b2": jnp.zeros((L, 1, D), jnp.float32),
        "wfc": nrm(ks[4], (L, D, DFF)),
        "bfc": jnp.zeros((L, 1, DFF), jnp.float32),
        "wpr": nrm(ks[5], (L, DFF, D)),
        "bpr": jnp.zeros((L, 1, D), jnp.float32),
    }


if __name__ == "__main__":
    key = jax.random.PRNGKey(0)
    kp, kprompt, ktok, kc1, kc2 = jax.random.split(key, 5)

    params = init_params(kp)

    prompts = (0.02 * jax.random.normal(kprompt, (B, S, D))).astype(jnp.float32)
    tokenized_prompts = jax.random.randint(ktok, (B, S), 0, 1000, dtype=jnp.int32)
    compound_prompts_deeper_text = [
        (0.02 * jax.random.normal(kc1, (N_CTX, D))).astype(jnp.float32),
        (0.02 * jax.random.normal(kc2, (N_CTX, D))).astype(jnp.float32),
    ]

    fwd = jax.jit(text_encoder_forward)
    out = fwd(prompts, tokenized_prompts, compound_prompts_deeper_text, params)
    out = jax.block_until_ready(out)
    assert out.shape == (B, P) and out.dtype == jnp.float32
    print("KERNEL_OK")
</pallas_src>

<mosaic_0001>
module attributes {stable_mosaic.version = 11 : i64} {
  func.func @encoder_kernel(%arg0: memref<2x8x32xf32, #tpu.memory_space<vmem>>, %arg1: memref<3x32x256xbf16, #tpu.memory_space<vmem>>, %arg2: memref<3x128x32xbf16, #tpu.memory_space<vmem>>, %arg3: memref<4x8x128xf32, #tpu.memory_space<vmem>>, %arg4: memref<104x32xf32, #tpu.memory_space<vmem>>, %arg5: memref<2x32xf32, #tpu.memory_space<vmem>>) attributes {dimension_semantics = [], scalar_prefetch = 0 : i64, scratch_operands = 0 : i64, tpu.core_type = #tpu.core_type<tc>} {
    %c0 = arith.constant 0 : index
    %c0_0 = arith.constant 0 : index
    %0 = vector.load %arg4[%c0, %c0_0] : memref<104x32xf32, #tpu.memory_space<vmem>>, vector<8x32xf32>
    %c0_1 = arith.constant 0 : index
    %c0_2 = arith.constant 0 : index
    %c0_3 = arith.constant 0 : index
    %1 = vector.load %arg0[%c0_1, %c0_2, %c0_3] : memref<2x8x32xf32, #tpu.memory_space<vmem>>, vector<2x8x32xf32>
    %2 = vector.shape_cast %0 : vector<8x32xf32> to vector<1x8x32xf32>
    %3 = vector.broadcast %2 : vector<1x8x32xf32> to vector<2x8x32xf32>
    %4 = arith.addf %1, %3 : vector<2x8x32xf32>
    %5 = vector.shape_cast %4 : vector<2x8x32xf32> to vector<16x32xf32>
    %c72 = arith.constant 72 : index
    %c0_4 = arith.constant 0 : index
    %6 = vector.load %arg4[%c72, %c0_4] : memref<104x32xf32, #tpu.memory_space<vmem>>, vector<16x32xf32>
    %7 = tpu.iota {dimensions = array<i32: 1>} : vector<8x8x8xi32>
    %8 = tpu.iota {dimensions = array<i32: 2>} : vector<8x8x8xi32>
    %9 = arith.cmpi sle, %8, %7 : vector<8x8x8xi32>
    %cst = arith.constant 0.000000e+00 : f32
    %cst_5 = arith.constant -1.000000e+30 : f32
    %10 = vector.broadcast %cst : f32 to vector<8x8x8xf32>
    %11 = vector.broadcast %cst_5 : f32 to vector<8x8x8xf32>
    %12 = arith.select %9, %10, %11 : vector<8x8x8xi1>, vector<8x8x8xf32>
    %13 = vector.shape_cast %12 : vector<8x8x8xf32> to vector<64x8xf32>
    %14 = tpu.iota {dimensions = array<i32: 1>} : vector<16x32xi32>
    %c0_i32 = arith.constant 0 : i32
    %15 = vector.broadcast %c0_i32 : i32 to vector<16x32xi32>
    %16 = arith.cmpi sge, %14, %15 : vector<16x32xi32>
    %c8_i32 = arith.constant 8 : i32
    %17 = vector.broadcast %c8_i32 : i32 to vector<16x32xi32>
    %18 = arith.cmpi slt, %14, %17 : vector<16x32xi32>
    %19 = arith.andi %16, %18 : vector<16x32xi1>
    %c8_i32_6 = arith.constant 8 : i32
    %20 = vector.broadcast %c8_i32_6 : i32 to vector<16x32xi32>
    %21 = arith.cmpi sge, %14, %20 : vector<16x32xi32>
    %c16_i32 = arith.constant 16 : i32
    %22 = vector.broadcast %c16_i32 : i32 to vector<16x32xi32>
    %23 = arith.cmpi slt, %14, %22 : vector<16x32xi32>
    %24 = arith.andi %21, %23 : vector<16x32xi1>
    %c16_i32_7 = arith.constant 16 : i32
    %25 = vector.broadcast %c16_i32_7 : i32 to vector<16x32xi32>
    %26 = arith.cmpi sge, %14, %25 : vector<16x32xi32>
    %c24_i32 = arith.constant 24 : i32
    %27 = vector.broadcast %c24_i32 : i32 to vector<16x32xi32>
    %28 = arith.cmpi slt, %14, %27 : vector<16x32xi32>
    %29 = arith.andi %26, %28 : vector<16x32xi1>
    %c24_i32_8 = arith.constant 24 : i32
    %30 = vector.broadcast %c24_i32_8 : i32 to vector<16x32xi32>
    %31 = arith.cmpi sge, %14, %30 : vector<16x32xi32>
    %c32_i32 = arith.constant 32 : i32
    %32 = vector.broadcast %c32_i32 : i32 to vector<16x32xi32>
    %33 = arith.cmpi slt, %14, %32 : vector<16x32xi32>
    %34 = arith.andi %31, %33 : vector<16x32xi1>
    %c0_9 = arith.constant 0 : index
    %c0_10 = arith.constant 0 : index
    %c0_11 = arith.constant 0 : index
    %35 = vector.load %arg3[%c0_9, %c0_10, %c0_11] : memref<4x8x128xf32, #tpu.memory_space<vmem>>, vector<1x8x128xf32>
    %36 = vector.shape_cast %35 : vector<1x8x128xf32> to vector<8x128xf32>
    %37 = vector.extract_strided_slice %36 {offsets = [0, 0], sizes = [1, 32], strides = [1, 1]} : vector<8x128xf32> to vector<1x32xf32>
    %38 = vector.extract_strided_slice %36 {offsets = [1, 0], sizes = [1, 32], strides = [1, 1]} : vector<8x128xf32> to vector<1x32xf32>
    %39 = vector.extract_strided_slice %36 {offsets = [2, 0], sizes = [1, 96], strides = [1, 1]} : vector<8x128xf32> to vector<1x96xf32>
    %40 = vector.extract_strided_slice %36 {offsets = [3, 0], sizes = [1, 32], strides = [1, 1]} : vector<8x128xf32> to vector<1x32xf32>
    %41 = vector.extract_strided_slice %36 {offsets = [4, 0], sizes = [1, 32], strides = [1, 1]} : vector<8x128xf32> to vector<1x32xf32>
    %42 = vector.extract_strided_slice %36 {offsets = [5, 0], sizes = [1, 32], strides = [1, 1]} : vector<8x128xf32> to vector<1x32xf32>
    %43 = vector.extract_strided_slice %36 {offsets = [6, 0], sizes = [1, 128], strides = [1, 1]} : vector<8x128xf32> to vector<1x128xf32>
    %44 = vector.extract_strided_slice %36 {offsets = [7, 0], sizes = [1, 32], strides = [1, 1]} : vector<8x128xf32> to vector<1x32xf32>
    %c0_12 = arith.constant 0 : index
    %c0_13 = arith.constant 0 : index
    %c0_14 = arith.constant 0 : index
    %45 = vector.load %arg1[%c0_12, %c0_13, %c0_14] : memref<3x32x256xbf16, #tpu.memory_space<vmem>>, vector<1x32x256xbf16>
    %46 = vector.shape_cast %45 : vector<1x32x256xbf16> to vector<32x256xbf16>
    %47 = vector.extract_strided_slice %46 {offsets = [0, 0], sizes = [32, 96], strides = [1, 1]} : vector<32x256xbf16> to vector<32x96xbf16>
    %48 = vector.extract_strided_slice %46 {offsets = [0, 96], sizes = [32, 32], strides = [1, 1]} : vector<32x256xbf16> to vector<32x32xbf16>
    %49 = vector.extract_strided_slice %46 {offsets = [0, 128], sizes = [32, 128], strides = [1, 1]} : vector<32x256xbf16> to vector<32x128xbf16>
    %c0_15 = arith.constant 0 : index
    %c0_16 = arith.constant 0 : index
    %c0_17 = arith.constant 0 : index
    %50 = vector.load %arg2[%c0_15, %c0_16, %c0_17] : memref<3x128x32xbf16, #tpu.memory_space<vmem>>, vector<1x128x32xbf16>
    %51 = vector.shape_cast %50 : vector<1x128x32xbf16> to vector<128x32xbf16>
    %cst_18 = arith.constant dense<0.000000e+00> : vector<16xf32>
    %52 = vector.multi_reduction <add>, %5, %cst_18 [1] : vector<16x32xf32> to vector<16xf32>
    %53 = vector.shape_cast %52 : vector<16xf32> to vector<16x1xf32>
    %cst_19 = arith.constant 3.200000e+01 : f32
    %54 = vector.broadcast %cst_19 : f32 to vector<16x1xf32>
    %55 = arith.divf %53, %54 : vector<16x1xf32>
    %56 = vector.broadcast %55 : vector<16x1xf32> to vector<16x32xf32>
    %57 = arith.subf %5, %56 : vector<16x32xf32>
    %58 = arith.mulf %57, %57 : vector<16x32xf32>
    %cst_20 = arith.constant dense<0.000000e+00> : vector<16xf32>
    %59 = vector.multi_reduction <add>, %58, %cst_20 [1] : vector<16x32xf32> to vector<16xf32>
    %60 = vector.shape_cast %59 : vector<16xf32> to vector<16x1xf32>
    %cst_21 = arith.constant 3.200000e+01 : f32
    %61 = vector.broadcast %cst_21 : f32 to vector<16x1xf32>
    %62 = arith.divf %60, %61 : vector<16x1xf32>
    %63 = vector.broadcast %55 : vector<16x1xf32> to vector<16x32xf32>
    %64 = arith.subf %5, %63 : vector<16x32xf32>
    %cst_22 = arith.constant 9.99999974E-6 : f32
    %65 = vector.broadcast %cst_22 : f32 to vector<16x1xf32>
    %66 = arith.addf %62, %65 : vector<16x1xf32>
    %67 = math.rsqrt %66 : vector<16x1xf32>
    %68 = vector.broadcast %67 : vector<16x1xf32> to vector<16x32xf32>
    %69 = arith.mulf %64, %68 : vector<16x32xf32>
    %70 = vector.broadcast %37 : vector<1x32xf32> to vector<16x32xf32>
    %71 = arith.mulf %69, %70 : vector<16x32xf32>
    %72 = vector.broadcast %38 : vector<1x32xf32> to vector<16x32xf32>
    %73 = arith.addf %71, %72 : vector<16x32xf32>
    %74 = arith.truncf %73 : vector<16x32xf32> to vector<16x32xbf16>
    %cst_23 = arith.constant dense<0.000000e+00> : vector<16x96xf32>
    %75 = tpu.matmul %74, %47, %cst_23 {dimension_numbers = #tpu.dot_dimension_numbers<[1], [0], [0], [1], [0, 0, 1, 1], [], []>} : vector<16x32xbf16>, vector<32x96xbf16>, vector<16x96xf32> -> vector<16x96xf32>
    %76 = vector.broadcast %39 : vector<1x96xf32> to vector<16x96xf32>
    %77 = arith.addf %75, %76 : vector<16x96xf32>
    %78 = vector.extract_strided_slice %77 {offsets = [0, 0], sizes = [16, 32], strides = [1, 1]} : vector<16x96xf32> to vector<16x32xf32>
    %79 = arith.truncf %78 : vector<16x32xf32> to vector<16x32xbf16>
    %80 = vector.extract_strided_slice %77 {offsets = [0, 32], sizes = [16, 32], strides = [1, 1]} : vector<16x96xf32> to vector<16x32xf32>
    %81 = arith.truncf %80 : vector<16x32xf32> to vector<16x32xbf16>
    %82 = vector.shape_cast %81 : vector<16x32xbf16> to vector<2x8x32xbf16>
    %83 = vector.extract_strided_slice %77 {offsets = [0, 64], sizes = [16, 32], strides = [1, 1]} : vector<16x96xf32> to vector<16x32xf32>
    %84 = arith.truncf %83 : vector<16x32xf32> to vector<16x32xbf16>
    %c0_i32_24 = arith.constant 0 : i32
    %85 = arith.sitofp %c0_i32_24 : i32 to bf16
    %86 = vector.broadcast %85 : bf16 to vector<16x32xbf16>
    %87 = arith.select %19, %79, %86 : vector<16x32xi1>, vector<16x32xbf16>
    %88 = vector.shape_cast %87 : vector<16x32xbf16> to vector<2x8x32xbf16>
    "tpu.trace_start"() <{level = 10 : i32, message = "bqd,bkd->bqk"}> : () -> ()
    %cst_25 = arith.constant dense<0.000000e+00> : vector<2x8x8xf32>
    %89 = tpu.matmul %88, %82, %cst_25 {dimension_numbers = #tpu.dot_dimension_numbers<[2], [2], [1], [1], [0, 0, 0, 1, 1, 1], [0], [0]>} : vector<2x8x32xbf16>, vector<2x8x32xbf16>, vector<2x8x8xf32> -> vector<2x8x8xf32>
    "tpu.trace_stop"() : () -> ()
    %90 = vector.shape_cast %89 : vector<2x8x8xf32> to vector<16x8xf32>
    %c0_i32_26 = arith.constant 0 : i32
    %91 = arith.sitofp %c0_i32_26 : i32 to bf16
    %92 = vector.broadcast %91 : bf16 to vector<16x32xbf16>
    %93 = arith.select %24, %79, %92 : vector<16x32xi1>, vector<16x32xbf16>
    %94 = vector.shape_cast %93 : vector<16x32xbf16> to vector<2x8x32xbf16>
    "tpu.trace_start"() <{level = 10 : i32, message = "bqd,bkd->bqk"}> : () -> ()
    %cst_27 = arith.constant dense<0.000000e+00> : vector<2x8x8xf32>
    %95 = tpu.matmul %94, %82, %cst_27 {dimension_numbers = #tpu.dot_dimension_numbers<[2], [2], [1], [1], [0, 0, 0, 1, 1, 1], [0], [0]>} : vector<2x8x32xbf16>, vector<2x8x32xbf16>, vector<2x8x8xf32> -> vector<2x8x8xf32>
    "tpu.trace_stop"() : () -> ()
    %96 = vector.shape_cast %95 : vector<2x8x8xf32> to vector<16x8xf32>
    %c0_i32_28 = arith.constant 0 : i32
    %97 = arith.sitofp %c0_i32_28 : i32 to bf16
    %98 = vector.broadcast %97 : bf16 to vector<16x32xbf16>
    %99 = arith.select %29, %79, %98 : vector<16x32xi1>, vector<16x32xbf16>
    %100 = vector.shape_cast %99 : vector<16x32xbf16> to vector<2x8x32xbf16>
    "tpu.trace_start"() <{level = 10 : i32, message = "bqd,bkd->bqk"}> : () -> ()
    %cst_29 = arith.constant dense<0.000000e+00> : vector<2x8x8xf32>
    %101 = tpu.matmul %100, %82, %cst_29 {dimension_numbers = #tpu.dot_dimension_numbers<[2], [2], [1], [1], [0, 0, 0, 1, 1, 1], [0], [0]>} : vector<2x8x32xbf16>, vector<2x8x32xbf16>, vector<2x8x8xf32> -> vector<2x8x8xf32>
    "tpu.trace_stop"() : () -> ()
    %102 = vector.shape_cast %101 : vector<2x8x8xf32> to vector<16x8xf32>
    %c0_i32_30 = arith.constant 0 : i32
    %103 = arith.sitofp %c0_i32_30 : i32 to bf16
    %104 = vector.broadcast %103 : bf16 to vector<16x32xbf16>
    %105 = arith.select %34, %79, %104 : vector<16x32xi1>, vector<16x32xbf16>
    %106 = vector.shape_cast %105 : vector<16x32xbf16> to vector<2x8x32xbf16>
    "tpu.trace_start"() <{level = 10 : i32, message = "bqd,bkd->bqk"}> : () -> ()
    %cst_31 = arith.constant dense<0.000000e+00> : vector<2x8x8xf32>
    %107 = tpu.matmul %106, %82, %cst_31 {dimension_numbers = #tpu.dot_dimension_numbers<[2], [2], [1], [1], [0, 0, 0, 1, 1, 1], [0], [0]>} : vector<2x8x32xbf16>, vector<2x8x32xbf16>, vector<2x8x8xf32> -> vector<2x8x8xf32>
    "tpu.trace_stop"() : () -> ()
    %108 = vector.shape_cast %107 : vector<2x8x8xf32> to vector<16x8xf32>
    %109 = tpu.concatenate %90, %96, %102, %108 in 0 : vector<16x8xf32>, vector<16x8xf32>, vector<16x8xf32>, vector<16x8xf32> -> vector<64x8xf32>
    %cst_32 = arith.constant 0.353553385 : f32
    %110 = vector.broadcast %cst_32 : f32 to vector<64x8xf32>
    %111 = arith.mulf %109, %110 : vector<64x8xf32>
    %112 = arith.addf %111, %13 : vector<64x8xf32>
    %cst_33 = arith.constant dense<0xFF800000> : vector<64xf32>
    %113 = vector.multi_reduction <maximumf>, %112, %cst_33 [1] : vector<64x8xf32> to vector<64xf32>
    %114 = vector.shape_cast %113 : vector<64xf32> to vector<64x1xf32>
    %115 = vector.broadcast %114 : vector<64x1xf32> to vector<64x8xf32>
    %116 = arith.subf %112, %115 : vector<64x8xf32>
    %117 = math.exp %116 : vector<64x8xf32>
    %cst_34 = arith.constant dense<0.000000e+00> : vector<64xf32>
    %118 = vector.multi_reduction <add>, %117, %cst_34 [1] : vector<64x8xf32> to vector<64xf32>
    %119 = vector.shape_cast %118 : vector<64xf32> to vector<64x1xf32>
    %120 = tpu.reciprocal %119 {approx = true} : vector<64x1xf32> -> vector<64x1xf32>
    %121 = vector.broadcast %120 : vector<64x1xf32> to vector<64x8xf32>
    %122 = arith.mulf %117, %121 : vector<64x8xf32>
    %123 = arith.truncf %122 : vector<64x8xf32> to vector<64x8xbf16>
    %c0_i32_35 = arith.constant 0 : i32
    %124 = arith.sitofp %c0_i32_35 : i32 to bf16
    %125 = vector.broadcast %124 : bf16 to vector<16x32xbf16>
    %126 = arith.select %19, %84, %125 : vector<16x32xi1>, vector<16x32xbf16>
    %127 = vector.shape_cast %126 : vector<16x32xbf16> to vector<2x8x32xbf16>
    %128 = vector.extract_strided_slice %123 {offsets = [0, 0], sizes = [16, 8], strides = [1, 1]} : vector<64x8xbf16> to vector<16x8xbf16>
    %129 = vector.shape_cast %128 : vector<16x8xbf16> to vector<2x8x8xbf16>
    "tpu.trace_start"() <{level = 10 : i32, message = "bqk,bkd->bqd"}> : () -> ()
    %cst_36 = arith.constant dense<0.000000e+00> : vector<2x8x32xf32>
    %130 = tpu.matmul %129, %127, %cst_36 {dimension_numbers = #tpu.dot_dimension_numbers<[2], [1], [1], [2], [0, 0, 0, 1, 1, 2], [0], [0]>} : vector<2x8x8xbf16>, vector<2x8x32xbf16>, vector<2x8x32xf32> -> vector<2x8x32xf32>
    "tpu.trace_stop"() : () -> ()
    %131 = vector.shape_cast %130 : vector<2x8x32xf32> to vector<16x32xf32>
    %c0_i32_37 = arith.constant 0 : i32
    %132 = arith.sitofp %c0_i32_37 : i32 to bf16
    %133 = vector.broadcast %132 : bf16 to vector<16x32xbf16>
    %134 = arith.select %24, %84, %133 : vector<16x32xi1>, vector<16x32xbf16>
    %135 = vector.shape_cast %134 : vector<16x32xbf16> to vector<2x8x32xbf16>
    %136 = vector.extract_strided_slice %123 {offsets = [16, 0], sizes = [16, 8], strides = [1, 1]} : vector<64x8xbf16> to vector<16x8xbf16>
    %137 = vector.shape_cast %136 : vector<16x8xbf16> to vector<2x8x8xbf16>
    "tpu.trace_start"() <{level = 10 : i32, message = "bqk,bkd->bqd"}> : () -> ()
    %cst_38 = arith.constant dense<0.000000e+00> : vector<2x8x32xf32>
    %138 = tpu.matmul %137, %135, %cst_38 {dimension_numbers = #tpu.dot_dimension_numbers<[2], [1], [1], [2], [0, 0, 0, 1, 1, 2], [0], [0]>} : vector<2x8x8xbf16>, vector<2x8x32xbf16>, vector<2x8x32xf32> -> vector<2x8x32xf32>
    "tpu.trace_stop"() : () -> ()
    %139 = vector.shape_cast %138 : vector<2x8x32xf32> to vector<16x32xf32>
    %140 = arith.addf %131, %139 : vector<16x32xf32>
    %c0_i32_39 = arith.constant 0 : i32
    %141 = arith.sitofp %c0_i32_39 : i32 to bf16
    %142 = vector.broadcast %141 : bf16 to vector<16x32xbf16>
    %143 = arith.select %29, %84, %142 : vector<16x32xi1>, vector<16x32xbf16>
    %144 = vector.shape_cast %143 : vector<16x32xbf16> to vector<2x8x32xbf16>
    %145 = vector.extract_strided_slice %123 {offsets = [32, 0], sizes = [16, 8], strides = [1, 1]} : vector<64x8xbf16> to vector<16x8xbf16>
    %146 = vector.shape_cast %145 : vector<16x8xbf16> to vector<2x8x8xbf16>
    "tpu.trace_start"() <{level = 10 : i32, message = "bqk,bkd->bqd"}> : () -> ()
    %cst_40 = arith.constant dense<0.000000e+00> : vector<2x8x32xf32>
    %147 = tpu.matmul %146, %144, %cst_40 {dimension_numbers = #tpu.dot_dimension_numbers<[2], [1], [1], [2], [0, 0, 0, 1, 1, 2], [0], [0]>} : vector<2x8x8xbf16>, vector<2x8x32xbf16>, vector<2x8x32xf32> -> vector<2x8x32xf32>
    "tpu.trace_stop"() : () -> ()
    %148 = vector.shape_cast %147 : vector<2x8x32xf32> to vector<16x32xf32>
    %149 = arith.addf %140, %148 : vector<16x32xf32>
    %c0_i32_41 = arith.constant 0 : i32
    %150 = arith.sitofp %c0_i32_41 : i32 to bf16
    %151 = vector.broadcast %150 : bf16 to vector<16x32xbf16>
    %152 = arith.select %34, %84, %151 : vector<16x32xi1>, vector<16x32xbf16>
    %153 = vector.shape_cast %152 : vector<16x32xbf16> to vector<2x8x32xbf16>
    %154 = vector.extract_strided_slice %123 {offsets = [48, 0], sizes = [16, 8], strides = [1, 1]} : vector<64x8xbf16> to vector<16x8xbf16>
    %155 = vector.shape_cast %154 : vector<16x8xbf16> to vector<2x8x8xbf16>
    "tpu.trace_start"() <{level = 10 : i32, message = "bqk,bkd->bqd"}> : () -> ()
    %cst_42 = arith.constant dense<0.000000e+00> : vector<2x8x32xf32>
    %156 = tpu.matmul %155, %153, %cst_42 {dimension_numbers = #tpu.dot_dimension_numbers<[2], [1], [1], [2], [0, 0, 0, 1, 1, 2], [0], [0]>} : vector<2x8x8xbf16>, vector<2x8x32xbf16>, vector<2x8x32xf32> -> vector<2x8x32xf32>
    "tpu.trace_stop"() : () -> ()
    %157 = vector.shape_cast %156 : vector<2x8x32xf32> to vector<16x32xf32>
    %158 = arith.addf %149, %157 : vector<16x32xf32>
    %159 = arith.truncf %158 : vector<16x32xf32> to vector<16x32xbf16>
    %cst_43 = arith.constant dense<0.000000e+00> : vector<16x32xf32>
    %160 = tpu.matmul %159, %48, %cst_43 {dimension_numbers = #tpu.dot_dimension_numbers<[1], [0], [0], [1], [0, 0, 1, 1], [], []>} : vector<16x32xbf16>, vector<32x32xbf16>, vector<16x32xf32> -> vector<16x32xf32>
    %161 = arith.addf %5, %160 : vector<16x32xf32>
    %162 = vector.broadcast %40 : vector<1x32xf32> to vector<16x32xf32>
    %163 = arith.addf %161, %162 : vector<16x32xf32>
    %cst_44 = arith.constant dense<0.000000e+00> : vector<16xf32>
    %164 = vector.multi_reduction <add>, %163, %cst_44 [1] : vector<16x32xf32> to vector<16xf32>
    %165 = vector.shape_cast %164 : vector<16xf32> to vector<16x1xf32>
    %cst_45 = arith.constant 3.200000e+01 : f32
    %166 = vector.broadcast %cst_45 : f32 to vector<16x1xf32>
    %167 = arith.divf %165, %166 : vector<16x1xf32>
    %168 = vector.broadcast %167 : vector<16x1xf32> to vector<16x32xf32>
    %169 = arith.subf %163, %168 : vector<16x32xf32>
    %170 = arith.mulf %169, %169 : vector<16x32xf32>
    %cst_46 = arith.constant dense<0.000000e+00> : vector<16xf32>
    %171 = vector.multi_reduction <add>, %170, %cst_46 [1] : vector<16x32xf32> to vector<16xf32>
    %172 = vector.shape_cast %171 : vector<16xf32> to vector<16x1xf32>
    %cst_47 = arith.constant 3.200000e+01 : f32
    %173 = vector.broadcast %cst_47 : f32 to vector<16x1xf32>
    %174 = arith.divf %172, %173 : vector<16x1xf32>
    %175 = vector.broadcast %167 : vector<16x1xf32> to vector<16x32xf32>
    %176 = arith.subf %163, %175 : vector<16x32xf32>
    %cst_48 = arith.constant 9.99999974E-6 : f32
    %177 = vector.broadcast %cst_48 : f32 to vector<16x1xf32>
    %178 = arith.addf %174, %177 : vector<16x1xf32>
    %179 = math.rsqrt %178 : vector<16x1xf32>
    %180 = vector.broadcast %179 : vector<16x1xf32> to vector<16x32xf32>
    %181 = arith.mulf %176, %180 : vector<16x32xf32>
    %182 = vector.broadcast %41 : vector<1x32xf32> to vector<16x32xf32>
    %183 = arith.mulf %181, %182 : vector<16x32xf32>
    %184 = vector.broadcast %42 : vector<1x32xf32> to vector<16x32xf32>
    %185 = arith.addf %183, %184 : vector<16x32xf32>
    %186 = arith.truncf %185 : vector<16x32xf32> to vector<16x32xbf16>
    %cst_49 = arith.constant dense<0.000000e+00> : vector<16x128xf32>
    %187 = tpu.matmul %186, %49, %cst_49 {dimension_numbers = #tpu.dot_dimension_numbers<[1], [0], [0], [1], [0, 0, 1, 1], [], []>} : vector<16x32xbf16>, vector<32x128xbf16>, vector<16x128xf32> -> vector<16x128xf32>
    %188 = vector.broadcast %43 : vector<1x128xf32> to vector<16x128xf32>
    %189 = arith.addf %187, %188 : vector<16x128xf32>
    %cst_50 = arith.constant -1.702000e+00 : f32
    %190 = vector.broadcast %cst_50 : f32 to vector<16x128xf32>
    %191 = arith.mulf %190, %189 : vector<16x128xf32>
    %192 = math.exp %191 : vector<16x128xf32>
    %cst_51 = arith.constant 1.000000e+00 : f32
    %193 = vector.broadcast %cst_51 : f32 to vector<16x128xf32>
    %194 = arith.addf %193, %192 : vector<16x128xf32>
    %195 = tpu.reciprocal %194 {approx = true} : vector<16x128xf32> -> vector<16x128xf32>
    %196 = arith.mulf %189, %195 : vector<16x128xf32>
    %197 = arith.truncf %196 : vector<16x128xf32> to vector<16x128xbf16>
    %cst_52 = arith.constant dense<0.000000e+00> : vector<16x32xf32>
    %198 = tpu.matmul %197, %51, %cst_52 {dimension_numbers = #tpu.dot_dimension_numbers<[1], [0], [0], [1], [0, 0, 1, 1], [], []>} : vector<16x128xbf16>, vector<128x32xbf16>, vector<16x32xf32> -> vector<16x32xf32>
    %199 = arith.addf %163, %198 : vector<16x32xf32>
    %200 = vector.broadcast %44 : vector<1x32xf32> to vector<16x32xf32>
    %201 = arith.addf %199, %200 : vector<16x32xf32>
    %202 = arith.mulf %201, %6 : vector<16x32xf32>
    %c40 = arith.constant 40 : index
    %c0_53 = arith.constant 0 : index
    %203 = vector.load %arg4[%c40, %c0_53] : memref<104x32xf32, #tpu.memory_space<vmem>>, vector<16x32xf32>
    %204 = arith.addf %202, %203 : vector<16x32xf32>
    %c1 = arith.constant 1 : index
    %c0_54 = arith.constant 0 : index
    %c0_55 = arith.constant 0 : index
    %205 = vector.load %arg3[%c1, %c0_54, %c0_55] : memref<4x8x128xf32, #tpu.memory_space<vmem>>, vector<1x8x128xf32>
    %206 = vector.shape_cast %205 : vector<1x8x128xf32> to vector<8x128xf32>
    %207 = vector.extract_strided_slice %206 {offsets = [0, 0], sizes = [1, 32], strides = [1, 1]} : vector<8x128xf32> to vector<1x32xf32>
    %208 = vector.extract_strided_slice %206 {offsets = [1, 0], sizes = [1, 32], strides = [1, 1]} : vector<8x128xf32> to vector<1x32xf32>
    %209 = vector.extract_strided_slice %206 {offsets = [2, 0], sizes = [1, 96], strides = [1, 1]} : vector<8x128xf32> to vector<1x96xf32>
    %210 = vector.extract_strided_slice %206 {offsets = [3, 0], sizes = [1, 32], strides = [1, 1]} : vector<8x128xf32> to vector<1x32xf32>
    %211 = vector.extract_strided_slice %206 {offsets = [4, 0], sizes = [1, 32], strides = [1, 1]} : vector<8x128xf32> to vector<1x32xf32>
    %212 = vector.extract_strided_slice %206 {offsets = [5, 0], sizes = [1, 32], strides = [1, 1]} : vector<8x128xf32> to vector<1x32xf32>
    %213 = vector.extract_strided_slice %206 {offsets = [6, 0], sizes = [1, 128], strides = [1, 1]} : vector<8x128xf32> to vector<1x128xf32>
    %214 = vector.extract_strided_slice %206 {offsets = [7, 0], sizes = [1, 32], strides = [1, 1]} : vector<8x128xf32> to vector<1x32xf32>
    %c1_56 = arith.constant 1 : index
    %c0_57 = arith.constant 0 : index
    %c0_58 = arith.constant 0 : index
    %215 = vector.load %arg1[%c1_56, %c0_57, %c0_58] : memref<3x32x256xbf16, #tpu.memory_space<vmem>>, vector<1x32x256xbf16>
    %216 = vector.shape_cast %215 : vector<1x32x256xbf16> to vector<32x256xbf16>
    %217 = vector.extract_strided_slice %216 {offsets = [0, 0], sizes = [32, 96], strides = [1, 1]} : vector<32x256xbf16> to vector<32x96xbf16>
    %218 = vector.extract_strided_slice %216 {offsets = [0, 96], sizes = [32, 32], strides = [1, 1]} : vector<32x256xbf16> to vector<32x32xbf16>
    %219 = vector.extract_strided_slice %216 {offsets = [0, 128], sizes = [32, 128], strides = [1, 1]} : vector<32x256xbf16> to vector<32x128xbf16>
    %c1_59 = arith.constant 1 : index
    %c0_60 = arith.constant 0 : index
    %c0_61 = arith.constant 0 : index
    %220 = vector.load %arg2[%c1_59, %c0_60, %c0_61] : memref<3x128x32xbf16, #tpu.memory_space<vmem>>, vector<1x128x32xbf16>
    %221 = vector.shape_cast %220 : vector<1x128x32xbf16> to vector<128x32xbf16>
    %cst_62 = arith.constant dense<0.000000e+00> : vector<16xf32>
    %222 = vector.multi_reduction <add>, %204, %cst_62 [1] : vector<16x32xf32> to vector<16xf32>
    %223 = vector.shape_cast %222 : vector<16xf32> to vector<16x1xf32>
    %cst_63 = arith.constant 3.200000e+01 : f32
    %224 = vector.broadcast %cst_63 : f32 to vector<16x1xf32>
    %225 = arith.divf %223, %224 : vector<16x1xf32>
    %226 = vector.broadcast %225 : vector<16x1xf32> to vector<16x32xf32>
    %227 = arith.subf %204, %226 : vector<16x32xf32>
    %228 = arith.mulf %227, %227 : vector<16x32xf32>
    %cst_64 = arith.constant dense<0.000000e+00> : vector<16xf32>
    %229 = vector.multi_reduction <add>, %228, %cst_64 [1] : vector<16x32xf32> to vector<16xf32>
    %230 = vector.shape_cast %229 : vector<16xf32> to vector<16x1xf32>
    %cst_65 = arith.constant 3.200000e+01 : f32
    %231 = vector.broadcast %cst_65 : f32 to vector<16x1xf32>
    %232 = arith.divf %230, %231 : vector<16x1xf32>
    %233 = vector.broadcast %225 : vector<16x1xf32> to vector<16x32xf32>
    %234 = arith.subf %204, %233 : vector<16x32xf32>
    %cst_66 = arith.constant 9.99999974E-6 : f32
    %235 = vector.broadcast %cst_66 : f32 to vector<16x1xf32>
    %236 = arith.addf %232, %235 : vector<16x1xf32>
    %237 = math.rsqrt %236 : vector<16x1xf32>
    %238 = vector.broadcast %237 : vector<16x1xf32> to vector<16x32xf32>
    %239 = arith.mulf %234, %238 : vector<16x32xf32>
    %240 = vector.broadcast %207 : vector<1x32xf32> to vector<16x32xf32>
    %241 = arith.mulf %239, %240 : vector<16x32xf32>
    %242 = vector.broadcast %208 : vector<1x32xf32> to vector<16x32xf32>
    %243 = arith.addf %241, %242 : vector<16x32xf32>
    %244 = arith.truncf %243 : vector<16x32xf32> to vector<16x32xbf16>
    %cst_67 = arith.constant dense<0.000000e+00> : vector<16x96xf32>
    %245 = tpu.matmul %244, %217, %cst_67 {dimension_numbers = #tpu.dot_dimension_numbers<[1], [0], [0], [1], [0, 0, 1, 1], [], []>} : vector<16x32xbf16>, vector<32x96xbf16>, vector<16x96xf32> -> vector<16x96xf32>
    %246 = vector.broadcast %209 : vector<1x96xf32> to vector<16x96xf32>
    %247 = arith.addf %245, %246 : vector<16x96xf32>
    %248 = vector.extract_strided_slice %247 {offsets = [0, 0], sizes = [16, 32], strides = [1, 1]} : vector<16x96xf32> to vector<16x32xf32>
    %249 = arith.truncf %248 : vector<16x32xf32> to vector<16x32xbf16>
    %250 = vector.extract_strided_slice %247 {offsets = [0, 32], sizes = [16, 32], strides = [1, 1]} : vector<16x96xf32> to vector<16x32xf32>
    %251 = arith.truncf %250 : vector<16x32xf32> to vector<16x32xbf16>
    %252 = vector.shape_cast %251 : vector<16x32xbf16> to vector<2x8x32xbf16>
    %253 = vector.extract_strided_slice %247 {offsets = [0, 64], sizes = [16, 32], strides = [1, 1]} : vector<16x96xf32> to vector<16x32xf32>
    %254 = arith.truncf %253 : vector<16x32xf32> to vector<16x32xbf16>
    %c0_i32_68 = arith.constant 0 : i32
    %255 = arith.sitofp %c0_i32_68 : i32 to bf16
    %256 = vector.broadcast %255 : bf16 to vector<16x32xbf16>
    %257 = arith.select %19, %249, %256 : vector<16x32xi1>, vector<16x32xbf16>
    %258 = vector.shape_cast %257 : vector<16x32xbf16> to vector<2x8x32xbf16>
    "tpu.trace_start"() <{level = 10 : i32, message = "bqd,bkd->bqk"}> : () -> ()
    %cst_69 = arith.constant dense<0.000000e+00> : vector<2x8x8xf32>
    %259 = tpu.matmul %258, %252, %cst_69 {dimension_numbers = #tpu.dot_dimension_numbers<[2], [2], [1], [1], [0, 0, 0, 1, 1, 1], [0], [0]>} : vector<2x8x32xbf16>, vector<2x8x32xbf16>, vector<2x8x8xf32> -> vector<2x8x8xf32>
    "tpu.trace_stop"() : () -> ()
    %260 = vector.shape_cast %259 : vector<2x8x8xf32> to vector<16x8xf32>
    %c0_i32_70 = arith.constant 0 : i32
    %261 = arith.sitofp %c0_i32_70 : i32 to bf16
    %262 = vector.broadcast %261 : bf16 to vector<16x32xbf16>
    %263 = arith.select %24, %249, %262 : vector<16x32xi1>, vector<16x32xbf16>
    %264 = vector.shape_cast %263 : vector<16x32xbf16> to vector<2x8x32xbf16>
    "tpu.trace_start"() <{level = 10 : i32, message = "bqd,bkd->bqk"}> : () -> ()
    %cst_71 = arith.constant dense<0.000000e+00> : vector<2x8x8xf32>
    %265 = tpu.matmul %264, %252, %cst_71 {dimension_numbers = #tpu.dot_dimension_numbers<[2], [2], [1], [1], [0, 0, 0, 1, 1, 1], [0], [0]>} : vector<2x8x32xbf16>, vector<2x8x32xbf16>, vector<2x8x8xf32> -> vector<2x8x8xf32>
    "tpu.trace_stop"() : () -> ()
    %266 = vector.shape_cast %265 : vector<2x8x8xf32> to vector<16x8xf32>
    %c0_i32_72 = arith.constant 0 : i32
    %267 = arith.sitofp %c0_i32_72 : i32 to bf16
    %268 = vector.broadcast %267 : bf16 to vector<16x32xbf16>
    %269 = arith.select %29, %249, %268 : vector<16x32xi1>, vector<16x32xbf16>
    %270 = vector.shape_cast %269 : vector<16x32xbf16> to vector<2x8x32xbf16>
    "tpu.trace_start"() <{level = 10 : i32, message = "bqd,bkd->bqk"}> : () -> ()
    %cst_73 = arith.constant dense<0.000000e+00> : vector<2x8x8xf32>
    %271 = tpu.matmul %270, %252, %cst_73 {dimension_numbers = #tpu.dot_dimension_numbers<[2], [2], [1], [1], [0, 0, 0, 1, 1, 1], [0], [0]>} : vector<2x8x32xbf16>, vector<2x8x32xbf16>, vector<2x8x8xf32> -> vector<2x8x8xf32>
    "tpu.trace_stop"() : () -> ()
    %272 = vector.shape_cast %271 : vector<2x8x8xf32> to vector<16x8xf32>
    %c0_i32_74 = arith.constant 0 : i32
    %273 = arith.sitofp %c0_i32_74 : i32 to bf16
    %274 = vector.broadcast %273 : bf16 to vector<16x32xbf16>
    %275 = arith.select %34, %249, %274 : vector<16x32xi1>, vector<16x32xbf16>
    %276 = vector.shape_cast %275 : vector<16x32xbf16> to vector<2x8x32xbf16>
    "tpu.trace_start"() <{level = 10 : i32, message = "bqd,bkd->bqk"}> : () -> ()
    %cst_75 = arith.constant dense<0.000000e+00> : vector<2x8x8xf32>
    %277 = tpu.matmul %276, %252, %cst_75 {dimension_numbers = #tpu.dot_dimension_numbers<[2], [2], [1], [1], [0, 0, 0, 1, 1, 1], [0], [0]>} : vector<2x8x32xbf16>, vector<2x8x32xbf16>, vector<2x8x8xf32> -> vector<2x8x8xf32>
    "tpu.trace_stop"() : () -> ()
    %278 = vector.shape_cast %277 : vector<2x8x8xf32> to vector<16x8xf32>
    %279 = tpu.concatenate %260, %266, %272, %278 in 0 : vector<16x8xf32>, vector<16x8xf32>, vector<16x8xf32>, vector<16x8xf32> -> vector<64x8xf32>
    %cst_76 = arith.constant 0.353553385 : f32
    %280 = vector.broadcast %cst_76 : f32 to vector<64x8xf32>
    %281 = arith.mulf %279, %280 : vector<64x8xf32>
    %282 = arith.addf %281, %13 : vector<64x8xf32>
    %cst_77 = arith.constant dense<0xFF800000> : vector<64xf32>
    %283 = vector.multi_reduction <maximumf>, %282, %cst_77 [1] : vector<64x8xf32> to vector<64xf32>
    %284 = vector.shape_cast %283 : vector<64xf32> to vector<64x1xf32>
    %285 = vector.broadcast %284 : vector<64x1xf32> to vector<64x8xf32>
    %286 = arith.subf %282, %285 : vector<64x8xf32>
    %287 = math.exp %286 : vector<64x8xf32>
    %cst_78 = arith.constant dense<0.000000e+00> : vector<64xf32>
    %288 = vector.multi_reduction <add>, %287, %cst_78 [1] : vector<64x8xf32> to vector<64xf32>
    %289 = vector.shape_cast %288 : vector<64xf32> to vector<64x1xf32>
    %290 = tpu.reciprocal %289 {approx = true} : vector<64x1xf32> -> vector<64x1xf32>
    %291 = vector.broadcast %290 : vector<64x1xf32> to vector<64x8xf32>
    %292 = arith.mulf %287, %291 : vector<64x8xf32>
    %293 = arith.truncf %292 : vector<64x8xf32> to vector<64x8xbf16>
    %c0_i32_79 = arith.constant 0 : i32
    %294 = arith.sitofp %c0_i32_79 : i32 to bf16
    %295 = vector.broadcast %294 : bf16 to vector<16x32xbf16>
    %296 = arith.select %19, %254, %295 : vector<16x32xi1>, vector<16x32xbf16>
    %297 = vector.shape_cast %296 : vector<16x32xbf16> to vector<2x8x32xbf16>
    %298 = vector.extract_strided_slice %293 {offsets = [0, 0], sizes = [16, 8], strides = [1, 1]} : vector<64x8xbf16> to vector<16x8xbf16>
    %299 = vector.shape_cast %298 : vector<16x8xbf16> to vector<2x8x8xbf16>
    "tpu.trace_start"() <{level = 10 : i32, message = "bqk,bkd->bqd"}> : () -> ()
    %cst_80 = arith.constant dense<0.000000e+00> : vector<2x8x32xf32>
    %300 = tpu.matmul %299, %297, %cst_80 {dimension_numbers = #tpu.dot_dimension_numbers<[2], [1], [1], [2], [0, 0, 0, 1, 1, 2], [0], [0]>} : vector<2x8x8xbf16>, vector<2x8x32xbf16>, vector<2x8x32xf32> -> vector<2x8x32xf32>
    "tpu.trace_stop"() : () -> ()
    %301 = vector.shape_cast %300 : vector<2x8x32xf32> to vector<16x32xf32>
    %c0_i32_81 = arith.constant 0 : i32
    %302 = arith.sitofp %c0_i32_81 : i32 to bf16
    %303 = vector.broadcast %302 : bf16 to vector<16x32xbf16>
    %304 = arith.select %24, %254, %303 : vector<16x32xi1>, vector<16x32xbf16>
    %305 = vector.shape_cast %304 : vector<16x32xbf16> to vector<2x8x32xbf16>
    %306 = vector.extract_strided_slice %293 {offsets = [16, 0], sizes = [16, 8], strides = [1, 1]} : vector<64x8xbf16> to vector<16x8xbf16>
    %307 = vector.shape_cast %306 : vector<16x8xbf16> to vector<2x8x8xbf16>
    "tpu.trace_start"() <{level = 10 : i32, message = "bqk,bkd->bqd"}> : () -> ()
    %cst_82 = arith.constant dense<0.000000e+00> : vector<2x8x32xf32>
    %308 = tpu.matmul %307, %305, %cst_82 {dimension_numbers = #tpu.dot_dimension_numbers<[2], [1], [1], [2], [0, 0, 0, 1, 1, 2], [0], [0]>} : vector<2x8x8xbf16>, vector<2x8x32xbf16>, vector<2x8x32xf32> -> vector<2x8x32xf32>
    "tpu.trace_stop"() : () -> ()
    %309 = vector.shape_cast %308 : vector<2x8x32xf32> to vector<16x32xf32>
    %310 = arith.addf %301, %309 : vector<16x32xf32>
    %c0_i32_83 = arith.constant 0 : i32
    %311 = arith.sitofp %c0_i32_83 : i32 to bf16
    %312 = vector.broadcast %311 : bf16 to vector<16x32xbf16>
    %313 = arith.select %29, %254, %312 : vector<16x32xi1>, vector<16x32xbf16>
    %314 = vector.shape_cast %313 : vector<16x32xbf16> to vector<2x8x32xbf16>
    %315 = vector.extract_strided_slice %293 {offsets = [32, 0], sizes = [16, 8], strides = [1, 1]} : vector<64x8xbf16> to vector<16x8xbf16>
    %316 = vector.shape_cast %315 : vector<16x8xbf16> to vector<2x8x8xbf16>
    "tpu.trace_start"() <{level = 10 : i32, message = "bqk,bkd->bqd"}> : () -> ()
    %cst_84 = arith.constant dense<0.000000e+00> : vector<2x8x32xf32>
    %317 = tpu.matmul %316, %314, %cst_84 {dimension_numbers = #tpu.dot_dimension_numbers<[2], [1], [1], [2], [0, 0, 0, 1, 1, 2], [0], [0]>} : vector<2x8x8xbf16>, vector<2x8x32xbf16>, vector<2x8x32xf32> -> vector<2x8x32xf32>
    "tpu.trace_stop"() : () -> ()
    %318 = vector.shape_cast %317 : vector<2x8x32xf32> to vector<16x32xf32>
    %319 = arith.addf %310, %318 : vector<16x32xf32>
    %c0_i32_85 = arith.constant 0 : i32
    %320 = arith.sitofp %c0_i32_85 : i32 to bf16
    %321 = vector.broadcast %320 : bf16 to vector<16x32xbf16>
    %322 = arith.select %34, %254, %321 : vector<16x32xi1>, vector<16x32xbf16>
    %323 = vector.shape_cast %322 : vector<16x32xbf16> to vector<2x8x32xbf16>
    %324 = vector.extract_strided_slice %293 {offsets = [48, 0], sizes = [16, 8], strides = [1, 1]} : vector<64x8xbf16> to vector<16x8xbf16>
    %325 = vector.shape_cast %324 : vector<16x8xbf16> to vector<2x8x8xbf16>
    "tpu.trace_start"() <{level = 10 : i32, message = "bqk,bkd->bqd"}> : () -> ()
    %cst_86 = arith.constant dense<0.000000e+00> : vector<2x8x32xf32>
    %326 = tpu.matmul %325, %323, %cst_86 {dimension_numbers = #tpu.dot_dimension_numbers<[2], [1], [1], [2], [0, 0, 0, 1, 1, 2], [0], [0]>} : vector<2x8x8xbf16>, vector<2x8x32xbf16>, vector<2x8x32xf32> -> vector<2x8x32xf32>
    "tpu.trace_stop"() : () -> ()
    %327 = vector.shape_cast %326 : vector<2x8x32xf32> to vector<16x32xf32>
    %328 = arith.addf %319, %327 : vector<16x32xf32>
    %329 = arith.truncf %328 : vector<16x32xf32> to vector<16x32xbf16>
    %cst_87 = arith.constant dense<0.000000e+00> : vector<16x32xf32>
    %330 = tpu.matmul %329, %218, %cst_87 {dimension_numbers = #tpu.dot_dimension_numbers<[1], [0], [0], [1], [0, 0, 1, 1], [], []>} : vector<16x32xbf16>, vector<32x32xbf16>, vector<16x32xf32> -> vector<16x32xf32>
    %331 = arith.addf %204, %330 : vector<16x32xf32>
    %332 = vector.broadcast %210 : vector<1x32xf32> to vector<16x32xf32>
    %333 = arith.addf %331, %332 : vector<16x32xf32>
    %cst_88 = arith.constant dense<0.000000e+00> : vector<16xf32>
    %334 = vector.multi_reduction <add>, %333, %cst_88 [1] : vector<16x32xf32> to vector<16xf32>
    %335 = vector.shape_cast %334 : vector<16xf32> to vector<16x1xf32>
    %cst_89 = arith.constant 3.200000e+01 : f32
    %336 = vector.broadcast %cst_89 : f32 to vector<16x1xf32>
    %337 = arith.divf %335, %336 : vector<16x1xf32>
    %338 = vector.broadcast %337 : vector<16x1xf32> to vector<16x32xf32>
    %339 = arith.subf %333, %338 : vector<16x32xf32>
    %340 = arith.mulf %339, %339 : vector<16x32xf32>
    %cst_90 = arith.constant dense<0.000000e+00> : vector<16xf32>
    %341 = vector.multi_reduction <add>, %340, %cst_90 [1] : vector<16x32xf32> to vector<16xf32>
    %342 = vector.shape_cast %341 : vector<16xf32> to vector<16x1xf32>
    %cst_91 = arith.constant 3.200000e+01 : f32
    %343 = vector.broadcast %cst_91 : f32 to vector<16x1xf32>
    %344 = arith.divf %342, %343 : vector<16x1xf32>
    %345 = vector.broadcast %337 : vector<16x1xf32> to vector<16x32xf32>
    %346 = arith.subf %333, %345 : vector<16x32xf32>
    %cst_92 = arith.constant 9.99999974E-6 : f32
    %347 = vector.broadcast %cst_92 : f32 to vector<16x1xf32>
    %348 = arith.addf %344, %347 : vector<16x1xf32>
    %349 = math.rsqrt %348 : vector<16x1xf32>
    %350 = vector.broadcast %349 : vector<16x1xf32> to vector<16x32xf32>
    %351 = arith.mulf %346, %350 : vector<16x32xf32>
    %352 = vector.broadcast %211 : vector<1x32xf32> to vector<16x32xf32>
    %353 = arith.mulf %351, %352 : vector<16x32xf32>
    %354 = vector.broadcast %212 : vector<1x32xf32> to vector<16x32xf32>
    %355 = arith.addf %353, %354 : vector<16x32xf32>
    %356 = arith.truncf %355 : vector<16x32xf32> to vector<16x32xbf16>
    %cst_93 = arith.constant dense<0.000000e+00> : vector<16x128xf32>
    %357 = tpu.matmul %356, %219, %cst_93 {dimension_numbers = #tpu.dot_dimension_numbers<[1], [0], [0], [1], [0, 0, 1, 1], [], []>} : vector<16x32xbf16>, vector<32x128xbf16>, vector<16x128xf32> -> vector<16x128xf32>
    %358 = vector.broadcast %213 : vector<1x128xf32> to vector<16x128xf32>
    %359 = arith.addf %357, %358 : vector<16x128xf32>
    %cst_94 = arith.constant -1.702000e+00 : f32
    %360 = vector.broadcast %cst_94 : f32 to vector<16x128xf32>
    %361 = arith.mulf %360, %359 : vector<16x128xf32>
    %362 = math.exp %361 : vector<16x128xf32>
    %cst_95 = arith.constant 1.000000e+00 : f32
    %363 = vector.broadcast %cst_95 : f32 to vector<16x128xf32>
    %364 = arith.addf %363, %362 : vector<16x128xf32>
    %365 = tpu.reciprocal %364 {approx = true} : vector<16x128xf32> -> vector<16x128xf32>
    %366 = arith.mulf %359, %365 : vector<16x128xf32>
    %367 = arith.truncf %366 : vector<16x128xf32> to vector<16x128xbf16>
    %cst_96 = arith.constant dense<0.000000e+00> : vector<16x32xf32>
    %368 = tpu.matmul %367, %221, %cst_96 {dimension_numbers = #tpu.dot_dimension_numbers<[1], [0], [0], [1], [0, 0, 1, 1], [], []>} : vector<16x128xbf16>, vector<128x32xbf16>, vector<16x32xf32> -> vector<16x32xf32>
    %369 = arith.addf %333, %368 : vector<16x32xf32>
    %370 = vector.broadcast %214 : vector<1x32xf32> to vector<16x32xf32>
    %371 = arith.addf %369, %370 : vector<16x32xf32>
    %372 = arith.mulf %371, %6 : vector<16x32xf32>
    %c56 = arith.constant 56 : index
    %c0_97 = arith.constant 0 : index
    %373 = vector.load %arg4[%c56, %c0_97] : memref<104x32xf32, #tpu.memory_space<vmem>>, vector<16x32xf32>
    %374 = arith.addf %372, %373 : vector<16x32xf32>
    %c2 = arith.constant 2 : index
    %c0_98 = arith.constant 0 : index
    %c0_99 = arith.constant 0 : index
    %375 = vector.load %arg3[%c2, %c0_98, %c0_99] : memref<4x8x128xf32, #tpu.memory_space<vmem>>, vector<1x8x128xf32>
    %376 = vector.shape_cast %375 : vector<1x8x128xf32> to vector<8x128xf32>
    %377 = vector.extract_strided_slice %376 {offsets = [0, 0], sizes = [1, 32], strides = [1, 1]} : vector<8x128xf32> to vector<1x32xf32>
    %378 = vector.extract_strided_slice %376 {offsets = [1, 0], sizes = [1, 32], strides = [1, 1]} : vector<8x128xf32> to vector<1x32xf32>
    %379 = vector.extract_strided_slice %376 {offsets = [2, 0], sizes = [1, 96], strides = [1, 1]} : vector<8x128xf32> to vector<1x96xf32>
    %380 = vector.extract_strided_slice %376 {offsets = [3, 0], sizes = [1, 32], strides = [1, 1]} : vector<8x128xf32> to vector<1x32xf32>
    %381 = vector.extract_strided_slice %376 {offsets = [4, 0], sizes = [1, 32], strides = [1, 1]} : vector<8x128xf32> to vector<1x32xf32>
    %382 = vector.extract_strided_slice %376 {offsets = [5, 0], sizes = [1, 32], strides = [1, 1]} : vector<8x128xf32> to vector<1x32xf32>
    %383 = vector.extract_strided_slice %376 {offsets = [6, 0], sizes = [1, 128], strides = [1, 1]} : vector<8x128xf32> to vector<1x128xf32>
    %384 = vector.extract_strided_slice %376 {offsets = [7, 0], sizes = [1, 32], strides = [1, 1]} : vector<8x128xf32> to vector<1x32xf32>
    %c2_100 = arith.constant 2 : index
    %c0_101 = arith.constant 0 : index
    %c0_102 = arith.constant 0 : index
    %385 = vector.load %arg1[%c2_100, %c0_101, %c0_102] : memref<3x32x256xbf16, #tpu.memory_space<vmem>>, vector<1x32x256xbf16>
    %386 = vector.shape_cast %385 : vector<1x32x256xbf16> to vector<32x256xbf16>
    %387 = vector.extract_strided_slice %386 {offsets = [0, 0], sizes = [32, 96], strides = [1, 1]} : vector<32x256xbf16> to vector<32x96xbf16>
    %388 = vector.extract_strided_slice %386 {offsets = [0, 96], sizes = [32, 32], strides = [1, 1]} : vector<32x256xbf16> to vector<32x32xbf16>
    %389 = vector.extract_strided_slice %386 {offsets = [0, 128], sizes = [32, 128], strides = [1, 1]} : vector<32x256xbf16> to vector<32x128xbf16>
    %c2_103 = arith.constant 2 : index
    %c0_104 = arith.constant 0 : index
    %c0_105 = arith.constant 0 : index
    %390 = vector.load %arg2[%c2_103, %c0_104, %c0_105] : memref<3x128x32xbf16, #tpu.memory_space<vmem>>, vector<1x128x32xbf16>
    %391 = vector.shape_cast %390 : vector<1x128x32xbf16> to vector<128x32xbf16>
    %cst_106 = arith.constant dense<0.000000e+00> : vector<16xf32>
    %392 = vector.multi_reduction <add>, %374, %cst_106 [1] : vector<16x32xf32> to vector<16xf32>
    %393 = vector.shape_cast %392 : vector<16xf32> to vector<16x1xf32>
    %cst_107 = arith.constant 3.200000e+01 : f32
    %394 = vector.broadcast %cst_107 : f32 to vector<16x1xf32>
    %395 = arith.divf %393, %394 : vector<16x1xf32>
    %396 = vector.broadcast %395 : vector<16x1xf32> to vector<16x32xf32>
    %397 = arith.subf %374, %396 : vector<16x32xf32>
    %398 = arith.mulf %397, %397 : vector<16x32xf32>
    %cst_108 = arith.constant dense<0.000000e+00> : vector<16xf32>
    %399 = vector.multi_reduction <add>, %398, %cst_108 [1] : vector<16x32xf32> to vector<16xf32>
    %400 = vector.shape_cast %399 : vector<16xf32> to vector<16x1xf32>
    %cst_109 = arith.constant 3.200000e+01 : f32
    %401 = vector.broadcast %cst_109 : f32 to vector<16x1xf32>
    %402 = arith.divf %400, %401 : vector<16x1xf32>
    %403 = vector.broadcast %395 : vector<16x1xf32> to vector<16x32xf32>
    %404 = arith.subf %374, %403 : vector<16x32xf32>
    %cst_110 = arith.constant 9.99999974E-6 : f32
    %405 = vector.broadcast %cst_110 : f32 to vector<16x1xf32>
    %406 = arith.addf %402, %405 : vector<16x1xf32>
    %407 = math.rsqrt %406 : vector<16x1xf32>
    %408 = vector.broadcast %407 : vector<16x1xf32> to vector<16x32xf32>
    %409 = arith.mulf %404, %408 : vector<16x32xf32>
    %410 = vector.broadcast %377 : vector<1x32xf32> to vector<16x32xf32>
    %411 = arith.mulf %409, %410 : vector<16x32xf32>
    %412 = vector.broadcast %378 : vector<1x32xf32> to vector<16x32xf32>
    %413 = arith.addf %411, %412 : vector<16x32xf32>
    %414 = arith.truncf %413 : vector<16x32xf32> to vector<16x32xbf16>
    %cst_111 = arith.constant dense<0.000000e+00> : vector<16x96xf32>
    %415 = tpu.matmul %414, %387, %cst_111 {dimension_numbers = #tpu.dot_dimension_numbers<[1], [0], [0], [1], [0, 0, 1, 1], [], []>} : vector<16x32xbf16>, vector<32x96xbf16>, vector<16x96xf32> -> vector<16x96xf32>
    %416 = vector.broadcast %379 : vector<1x96xf32> to vector<16x96xf32>
    %417 = arith.addf %415, %416 : vector<16x96xf32>
    %418 = vector.extract_strided_slice %417 {offsets = [0, 0], sizes = [16, 32], strides = [1, 1]} : vector<16x96xf32> to vector<16x32xf32>
    %419 = arith.truncf %418 : vector<16x32xf32> to vector<16x32xbf16>
    %420 = vector.extract_strided_slice %417 {offsets = [0, 32], sizes = [16, 32], strides = [1, 1]} : vector<16x96xf32> to vector<16x32xf32>
    %421 = arith.truncf %420 : vector<16x32xf32> to vector<16x32xbf16>
    %422 = vector.shape_cast %421 : vector<16x32xbf16> to vector<2x8x32xbf16>
    %423 = vector.extract_strided_slice %417 {offsets = [0, 64], sizes = [16, 32], strides = [1, 1]} : vector<16x96xf32> to vector<16x32xf32>
    %424 = arith.truncf %423 : vector<16x32xf32> to vector<16x32xbf16>
    %c0_i32_112 = arith.constant 0 : i32
    %425 = arith.sitofp %c0_i32_112 : i32 to bf16
    %426 = vector.broadcast %425 : bf16 to vector<16x32xbf16>
    %427 = arith.select %19, %419, %426 : vector<16x32xi1>, vector<16x32xbf16>
    %428 = vector.shape_cast %427 : vector<16x32xbf16> to vector<2x8x32xbf16>
    "tpu.trace_start"() <{level = 10 : i32, message = "bqd,bkd->bqk"}> : () -> ()
    %cst_113 = arith.constant dense<0.000000e+00> : vector<2x8x8xf32>
    %429 = tpu.matmul %428, %422, %cst_113 {dimension_numbers = #tpu.dot_dimension_numbers<[2], [2], [1], [1], [0, 0, 0, 1, 1, 1], [0], [0]>} : vector<2x8x32xbf16>, vector<2x8x32xbf16>, vector<2x8x8xf32> -> vector<2x8x8xf32>
    "tpu.trace_stop"() : () -> ()
    %430 = vector.shape_cast %429 : vector<2x8x8xf32> to vector<16x8xf32>
    %c0_i32_114 = arith.constant 0 : i32
    %431 = arith.sitofp %c0_i32_114 : i32 to bf16
    %432 = vector.broadcast %431 : bf16 to vector<16x32xbf16>
    %433 = arith.select %24, %419, %432 : vector<16x32xi1>, vector<16x32xbf16>
    %434 = vector.shape_cast %433 : vector<16x32xbf16> to vector<2x8x32xbf16>
    "tpu.trace_start"() <{level = 10 : i32, message = "bqd,bkd->bqk"}> : () -> ()
    %cst_115 = arith.constant dense<0.000000e+00> : vector<2x8x8xf32>
    %435 = tpu.matmul %434, %422, %cst_115 {dimension_numbers = #tpu.dot_dimension_numbers<[2], [2], [1], [1], [0, 0, 0, 1, 1, 1], [0], [0]>} : vector<2x8x32xbf16>, vector<2x8x32xbf16>, vector<2x8x8xf32> -> vector<2x8x8xf32>
    "tpu.trace_stop"() : () -> ()
    %436 = vector.shape_cast %435 : vector<2x8x8xf32> to vector<16x8xf32>
    %c0_i32_116 = arith.constant 0 : i32
    %437 = arith.sitofp %c0_i32_116 : i32 to bf16
    %438 = vector.broadcast %437 : bf16 to vector<16x32xbf16>
    %439 = arith.select %29, %419, %438 : vector<16x32xi1>, vector<16x32xbf16>
    %440 = vector.shape_cast %439 : vector<16x32xbf16> to vector<2x8x32xbf16>
    "tpu.trace_start"() <{level = 10 : i32, message = "bqd,bkd->bqk"}> : () -> ()
    %cst_117 = arith.constant dense<0.000000e+00> : vector<2x8x8xf32>
    %441 = tpu.matmul %440, %422, %cst_117 {dimension_numbers = #tpu.dot_dimension_numbers<[2], [2], [1], [1], [0, 0, 0, 1, 1, 1], [0], [0]>} : vector<2x8x32xbf16>, vector<2x8x32xbf16>, vector<2x8x8xf32> -> vector<2x8x8xf32>
    "tpu.trace_stop"() : () -> ()
    %442 = vector.shape_cast %441 : vector<2x8x8xf32> to vector<16x8xf32>
    %c0_i32_118 = arith.constant 0 : i32
    %443 = arith.sitofp %c0_i32_118 : i32 to bf16
    %444 = vector.broadcast %443 : bf16 to vector<16x32xbf16>
    %445 = arith.select %34, %419, %444 : vector<16x32xi1>, vector<16x32xbf16>
    %446 = vector.shape_cast %445 : vector<16x32xbf16> to vector<2x8x32xbf16>
    "tpu.trace_start"() <{level = 10 : i32, message = "bqd,bkd->bqk"}> : () -> ()
    %cst_119 = arith.constant dense<0.000000e+00> : vector<2x8x8xf32>
    %447 = tpu.matmul %446, %422, %cst_119 {dimension_numbers = #tpu.dot_dimension_numbers<[2], [2], [1], [1], [0, 0, 0, 1, 1, 1], [0], [0]>} : vector<2x8x32xbf16>, vector<2x8x32xbf16>, vector<2x8x8xf32> -> vector<2x8x8xf32>
    "tpu.trace_stop"() : () -> ()
    %448 = vector.shape_cast %447 : vector<2x8x8xf32> to vector<16x8xf32>
    %449 = tpu.concatenate %430, %436, %442, %448 in 0 : vector<16x8xf32>, vector<16x8xf32>, vector<16x8xf32>, vector<16x8xf32> -> vector<64x8xf32>
    %cst_120 = arith.constant 0.353553385 : f32
    %450 = vector.broadcast %cst_120 : f32 to vector<64x8xf32>
    %451 = arith.mulf %449, %450 : vector<64x8xf32>
    %452 = arith.addf %451, %13 : vector<64x8xf32>
    %cst_121 = arith.constant dense<0xFF800000> : vector<64xf32>
    %453 = vector.multi_reduction <maximumf>, %452, %cst_121 [1] : vector<64x8xf32> to vector<64xf32>
    %454 = vector.shape_cast %453 : vector<64xf32> to vector<64x1xf32>
    %455 = vector.broadcast %454 : vector<64x1xf32> to vector<64x8xf32>
    %456 = arith.subf %452, %455 : vector<64x8xf32>
    %457 = math.exp %456 : vector<64x8xf32>
    %cst_122 = arith.constant dense<0.000000e+00> : vector<64xf32>
    %458 = vector.multi_reduction <add>, %457, %cst_122 [1] : vector<64x8xf32> to vector<64xf32>
    %459 = vector.shape_cast %458 : vector<64xf32> to vector<64x1xf32>
    %460 = tpu.reciprocal %459 {approx = true} : vector<64x1xf32> -> vector<64x1xf32>
    %461 = vector.broadcast %460 : vector<64x1xf32> to vector<64x8xf32>
    %462 = arith.mulf %457, %461 : vector<64x8xf32>
    %463 = arith.truncf %462 : vector<64x8xf32> to vector<64x8xbf16>
    %c0_i32_123 = arith.constant 0 : i32
    %464 = arith.sitofp %c0_i32_123 : i32 to bf16
    %465 = vector.broadcast %464 : bf16 to vector<16x32xbf16>
    %466 = arith.select %19, %424, %465 : vector<16x32xi1>, vector<16x32xbf16>
    %467 = vector.shape_cast %466 : vector<16x32xbf16> to vector<2x8x32xbf16>
    %468 = vector.extract_strided_slice %463 {offsets = [0, 0], sizes = [16, 8], strides = [1, 1]} : vector<64x8xbf16> to vector<16x8xbf16>
    %469 = vector.shape_cast %468 : vector<16x8xbf16> to vector<2x8x8xbf16>
    "tpu.trace_start"() <{level = 10 : i32, message = "bqk,bkd->bqd"}> : () -> ()
    %cst_124 = arith.constant dense<0.000000e+00> : vector<2x8x32xf32>
    %470 = tpu.matmul %469, %467, %cst_124 {dimension_numbers = #tpu.dot_dimension_numbers<[2], [1], [1], [2], [0, 0, 0, 1, 1, 2], [0], [0]>} : vector<2x8x8xbf16>, vector<2x8x32xbf16>, vector<2x8x32xf32> -> vector<2x8x32xf32>
    "tpu.trace_stop"() : () -> ()
    %471 = vector.shape_cast %470 : vector<2x8x32xf32> to vector<16x32xf32>
    %c0_i32_125 = arith.constant 0 : i32
    %472 = arith.sitofp %c0_i32_125 : i32 to bf16
    %473 = vector.broadcast %472 : bf16 to vector<16x32xbf16>
    %474 = arith.select %24, %424, %473 : vector<16x32xi1>, vector<16x32xbf16>
    %475 = vector.shape_cast %474 : vector<16x32xbf16> to vector<2x8x32xbf16>
    %476 = vector.extract_strided_slice %463 {offsets = [16, 0], sizes = [16, 8], strides = [1, 1]} : vector<64x8xbf16> to vector<16x8xbf16>
    %477 = vector.shape_cast %476 : vector<16x8xbf16> to vector<2x8x8xbf16>
    "tpu.trace_start"() <{level = 10 : i32, message = "bqk,bkd->bqd"}> : () -> ()
    %cst_126 = arith.constant dense<0.000000e+00> : vector<2x8x32xf32>
    %478 = tpu.matmul %477, %475, %cst_126 {dimension_numbers = #tpu.dot_dimension_numbers<[2], [1], [1], [2], [0, 0, 0, 1, 1, 2], [0], [0]>} : vector<2x8x8xbf16>, vector<2x8x32xbf16>, vector<2x8x32xf32> -> vector<2x8x32xf32>
    "tpu.trace_stop"() : () -> ()
    %479 = vector.shape_cast %478 : vector<2x8x32xf32> to vector<16x32xf32>
    %480 = arith.addf %471, %479 : vector<16x32xf32>
    %c0_i32_127 = arith.constant 0 : i32
    %481 = arith.sitofp %c0_i32_127 : i32 to bf16
    %482 = vector.broadcast %481 : bf16 to vector<16x32xbf16>
    %483 = arith.select %29, %424, %482 : vector<16x32xi1>, vector<16x32xbf16>
    %484 = vector.shape_cast %483 : vector<16x32xbf16> to vector<2x8x32xbf16>
    %485 = vector.extract_strided_slice %463 {offsets = [32, 0], sizes = [16, 8], strides = [1, 1]} : vector<64x8xbf16> to vector<16x8xbf16>
    %486 = vector.shape_cast %485 : vector<16x8xbf16> to vector<2x8x8xbf16>
    "tpu.trace_start"() <{level = 10 : i32, message = "bqk,bkd->bqd"}> : () -> ()
    %cst_128 = arith.constant dense<0.000000e+00> : vector<2x8x32xf32>
    %487 = tpu.matmul %486, %484, %cst_128 {dimension_numbers = #tpu.dot_dimension_numbers<[2], [1], [1], [2], [0, 0, 0, 1, 1, 2], [0], [0]>} : vector<2x8x8xbf16>, vector<2x8x32xbf16>, vector<2x8x32xf32> -> vector<2x8x32xf32>
    "tpu.trace_stop"() : () -> ()
    %488 = vector.shape_cast %487 : vector<2x8x32xf32> to vector<16x32xf32>
    %489 = arith.addf %480, %488 : vector<16x32xf32>
    %c0_i32_129 = arith.constant 0 : i32
    %490 = arith.sitofp %c0_i32_129 : i32 to bf16
    %491 = vector.broadcast %490 : bf16 to vector<16x32xbf16>
    %492 = arith.select %34, %424, %491 : vector<16x32xi1>, vector<16x32xbf16>
    %493 = vector.shape_cast %492 : vector<16x32xbf16> to vector<2x8x32xbf16>
    %494 = vector.extract_strided_slice %463 {offsets = [48, 0], sizes = [16, 8], strides = [1, 1]} : vector<64x8xbf16> to vector<16x8xbf16>
    %495 = vector.shape_cast %494 : vector<16x8xbf16> to vector<2x8x8xbf16>
    "tpu.trace_start"() <{level = 10 : i32, message = "bqk,bkd->bqd"}> : () -> ()
    %cst_130 = arith.constant dense<0.000000e+00> : vector<2x8x32xf32>
    %496 = tpu.matmul %495, %493, %cst_130 {dimension_numbers = #tpu.dot_dimension_numbers<[2], [1], [1], [2], [0, 0, 0, 1, 1, 2], [0], [0]>} : vector<2x8x8xbf16>, vector<2x8x32xbf16>, vector<2x8x32xf32> -> vector<2x8x32xf32>
    "tpu.trace_stop"() : () -> ()
    %497 = vector.shape_cast %496 : vector<2x8x32xf32> to vector<16x32xf32>
    %498 = arith.addf %489, %497 : vector<16x32xf32>
    %499 = arith.truncf %498 : vector<16x32xf32> to vector<16x32xbf16>
    %cst_131 = arith.constant dense<0.000000e+00> : vector<16x32xf32>
    %500 = tpu.matmul %499, %388, %cst_131 {dimension_numbers = #tpu.dot_dimension_numbers<[1], [0], [0], [1], [0, 0, 1, 1], [], []>} : vector<16x32xbf16>, vector<32x32xbf16>, vector<16x32xf32> -> vector<16x32xf32>
    %501 = arith.addf %374, %500 : vector<16x32xf32>
    %502 = vector.broadcast %380 : vector<1x32xf32> to vector<16x32xf32>
    %503 = arith.addf %501, %502 : vector<16x32xf32>
    %cst_132 = arith.constant dense<0.000000e+00> : vector<16xf32>
    %504 = vector.multi_reduction <add>, %503, %cst_132 [1] : vector<16x32xf32> to vector<16xf32>
    %505 = vector.shape_cast %504 : vector<16xf32> to vector<16x1xf32>
    %cst_133 = arith.constant 3.200000e+01 : f32
    %506 = vector.broadcast %cst_133 : f32 to vector<16x1xf32>
    %507 = arith.divf %505, %506 : vector<16x1xf32>
    %508 = vector.broadcast %507 : vector<16x1xf32> to vector<16x32xf32>
    %509 = arith.subf %503, %508 : vector<16x32xf32>
    %510 = arith.mulf %509, %509 : vector<16x32xf32>
    %cst_134 = arith.constant dense<0.000000e+00> : vector<16xf32>
    %511 = vector.multi_reduction <add>, %510, %cst_134 [1] : vector<16x32xf32> to vector<16xf32>
    %512 = vector.shape_cast %511 : vector<16xf32> to vector<16x1xf32>
    %cst_135 = arith.constant 3.200000e+01 : f32
    %513 = vector.broadcast %cst_135 : f32 to vector<16x1xf32>
    %514 = arith.divf %512, %513 : vector<16x1xf32>
    %515 = vector.broadcast %507 : vector<16x1xf32> to vector<16x32xf32>
    %516 = arith.subf %503, %515 : vector<16x32xf32>
    %cst_136 = arith.constant 9.99999974E-6 : f32
    %517 = vector.broadcast %cst_136 : f32 to vector<16x1xf32>
    %518 = arith.addf %514, %517 : vector<16x1xf32>
    %519 = math.rsqrt %518 : vector<16x1xf32>
    %520 = vector.broadcast %519 : vector<16x1xf32> to vector<16x32xf32>
    %521 = arith.mulf %516, %520 : vector<16x32xf32>
    %522 = vector.broadcast %381 : vector<1x32xf32> to vector<16x32xf32>
    %523 = arith.mulf %521, %522 : vector<16x32xf32>
    %524 = vector.broadcast %382 : vector<1x32xf32> to vector<16x32xf32>
    %525 = arith.addf %523, %524 : vector<16x32xf32>
    %526 = arith.truncf %525 : vector<16x32xf32> to vector<16x32xbf16>
    %cst_137 = arith.constant dense<0.000000e+00> : vector<16x128xf32>
    %527 = tpu.matmul %526, %389, %cst_137 {dimension_numbers = #tpu.dot_dimension_numbers<[1], [0], [0], [1], [0, 0, 1, 1], [], []>} : vector<16x32xbf16>, vector<32x128xbf16>, vector<16x128xf32> -> vector<16x128xf32>
    %528 = vector.broadcast %383 : vector<1x128xf32> to vector<16x128xf32>
    %529 = arith.addf %527, %528 : vector<16x128xf32>
    %cst_138 = arith.constant -1.702000e+00 : f32
    %530 = vector.broadcast %cst_138 : f32 to vector<16x128xf32>
    %531 = arith.mulf %530, %529 : vector<16x128xf32>
    %532 = math.exp %531 : vector<16x128xf32>
    %cst_139 = arith.constant 1.000000e+00 : f32
    %533 = vector.broadcast %cst_139 : f32 to vector<16x128xf32>
    %534 = arith.addf %533, %532 : vector<16x128xf32>
    %535 = tpu.reciprocal %534 {approx = true} : vector<16x128xf32> -> vector<16x128xf32>
    %536 = arith.mulf %529, %535 : vector<16x128xf32>
    %537 = arith.truncf %536 : vector<16x128xf32> to vector<16x128xbf16>
    %cst_140 = arith.constant dense<0.000000e+00> : vector<16x32xf32>
    %538 = tpu.matmul %537, %391, %cst_140 {dimension_numbers = #tpu.dot_dimension_numbers<[1], [0], [0], [1], [0, 0, 1, 1], [], []>} : vector<16x128xbf16>, vector<128x32xbf16>, vector<16x32xf32> -> vector<16x32xf32>
    %539 = arith.addf %503, %538 : vector<16x32xf32>
    %540 = vector.broadcast %384 : vector<1x32xf32> to vector<16x32xf32>
    %541 = arith.addf %539, %540 : vector<16x32xf32>
    %c88 = arith.constant 88 : index
    %c0_141 = arith.constant 0 : index
    %542 = vector.load %arg4[%c88, %c0_141] : memref<104x32xf32, #tpu.memory_space<vmem>>, vector<16x32xf32>
    %543 = arith.mulf %541, %542 : vector<16x32xf32>
    %c3 = arith.constant 3 : index
    %c0_142 = arith.constant 0 : index
    %c0_143 = arith.constant 0 : index
    %544 = vector.load %arg3[%c3, %c0_142, %c0_143] : memref<4x8x128xf32, #tpu.memory_space<vmem>>, vector<1x8x128xf32>
    %545 = vector.shape_cast %544 : vector<1x8x128xf32> to vector<8x128xf32>
    %546 = vector.extract_strided_slice %545 {offsets = [0, 0], sizes = [1, 32], strides = [1, 1]} : vector<8x128xf32> to vector<1x32xf32>
    %547 = vector.extract_strided_slice %545 {offsets = [1, 0], sizes = [1, 32], strides = [1, 1]} : vector<8x128xf32> to vector<1x32xf32>
    %c8 = arith.constant 8 : index
    %c0_144 = arith.constant 0 : index
    %548 = vector.load %arg4[%c8, %c0_144] : memref<104x32xf32, #tpu.memory_space<vmem>>, vector<32x32xf32>
    %549 = arith.truncf %548 : vector<32x32xf32> to vector<32x32xbf16>
    %550 = vector.extract_strided_slice %543 {offsets = [0, 0], sizes = [8, 32], strides = [1, 1]} : vector<16x32xf32> to vector<8x32xf32>
    %cst_145 = arith.constant dense<0.000000e+00> : vector<32xf32>
    %551 = vector.multi_reduction <add>, %550, %cst_145 [0] : vector<8x32xf32> to vector<32xf32>
    %552 = vector.shape_cast %551 : vector<32xf32> to vector<1x32xf32>
    %cst_146 = arith.constant dense<0.000000e+00> : vector<1xf32>
    %553 = vector.multi_reduction <add>, %552, %cst_146 [1] : vector<1x32xf32> to vector<1xf32>
    %554 = vector.shape_cast %553 : vector<1xf32> to vector<1x1xf32>
    %cst_147 = arith.constant 3.200000e+01 : f32
    %555 = vector.broadcast %cst_147 : f32 to vector<1x1xf32>
    %556 = arith.divf %554, %555 : vector<1x1xf32>
    %557 = vector.broadcast %556 : vector<1x1xf32> to vector<1x32xf32>
    %558 = arith.subf %552, %557 : vector<1x32xf32>
    %559 = arith.mulf %558, %558 : vector<1x32xf32>
    %cst_148 = arith.constant dense<0.000000e+00> : vector<1xf32>
    %560 = vector.multi_reduction <add>, %559, %cst_148 [1] : vector<1x32xf32> to vector<1xf32>
    %561 = vector.shape_cast %560 : vector<1xf32> to vector<1x1xf32>
    %cst_149 = arith.constant 3.200000e+01 : f32
    %562 = vector.broadcast %cst_149 : f32 to vector<1x1xf32>
    %563 = arith.divf %561, %562 : vector<1x1xf32>
    %564 = vector.broadcast %556 : vector<1x1xf32> to vector<1x32xf32>
    %565 = arith.subf %552, %564 : vector<1x32xf32>
    %cst_150 = arith.constant 9.99999974E-6 : f32
    %566 = vector.broadcast %cst_150 : f32 to vector<1x1xf32>
    %567 = arith.addf %563, %566 : vector<1x1xf32>
    %568 = math.rsqrt %567 : vector<1x1xf32>
    %569 = vector.broadcast %568 : vector<1x1xf32> to vector<1x32xf32>
    %570 = arith.mulf %565, %569 : vector<1x32xf32>
    %571 = arith.mulf %570, %546 : vector<1x32xf32>
    %572 = arith.addf %571, %547 : vector<1x32xf32>
    %573 = arith.truncf %572 : vector<1x32xf32> to vector<1x32xbf16>
    %cst_151 = arith.constant dense<0.000000e+00> : vector<1x32xf32>
    %574 = tpu.matmul %573, %549, %cst_151 {dimension_numbers = #tpu.dot_dimension_numbers<[1], [0], [0], [1], [0, 0, 1, 1], [], []>} : vector<1x32xbf16>, vector<32x32xbf16>, vector<1x32xf32> -> vector<1x32xf32>
    %c0_152 = arith.constant 0 : index
    %c0_153 = arith.constant 0 : index
    %575 = vector.load %arg5[%c0_152, %c0_153] : memref<2x32xf32, #tpu.memory_space<vmem>>, vector<1x32xf32>
    tpu.vector_store %arg5[%c0_152, %c0_153], %574 {strides = array<i32>} : memref<2x32xf32, #tpu.memory_space<vmem>>, vector<1x32xf32>,
    %576 = vector.extract_strided_slice %543 {offsets = [8, 0], sizes = [8, 32], strides = [1, 1]} : vector<16x32xf32> to vector<8x32xf32>
    %cst_154 = arith.constant dense<0.000000e+00> : vector<32xf32>
    %577 = vector.multi_reduction <add>, %576, %cst_154 [0] : vector<8x32xf32> to vector<32xf32>
    %578 = vector.shape_cast %577 : vector<32xf32> to vector<1x32xf32>
    %cst_155 = arith.constant dense<0.000000e+00> : vector<1xf32>
    %579 = vector.multi_reduction <add>, %578, %cst_155 [1] : vector<1x32xf32> to vector<1xf32>
    %580 = vector.shape_cast %579 : vector<1xf32> to vector<1x1xf32>
    %cst_156 = arith.constant 3.200000e+01 : f32
    %581 = vector.broadcast %cst_156 : f32 to vector<1x1xf32>
    %582 = arith.divf %580, %581 : vector<1x1xf32>
    %583 = vector.broadcast %582 : vector<1x1xf32> to vector<1x32xf32>
    %584 = arith.subf %578, %583 : vector<1x32xf32>
    %585 = arith.mulf %584, %584 : vector<1x32xf32>
    %cst_157 = arith.constant dense<0.000000e+00> : vector<1xf32>
    %586 = vector.multi_reduction <add>, %585, %cst_157 [1] : vector<1x32xf32> to vector<1xf32>
    %587 = vector.shape_cast %586 : vector<1xf32> to vector<1x1xf32>
    %cst_158 = arith.constant 3.200000e+01 : f32
    %588 = vector.broadcast %cst_158 : f32 to vector<1x1xf32>
    %589 = arith.divf %587, %588 : vector<1x1xf32>
    %590 = vector.broadcast %582 : vector<1x1xf32> to vector<1x32xf32>
    %591 = arith.subf %578, %590 : vector<1x32xf32>
    %cst_159 = arith.constant 9.99999974E-6 : f32
    %592 = vector.broadcast %cst_159 : f32 to vector<1x1xf32>
    %593 = arith.addf %589, %592 : vector<1x1xf32>
    %594 = math.rsqrt %593 : vector<1x1xf32>
    %595 = vector.broadcast %594 : vector<1x1xf32> to vector<1x32xf32>
    %596 = arith.mulf %591, %595 : vector<1x32xf32>
    %597 = arith.mulf %596, %546 : vector<1x32xf32>
    %598 = arith.addf %597, %547 : vector<1x32xf32>
    %599 = arith.truncf %598 : vector<1x32xf32> to vector<1x32xbf16>
    %cst_160 = arith.constant dense<0.000000e+00> : vector<1x32xf32>
    %600 = tpu.matmul %599, %549, %cst_160 {dimension_numbers = #tpu.dot_dimension_numbers<[1], [0], [0], [1], [0, 0, 1, 1], [], []>} : vector<1x32xbf16>, vector<32x32xbf16>, vector<1x32xf32> -> vector<1x32xf32>
    %c1_161 = arith.constant 1 : index
    %c0_162 = arith.constant 0 : index
    %601 = vector.load %arg5[%c1_161, %c0_162] : memref<2x32xf32, #tpu.memory_space<vmem>>, vector<1x32xf32>
    tpu.vector_store %arg5[%c1_161, %c0_162], %600 {strides = array<i32>} : memref<2x32xf32, #tpu.memory_space<vmem>>, vector<1x32xf32>,
    return
  }
}

</mosaic_0001>

<bundles_post_ra>
// kernel: text_encoder_forward.1
= control target key start
LH: loop header
LB: loop body
LE: loop exit
PB: predicated region body
PF: predicated region fallthrough
CT: control target
= control target key end

     0   :  { %vm70_vm0 = vcmask 261120   ;;  %s6450_s0 = inlined_call_operand.vmem [shape: f32[2,8,32], index: 0, kind: input, shape index: {}]   ;;  %s6451_s1 = inlined_call_operand.vmem [shape: bf16[3,32,256], index: 1, kind: input, shape index: {}]   ;;  %s6452_s2 = inlined_call_operand.vmem [shape: bf16[3,128,32], index: 2, kind: input, shape index: {}]   ;;  %s6453_s3 = inlined_call_operand.vmem [shape: f32[4,8,128], index: 3, kind: input, shape index: {}]   ;;  %s6454_s4 = inlined_call_operand.vmem [shape: f32[104,32], index: 4, kind: input, shape index: {}]   ;;  %s6455_s5 = inlined_call_operand.hbm [shape: f32[2,32], index: 5, kind: output, shape index: {}]  }
   0x1   :  { %v24_v0 = vld [vmem:[%s6454_s4] sm:$0xff]  ;;  %v26_v2 = vld [vmem:[%s6450_s0 + $0x8] sm:$0xff] }
   0x2   :  { %v25_v1 = vld [vmem:[%s6450_s0] sm:$0xff]  ;;  %v5386_v4 = vadd.f32 %v26_v2, %v24_v0 }
   0x3   :  { %v5384_v3 = vadd.f32 %v25_v1, %v24_v0 }
   0x4   :  { %v74_v6 = vsel %vm70_vm0, %v5386_v4, 0.0 }
   0x5   :  { %v71_v5 = vsel %vm70_vm0, %v5384_v3, 0.0 }
   0x6   :  { %72 = vadd.xlane.f32.xlu0 %v71_v5 }
   0xa   :  { %75 = vadd.xlane.f32.xlu0 %v74_v6 }
   0xb   :  { %10 = vsyncpa [#allocation3], 0  ;;  %v5399_v17 = vld [vmem:[%s6451_s1] ss:$8 sps:$4 sm:$0xff]   ;;  %v5337_v18 = vmov 0.0   ;;  %vm5338_vm1 = vmmov 0   ;;  %v31_v24 = vlaneseq }
   0xc   :  { %4607 = vmatprep.subr.bf16.mxu0 %v5337_v18  ;;  %4611 = vmatprep.mubr.msk.bf16.mxu0 %vm5338_vm1, %v5337_v18  ;;  %v5408_v19 = vld [vmem:[%s6451_s1 + $0x10] ss:$8 sps:$4 sm:$0xff]   ;;  %v5424_v29 = vld [vmem:[%s6453_s3] sm:$0xff]  ;;  %v5339_v53 = vmov 0   ;;  %s5340_s29 = smov 96   ;;  %s5341_s30 = smov 64  }
   0xd   :  { %4608 = vmatpush3.bf16.msra.mxu0 %v5399_v17  ;;  %4615 = vmatprep.subr.bf16.mxu1 %v5337_v18  ;;  %v5416_v27 = vshrl.u32 %v31_v24, 7  ;;  %v5439_v43 = vand.u32 127, %v31_v24  ;;  %s5343_s6 = smov 32  }
   0xe   :  { %4609 = vmatprep.subr.bf16.mxu0 %v5337_v18  ;;  %4617 = vmatprep.mubr.msk.bf16.mxu1 %vm5338_vm1, %v5337_v18 }
   0xf   :  { %v5419_v28 = vsub.s32 0, %v5416_v27  ;;  %v5429_v33 = vsub.s32 1, %v5416_v27  ;;  %v5437_v42 = vsub.s32 2, %v5416_v27  ;;  %vm40_vm2 = vcmp.ge.s32.totalorder %v5439_v43, 8 }
  0x10   :  { %vm41_vm3 = vcmp.lt.s32.totalorder %v5439_v43, 16  ;;  %vm38_vm4 = vcmp.lt.s32.totalorder %v5439_v43, 8  ;;  %vm43_vm7 = vcmp.ge.s32.totalorder %v5439_v43, 16  ;;  %vm44_vm8 = vcmp.lt.s32.totalorder %v5439_v43, 24 }
  0x11   :  { %4610 = vmatpush3.bf16.msra.mxu0 %v5408_v19  ;;  %v101_v32 = vrot.slane %v5424_v29, %v5419_v28  ;;  %v107_v37 = vrot.slane %v5424_v29, %v5429_v33  ;;  %v114_v44 = vrot.slane %v5424_v29, %v5437_v42  ;;  %vm5446_vm5 = vmand %vm40_vm2, %vm41_vm3  ;;  %vm46_vm11 = vcmp.ge.s32.totalorder %v5439_v43, 24 }
  0x12   :  { %4621 = vmatprep.subr.bf16.mxu0 %v5337_v18  ;;  %vm175_vm6 = vmpackc.low %vm38_vm4, %vm38_vm4  ;;  %vm47_vm12 = vcmp.lt.s32.totalorder %v5439_v43, 32 }
  0x13   :  { %vm286_vm9 = vmpackc.low %vm5446_vm5, %vm5446_vm5  ;;  %v176_v54 = vsel %vm175_vm6, 65537, %v5339_v53  ;;  %vm35_vm6 = vcmp.le.s32.totalorder %v5439_v43, %v5416_v27 }
  0x14   :  { %vm5455_vm10 = vmand %vm43_vm7, %vm44_vm8  ;;  %v287_v58 = vsel %vm286_vm9, 65537, %v5339_v53  ;;  %v5466_v59 = vrot.slane %v176_v54, %v5419_v28  ;;  %vm599_vm7 = vcmask 64512   ;;  %vm710_vm9 = vcmask 1043456  }
  0x15   :  { %vm385_vm13 = vmpackc.low %vm5455_vm10, %vm5455_vm10  ;;  %v5474_v60 = vrot.slane %v287_v58, %v5419_v28 }
  0x16   :  { %vm48_vm14 = vmand %vm46_vm11, %vm47_vm12  ;;  %v386_v61 = vsel %vm385_vm13, 65537, %v5339_v53  ;;  %vm181_vm2 = vcmp.ne.s16.totalorder %v5466_v59, 0  ;;  %vm4122_vm13 = vcmask 253952  }
  0x17   :  { %vm484_vm15 = vmpackc.low %vm48_vm14, %vm48_vm14  ;;  %v5479_v62 = vrot.slane %v386_v61, %v5419_v28  ;;  %vm292_vm3 = vcmp.ne.s16.totalorder %v5474_v60, 0 }
  0x18   :  { %v485_v63 = vsel %vm484_vm15, 65537, %v5339_v53 }
  0x19   :  { %v5484_v0 = vrot.slane %v485_v63, %v5419_v28  ;;  %vm391_vm4 = vcmp.ne.s16.totalorder %v5479_v62, 0 }
  0x1b   :  { %vm490_vm5 = vcmp.ne.s16.totalorder %v5484_v0, 0 }
  0x93   :  { %v73_v7 = vpop.xlane.xlu0 %72 }
  0x94   :  { %v78_v8 = vmul.f32 0.03125, %v73_v7 }
  0x96   :  { %v80_v9 = vsub.f32 %v5384_v3, %v78_v8 }
  0x97   :  { %v76_v10 = vpop.xlane.xlu0 %75 }
  0x98   :  { %v79_v11 = vmul.f32 0.03125, %v76_v10  ;;  %v82_v12 = vmul.f32 %v80_v9, %v80_v9 }
  0x9a   :  { %v81_v13 = vsub.f32 %v5386_v4, %v79_v11  ;;  %v84_v14 = vsel %vm70_vm0, %v82_v12, 0.0 }
  0x9b   :  { %85 = vadd.xlane.f32.xlu1 %v84_v14 }
  0x9c   :  { %v83_v15 = vmul.f32 %v81_v13, %v81_v13 }
  0x9e   :  { %v87_v16 = vsel %vm70_vm0, %v83_v15, 0.0 }
  0x9f   :  { %88 = vadd.xlane.f32.xlu1 %v87_v16 }
 0x128   :  { %v86_v20 = vpop.xlane.xlu1 %85 }
 0x129   :  { %v90_v21 = vmul.f32 0.03125, %v86_v20 }
 0x12b   :  { %v92_v22 = vadd.f32 1e-05, %v90_v21 }
 0x12c   :  { %v89_v23 = vpop.xlane.xlu1 %88 }
 0x12d   :  { %5165 = vrsqrt.f32 %v92_v22  ;;  %v91_v25 = vmul.f32 0.03125, %v89_v23  ;;  %v5342_v22 = vmov -1e+30  }
 0x12e   :  { %v5540_v23 = vsel %vm35_vm6, 0.0, %v5342_v22 }
 0x12f   :  { %v93_v26 = vadd.f32 1e-05, %v91_v25 }
 0x131   :  { %5167 = vrsqrt.f32 %v93_v26 }
 0x137   :  { %v5166_v30 = vpop.eup %5165 }
 0x138   :  { %v96_v31 = vmul.f32 %v5166_v30, %v80_v9 }
 0x13a   :  { %v102_v36 = vmul.f32 %v101_v32, %v96_v31 }
 0x13b   :  { %v5168_v34 = vpop.eup %5167 }
 0x13c   :  { %v97_v35 = vmul.f32 %v5168_v34, %v81_v13  ;;  %v108_v39 = vadd.f32 %v107_v37, %v102_v36 }
 0x13e   :  { %v103_v38 = vmul.f32 %v101_v32, %v97_v35 }
 0x140   :  { %v109_v40 = vadd.f32 %v107_v37, %v103_v38 }
 0x142   :  { %v110_v41 = vpack.c.bf16 %v109_v40, %v108_v39 }
 0x144   :  { %4612 = vmatmul.mubr.msk.bf16.vlgmr.msra.gmra.mrb[0].mxu0 %vm70_vm0, %v110_v41 }
 0x145   :  { %4623 = vmatprep.mubr.msk.bf16.mxu0 %vm5338_vm1, %v5337_v18 }
 0x217   :  { %v164_v45 = vpop.f32.mrb[0].mxu0 }
 0x218   :  { %v165_v47 = vadd.f32 %v164_v45, %v114_v44  ;;  %v4613_v48 = vpop.f32.mrb[1].mxu0 }
 0x219   :  { %v167_v49 = vpop.f32.mrb[2].mxu0 }
 0x21a   :  { %v4421_v50 = vpack.c.bf16 %v165_v47, %v165_v47  ;;  %v168_v51 = vadd.f32 %v167_v49, %v114_v44  ;;  %v4614_v52 = vpop.f32.mrb[3].mxu0 }
 0x21c   :  { %v5459_v56 = vpack.c.bf16 %v168_v51, %v165_v47  ;;  %v4422_v57 = vpack.c.bf16 %v168_v51, %v168_v51  ;;  %189 = vrot.lane.b32.xlu0 %v4421_v50, %s5340_s29 }
 0x21e   :  { %238 = vrot.lane.b32.xlu1 %v4422_v57, %s5340_s29  ;;  %v182_v7 = vsel %vm181_vm2, %v5459_v56, 0  ;;  %v293_v10 = vsel %vm292_vm3, %v5459_v56, 0  ;;  %v392_v13 = vsel %vm391_vm4, %v5459_v56, 0  ;;  %v491_v16 = vsel %vm490_vm5, %v5459_v56, 0 }
 0x21f   :  { %v4208_v8 = vcombine.low %v182_v7, %v182_v7  ;;  %v4209_v9 = vcombine.high %v182_v7, %v182_v7  ;;  %v4214_v11 = vcombine.low %v293_v10, %v293_v10  ;;  %v4215_v12 = vcombine.high %v293_v10, %v293_v10 }
 0x220   :  { %692 = vrot.lane.b32.xlu0 %v5466_v59, %s5341_s30  ;;  %v4218_v14 = vcombine.low %v392_v13, %v392_v13  ;;  %v4219_v15 = vcombine.high %v392_v13, %v392_v13  ;;  %v4222_v20 = vcombine.low %v491_v16, %v491_v16  ;;  %v4223_v21 = vcombine.high %v491_v16, %v491_v16 }
 0x222   :  { %803 = vrot.lane.b32.xlu1 %v5474_v60, %s5341_s30 }
 0x226   :  { %915 = vrot.lane.b32.xlu1 %v5479_v62, %s5341_s30 }
 0x22a   :  { %1027 = vrot.lane.b32.xlu1 %v5484_v0, %s5341_s30 }
 0x28e   :  { %v190_v1 = vpop.permute.xlu0 %189 }
 0x28f   :  { %v195_v2 = vsel %vm70_vm0, %v190_v1, 0 }
 0x290   :  { %4616 = vmatpush3.bf16.xpose.msra.mxu1 %v195_v2  ;;  %v239_v5 = vpop.permute.xlu1 %238 }
 0x291   :  { %v244_v6 = vsel %vm70_vm0, %v239_v5, 0  ;;  %4627 = vmatprep.subr.bf16.mxu1 %v5337_v18 }
 0x292   :  { %4622 = vmatpush3.bf16.xpose.msra.mxu0 %v244_v6 }
 0x293   :  { %4633 = vmatprep.subr.bf16.mxu0 %v5337_v18 }
 0x297   :  { %4618 = vmatmul.mubr.msk.bf16.vlgmr.msra.gmra.mrb[0].mxu1 %vm70_vm0, %v4208_v8 }
 0x298   :  { %4628 = vmatpush3.bf16.xpose.msra.mxu1 %v195_v2  ;;  %4629 = vmatprep.mubr.msk.bf16.mxu1 %vm5338_vm1, %v5337_v18 }
 0x299   :  { %4624 = vmatmul.mubr.msk.bf16.vlgmr.msra.gmra.mrb[4].mxu0 %vm70_vm0, %v4209_v9  ;;  %4639 = vmatprep.subr.bf16.mxu1 %v5337_v18 }
 0x29a   :  { %4634 = vmatpush3.bf16.xpose.msra.mxu0 %v244_v6  ;;  %4635 = vmatprep.mubr.msk.bf16.mxu0 %vm5338_vm1, %v5337_v18 }
 0x29b   :  { %4645 = vmatprep.subr.bf16.mxu0 %v5337_v18 }
 0x29f   :  { %4630 = vmatmul.mubr.msk.bf16.vlgmr.msra.gmra.mrb[4].mxu1 %vm70_vm0, %v4214_v11 }
 0x2a0   :  { %4640 = vmatpush3.bf16.xpose.msra.mxu1 %v195_v2  ;;  %4641 = vmatprep.mubr.msk.bf16.mxu1 %vm5338_vm1, %v5337_v18 }
 0x2a1   :  { %4636 = vmatmul.mubr.msk.bf16.vlgmr.msra.gmra.mrb[8].mxu0 %vm70_vm0, %v4215_v12  ;;  %4651 = vmatprep.subr.bf16.mxu1 %v5337_v18 }
 0x2a2   :  { %4646 = vmatpush3.bf16.xpose.msra.mxu0 %v244_v6  ;;  %4647 = vmatprep.mubr.msk.bf16.mxu0 %vm5338_vm1, %v5337_v18 }
 0x2a3   :  { %4657 = vmatprep.subr.bf16.mxu0 %v5337_v18 }
 0x2a7   :  { %4642 = vmatmul.mubr.msk.bf16.vlgmr.msra.gmra.mrb[8].mxu1 %vm70_vm0, %v4218_v14 }
 0x2a8   :  { %4652 = vmatpush3.bf16.xpose.msra.mxu1 %v195_v2  ;;  %4653 = vmatprep.mubr.msk.bf16.mxu1 %vm5338_vm1, %v5337_v18 }
 0x2a9   :  { %4648 = vmatmul.mubr.msk.bf16.vlgmr.msra.gmra.mrb[12].mxu0 %vm70_vm0, %v4219_v15  ;;  %4663 = vmatprep.subr.bf16.mxu1 %v5337_v18 }
 0x2aa   :  { %4658 = vmatpush3.bf16.xpose.msra.mxu0 %v244_v6  ;;  %4659 = vmatprep.mubr.msk.bf16.mxu0 %vm5338_vm1, %v5337_v18 }
 0x2ab   :  { %4669 = vmatprep.subr.bf16.mxu0 %v5337_v18 }
 0x2af   :  { %4654 = vmatmul.mubr.msk.bf16.vlgmr.msra.gmra.mrb[12].mxu1 %vm70_vm0, %v4222_v20 }
 0x2b0   :  { %4665 = vmatprep.mubr.msk.bf16.mxu1 %vm5338_vm1, %v5337_v18 }
 0x2b1   :  { %4660 = vmatmul.mubr.msk.bf16.vlgmr.msra.gmra.mrb[16].mxu0 %vm70_vm0, %v4223_v21 }
 0x2b2   :  { %4671 = vmatprep.mubr.msk.bf16.mxu0 %vm5338_vm1, %v5337_v18 }
 0x36a   :  { %v231_v24 = vpop.f32.mrb[0].mxu1 }
 0x36b   :  { %v583_v25 = vmul.f32 0.35355338, %v231_v24  ;;  %v4619_v26 = vpop.f32.mrb[1].mxu1 }
 0x36c   :  { %v234_v30 = vpop.f32.mrb[2].mxu1  ;;  %v280_v31 = vpop.f32.mrb[4].mxu0 }
 0x36d   :  { %v584_v32 = vmul.f32 0.35355338, %v280_v31  ;;  %v4620_v34 = vpop.f32.mrb[3].mxu1  ;;  %v4625_v35 = vpop.f32.mrb[5].mxu0  ;;  %v5543_v36 = vadd.f32 %v583_v25, %v5540_v23 }
 0x36e   :  { %v283_v37 = vpop.f32.mrb[6].mxu0 }
 0x36f   :  { %v4626_v38 = vpop.f32.mrb[7].mxu0  ;;  %v600_v39 = vsel %vm599_vm7, %v5543_v36, -inf  ;;  %v5548_v40 = vadd.f32 %v584_v32, %v5540_v23  ;;  %v5573_v37 = vpop.permute.xlu0 %692 }
 0x370   :  { %601 = vmax.xlane.f32.xlu1 %v600_v39  ;;  %vm694_vm8 = vcmp.ne.s16.totalorder %v5573_v37, 0 }
 0x371   :  { %v603_v41 = vsel %vm599_vm7, %v5548_v40, -inf  ;;  %v695_v38 = vsel %vm694_vm8, %v5459_v56, 0 }
 0x372   :  { %v336_v43 = vpop.f32.mrb[4].mxu1  ;;  %604 = vmax.xlane.f32.xlu0 %v603_v41  ;;  %v4230_v39 = vcombine.high %v695_v38, %v695_v38  ;;  %v4228_v41 = vcombine.low %v695_v38, %v695_v38 }
 0x373   :  { %v585_v44 = vmul.f32 0.35355338, %v336_v43  ;;  %v4631_v45 = vpop.f32.mrb[5].mxu1  ;;  %v5581_v43 = vpop.permute.xlu1 %803 }
 0x374   :  { %v339_v46 = vpop.f32.mrb[6].mxu1  ;;  %v379_v47 = vpop.f32.mrb[8].mxu0  ;;  %vm805_vm10 = vcmp.ne.s16.totalorder %v5581_v43, 0 }
 0x375   :  { %v586_v48 = vmul.f32 0.35355338, %v379_v47  ;;  %v4632_v49 = vpop.f32.mrb[7].mxu1  ;;  %v4637_v50 = vpop.f32.mrb[9].mxu0  ;;  %v593_v51 = vadd.f32 %v585_v44, %v5540_v23 }
 0x376   :  { %v382_v52 = vpop.f32.mrb[10].mxu0 }
 0x377   :  { %v4638_v53 = vpop.f32.mrb[11].mxu0  ;;  %v606_v54 = vsel %vm599_vm7, %v593_v51, -inf  ;;  %v594_v55 = vadd.f32 %v586_v48, %v5540_v23  ;;  %v5583_v44 = vpop.permute.xlu1 %915 }
 0x378   :  { %607 = vmax.xlane.f32.xlu0 %v606_v54  ;;  %vm917_vm11 = vcmp.ne.s16.totalorder %v5583_v44, 0 }
 0x379   :  { %v609_v57 = vsel %vm599_vm7, %v594_v55, -inf }
 0x37a   :  { %v435_v58 = vpop.f32.mrb[8].mxu1  ;;  %610 = vmax.xlane.f32.xlu1 %v609_v57 }
 0x37b   :  { %v587_v61 = vmul.f32 0.35355338, %v435_v58  ;;  %v4643_v63 = vpop.f32.mrb[9].mxu1  ;;  %v5585_v45 = vpop.permute.xlu1 %1027 }
 0x37c   :  { %v438_v1 = vpop.f32.mrb[10].mxu1  ;;  %v478_v2 = vpop.f32.mrb[12].mxu0  ;;  %vm1029_vm12 = vcmp.ne.s16.totalorder %v5585_v45, 0 }
 0x37d   :  { %v588_v5 = vmul.f32 0.35355338, %v478_v2  ;;  %v4644_v6 = vpop.f32.mrb[11].mxu1  ;;  %v4649_v7 = vpop.f32.mrb[13].mxu0  ;;  %v595_v8 = vadd.f32 %v587_v61, %v5540_v23 }
 0x37e   :  { %v481_v9 = vpop.f32.mrb[14].mxu0 }
 0x37f   :  { %v4650_v10 = vpop.f32.mrb[15].mxu0  ;;  %v612_v11 = vsel %vm599_vm7, %v595_v8, -inf  ;;  %v5559_v12 = vadd.f32 %v588_v5, %v5540_v23 }
 0x380   :  { %613 = vmax.xlane.f32.xlu0 %v612_v11 }
 0x381   :  { %v615_v13 = vsel %vm599_vm7, %v5559_v12, -inf }
 0x382   :  { %v534_v14 = vpop.f32.mrb[12].mxu1  ;;  %616 = vmax.xlane.f32.xlu1 %v615_v13 }
 0x383   :  { %v589_v15 = vmul.f32 0.35355338, %v534_v14  ;;  %v4655_v16 = vpop.f32.mrb[13].mxu1 }
 0x384   :  { %v537_v20 = vpop.f32.mrb[14].mxu1  ;;  %v577_v21 = vpop.f32.mrb[16].mxu0 }
 0x385   :  { %v590_v22 = vmul.f32 0.35355338, %v577_v21  ;;  %v4656_v24 = vpop.f32.mrb[15].mxu1  ;;  %v4661_v25 = vpop.f32.mrb[17].mxu0  ;;  %v5564_v26 = vadd.f32 %v589_v15, %v5540_v23  ;;  %v806_v21 = vsel %vm805_vm10, %v5459_v56, 0 }
 0x386   :  { %v580_v30 = vpop.f32.mrb[18].mxu0  ;;  %v4236_v25 = vcombine.high %v806_v21, %v806_v21 }
 0x387   :  { %v4662_v31 = vpop.f32.mrb[19].mxu0  ;;  %v618_v32 = vsel %vm599_vm7, %v5564_v26, -inf  ;;  %v5569_v34 = vadd.f32 %v590_v22, %v5540_v23  ;;  %v918_v30 = vsel %vm917_vm11, %v5459_v56, 0 }
 0x388   :  { %619 = vmax.xlane.f32.xlu0 %v618_v32  ;;  %v4240_v31 = vcombine.low %v918_v30, %v918_v30  ;;  %v4242_v32 = vcombine.high %v918_v30, %v918_v30 }
 0x389   :  { %v621_v35 = vsel %vm599_vm7, %v5569_v34, -inf }
 0x38a   :  { %622 = vmax.xlane.f32.xlu1 %v621_v35  ;;  %v4234_v35 = vcombine.low %v806_v21, %v806_v21 }
 0x39b   :  { %755 = vrot.lane.b32.xlu1 %v4230_v39, %s5341_s30 }
 0x39e   :  { %705 = vrot.lane.b32.xlu0 %v4228_v41, %s5341_s30 }
 0x3fd   :  { %v602_v46 = vpop.xlane.xlu1 %601 }
 0x3fe   :  { %v624_v47 = vsub.f32 %v5543_v36, %v602_v46 }
 0x3ff   :  { %v605_v48 = vpop.xlane.xlu0 %604 }
 0x400   :  { %v632_v49 = vmul.f32 1.442695, %v624_v47  ;;  %v625_v50 = vsub.f32 %v5548_v40, %v605_v48 }
 0x402   :  { %5169 = vpow2.f32 %v632_v49  ;;  %v634_v52 = vmul.f32 1.442695, %v625_v50 }
 0x404   :  { %5171 = vpow2.f32 %v634_v52 }
 0x405   :  { %v608_v53 = vpop.xlane.xlu0 %607 }
 0x406   :  { %v626_v54 = vsub.f32 %v593_v51, %v608_v53 }
 0x407   :  { %v611_v57 = vpop.xlane.xlu1 %610 }
 0x408   :  { %v636_v58 = vmul.f32 1.442695, %v626_v54  ;;  %v627_v61 = vsub.f32 %v594_v55, %v611_v57 }
 0x40a   :  { %5173 = vpow2.f32 %v636_v58  ;;  %v638_v63 = vmul.f32 1.442695, %v627_v61 }
 0x40c   :  { %v5589_v1 = vpop.eup %5169  ;;  %5175 = vpow2.f32 %v638_v63 }
 0x40d   :  { %v614_v2 = vpop.xlane.xlu0 %613  ;;  %v648_v36 = vsel %vm599_vm7, %v5589_v1, 0.0 }
 0x40e   :  { %v5593_v5 = vpop.eup %5171  ;;  %v628_v40 = vsub.f32 %v595_v8, %v614_v2  ;;  %649 = vadd.xlane.f32.xlu0 %v648_v36 }
 0x40f   :  { %v651_v6 = vsel %vm599_vm7, %v5593_v5, 0.0  ;;  %v617_v55 = vpop.xlane.xlu1 %616 }
 0x410   :  { %v640_v51 = vmul.f32 1.442695, %v628_v40  ;;  %652 = vadd.xlane.f32.xlu1 %v651_v6  ;;  %v629_v38 = vsub.f32 %v5559_v12, %v617_v55 }
 0x412   :  { %5177 = vpow2.f32 %v640_v51  ;;  %v642_v39 = vmul.f32 1.442695, %v629_v38 }
 0x414   :  { %v5597_v7 = vpop.eup %5173  ;;  %5179 = vpow2.f32 %v642_v39 }
 0x415   :  { %v620_v9 = vpop.xlane.xlu0 %619  ;;  %v654_v10 = vsel %vm599_vm7, %v5597_v7, 0.0 }
 0x416   :  { %v5601_v11 = vpop.eup %5175  ;;  %655 = vadd.xlane.f32.xlu0 %v654_v10  ;;  %v630_v41 = vsub.f32 %v5564_v26, %v620_v9 }
 0x417   :  { %v623_v13 = vpop.xlane.xlu1 %622  ;;  %v657_v14 = vsel %vm599_vm7, %v5601_v11, 0.0 }
 0x418   :  { %v631_v46 = vsub.f32 %v5569_v34, %v623_v13  ;;  %v644_v47 = vmul.f32 1.442695, %v630_v41  ;;  %v1030_v34 = vsel %vm1029_vm12, %v5459_v56, 0 }
 0x419   :  { %v706_v8 = vpop.permute.xlu0 %705  ;;  %v4248_v54 = vcombine.high %v1030_v34, %v1030_v34  ;;  %v4246_v57 = vcombine.low %v1030_v34, %v1030_v34 }
 0x41a   :  { %v712_v15 = vsel %vm710_vm9, %v706_v8, 0  ;;  %658 = vadd.xlane.f32.xlu0 %v657_v14  ;;  %v646_v48 = vmul.f32 1.442695, %v631_v46  ;;  %5181 = vpow2.f32 %v644_v47 }
 0x41b   :  { %4664 = vmatpush3.bf16.msra.mxu1 %v712_v15  ;;  %v756_v16 = vpop.permute.xlu1 %755 }
 0x41c   :  { %v5607_v20 = vpop.eup %5177  ;;  %v761_v22 = vsel %vm710_vm9, %v756_v16, 0  ;;  %4675 = vmatprep.subr.bf16.mxu1 %v5337_v18  ;;  %5183 = vpow2.f32 %v646_v48 }
 0x41d   :  { %4670 = vmatpush3.bf16.msra.mxu0 %v761_v22  ;;  %v660_v24 = vsel %vm599_vm7, %v5607_v20, 0.0 }
 0x41e   :  { %661 = vadd.xlane.f32.xlu0 %v660_v24  ;;  %4681 = vmatprep.subr.bf16.mxu0 %v5337_v18  ;;  %v5628_v49 = vpop.eup %5179 }
 0x41f   :  { %v663_v50 = vsel %vm599_vm7, %v5628_v49, 0.0 }
 0x421   :  { %865 = vrot.lane.b32.xlu1 %v4236_v25, %s5341_s30 }
 0x424   :  { %v5632_v52 = vpop.eup %5181 }
 0x425   :  { %928 = vrot.lane.b32.xlu1 %v4240_v31, %s5341_s30  ;;  %v666_v12 = vsel %vm599_vm7, %v5632_v52, 0.0 }
 0x426   :  { %v5634_v53 = vpop.eup %5183 }
 0x427   :  { %v669_v26 = vsel %vm599_vm7, %v5634_v53, 0.0 }
 0x429   :  { %977 = vrot.lane.b32.xlu1 %v4242_v32, %s5341_s30 }
 0x434   :  { %816 = vrot.lane.b32.xlu0 %v4234_v35, %s5341_s30 }
 0x44d   :  { %664 = vadd.xlane.f32.xlu1 %v663_v50 }
 0x451   :  { %667 = vadd.xlane.f32.xlu1 %v666_v12 }
 0x453   :  { %670 = vadd.xlane.f32.xlu0 %v669_v26 }
 0x462   :  { %1089 = vrot.lane.b32.xlu1 %v4248_v54, %s5341_s30 }
 0x466   :  { %1142 = vrot.lane.b32.xlu1 %v5408_v19, %s5343_s6 }
 0x469   :  { %1040 = vrot.lane.b32.xlu0 %v4246_v57, %s5341_s30  ;;  %v5128_v57 = vld [vmem:[%s6451_s1 + $0x14] ss:$8 sps:$4 sm:$0xff]  }
 0x46d   :  { %1140 = vrot.lane.b32.xlu0 %v5399_v17, %s5343_s6 }
 0x49b   :  { %v650_v58 = vpop.xlane.xlu0 %649 }
 0x49c   :  { %5185 = vrcp.f32 %v650_v58 }
 0x49d   :  { %v653_v61 = vpop.xlane.xlu1 %652 }
 0x49e   :  { %5187 = vrcp.f32 %v653_v61 }
 0x4a1   :  { %v866_v55 = vpop.permute.xlu1 %865 }
 0x4a2   :  { %v871_v9 = vsel %vm710_vm9, %v866_v55, 0 }
 0x4a3   :  { %v656_v63 = vpop.xlane.xlu0 %655 }
 0x4a4   :  { %5189 = vrcp.f32 %v656_v63 }
 0x4a6   :  { %v5186_v56 = vpop.eup %5185 }
 0x4a7   :  { %v680_v2 = vmul.f32 %v5186_v56, %v5589_v1  ;;  %v659_v36 = vpop.xlane.xlu0 %658 }
 0x4a8   :  { %v5188_v40 = vpop.eup %5187  ;;  %5191 = vrcp.f32 %v659_v36 }
 0x4a9   :  { %v681_v6 = vmul.f32 %v5188_v40, %v5593_v5  ;;  %v4423_v51 = vpack.c.bf16 %v680_v2, %v680_v2  ;;  %v929_v5 = vpop.permute.xlu1 %928 }
 0x4aa   :  { %v934_v22 = vsel %vm710_vm9, %v929_v5, 0 }
 0x4ab   :  { %4666 = vmatmul.mubr.msk.bf16.vlgmr.msra.gmra.mrb[16].mxu1 %vm599_vm7, %v4423_v51  ;;  %v662_v17 = vpop.xlane.xlu0 %661  ;;  %v4424_v19 = vpack.c.bf16 %v681_v6, %v681_v6 }
 0x4ac   :  { %4677 = vmatprep.mubr.msk.bf16.mxu1 %vm5338_vm1, %v5337_v18  ;;  %5193 = vrcp.f32 %v662_v17  ;;  %v5708_v17 = vsub.s32 3, %v5416_v27 }
 0x4ad   :  { %4672 = vmatmul.mubr.msk.bf16.vlgmr.msra.gmra.mrb[20].mxu0 %vm599_vm7, %v4424_v19  ;;  %v978_v21 = vpop.permute.xlu1 %977 }
 0x4ae   :  { %v5190_v10 = vpop.eup %5189  ;;  %4682 = vmatpush3.bf16.msra.mxu0 %v871_v9  ;;  %4683 = vmatprep.mubr.msk.bf16.mxu0 %vm5338_vm1, %v5337_v18  ;;  %v983_v25 = vsel %vm710_vm9, %v978_v21, 0  ;;  %v1195_v19 = vrot.slane %v5424_v29, %v5708_v17 }
 0x4af   :  { %v817_v1 = vpop.permute.xlu0 %816  ;;  %4693 = vmatprep.subr.bf16.mxu0 %v5337_v18  ;;  %v682_v8 = vmul.f32 %v5190_v10, %v5597_v7 }
 0x4b0   :  { %v822_v13 = vsel %vm710_vm9, %v817_v1, 0 }
 0x4b1   :  { %4676 = vmatpush3.bf16.msra.mxu1 %v822_v13  ;;  %v4425_v16 = vpack.c.bf16 %v682_v8, %v682_v8 }
 0x4b2   :  { %v5192_v14 = vpop.eup %5191  ;;  %4687 = vmatprep.subr.bf16.mxu1 %v5337_v18 }
 0x4b3   :  { %v683_v15 = vmul.f32 %v5192_v14, %v5601_v11 }
 0x4b5   :  { %v4426_v24 = vpack.c.bf16 %v683_v15, %v683_v15 }
 0x4b6   :  { %v5194_v7 = vpop.eup %5193 }
 0x4b7   :  { %4678 = vmatmul.mubr.msk.bf16.vlgmr.msra.gmra.mrb[16].mxu1 %vm599_vm7, %v4425_v16  ;;  %v684_v11 = vmul.f32 %v5194_v7, %v5607_v20 }
 0x4b8   :  { %4688 = vmatpush3.bf16.msra.mxu1 %v934_v22  ;;  %4689 = vmatprep.mubr.msk.bf16.mxu1 %vm5338_vm1, %v5337_v18 }
 0x4b9   :  { %4684 = vmatmul.mubr.msk.bf16.vlgmr.msra.gmra.mrb[20].mxu0 %vm599_vm7, %v4426_v24  ;;  %4699 = vmatprep.subr.bf16.mxu1 %v5337_v18  ;;  %v4427_v30 = vpack.c.bf16 %v684_v11, %v684_v11 }
 0x4ba   :  { %4694 = vmatpush3.bf16.msra.mxu0 %v983_v25  ;;  %4695 = vmatprep.mubr.msk.bf16.mxu0 %vm5338_vm1, %v5337_v18 }
 0x4bb   :  { %4705 = vmatprep.subr.bf16.mxu0 %v5337_v18 }
 0x4c3   :  { %4690 = vmatmul.mubr.msk.bf16.vlgmr.msra.gmra.mrb[16].mxu1 %vm599_vm7, %v4427_v30 }
 0x4c4   :  { %4701 = vmatprep.mubr.msk.bf16.mxu1 %vm5338_vm1, %v5337_v18 }
 0x4da   :  { %v665_v31 = vpop.xlane.xlu1 %664 }
 0x4db   :  { %5195 = vrcp.f32 %v665_v31 }
 0x4de   :  { %v668_v32 = vpop.xlane.xlu1 %667 }
 0x4df   :  { %5197 = vrcp.f32 %v668_v32 }
 0x4e0   :  { %v671_v35 = vpop.xlane.xlu0 %670 }
 0x4e1   :  { %5199 = vrcp.f32 %v671_v35 }
 0x4e2   :  { %v1090_v20 = vpop.permute.xlu1 %1089 }
 0x4e3   :  { %v1095_v12 = vsel %vm710_vm9, %v1090_v20, 0 }
 0x4e4   :  { %v1041_v38 = vpop.permute.xlu0 %1040 }
 0x4e5   :  { %v5196_v39 = vpop.eup %5195  ;;  %v1046_v41 = vsel %vm710_vm9, %v1041_v38, 0 }
 0x4e6   :  { %v685_v46 = vmul.f32 %v5196_v39, %v5628_v49  ;;  %4700 = vmatpush3.bf16.msra.mxu1 %v1046_v41  ;;  %v1143_v58 = vpop.permute.xlu1 %1142 }
 0x4e7   :  { %4711 = vmatprep.subr.bf16.mxu1 %v5337_v18 }
 0x4e8   :  { %v4428_v47 = vpack.c.bf16 %v685_v46, %v685_v46 }
 0x4e9   :  { %v5198_v48 = vpop.eup %5197 }
 0x4ea   :  { %v686_v50 = vmul.f32 %v5198_v48, %v5632_v52  ;;  %4696 = vmatmul.mubr.msk.bf16.vlgmr.msra.gmra.mrb[20].mxu0 %vm599_vm7, %v4428_v47  ;;  %v5125_v52 = vld [vmem:[%s6451_s1 + $0x4] ss:$8 sps:$4 sm:$0xff]   ;;  %v5727_v47 = vsub.s32 4, %v5416_v27 }
 0x4eb   :  { %4706 = vmatpush3.bf16.msra.mxu0 %v1095_v12  ;;  %4707 = vmatprep.mubr.msk.bf16.mxu0 %vm5338_vm1, %v5337_v18  ;;  %v5200_v49 = vpop.eup %5199 }
 0x4ec   :  { %v4429_v26 = vpack.c.bf16 %v686_v50, %v686_v50  ;;  %4719 = vmatprep.subr.bf16.mxu0 %v5337_v18  ;;  %v687_v34 = vmul.f32 %v5200_v49, %v5634_v53  ;;  %v1141_v53 = vpop.permute.xlu0 %1140  ;;  %v1227_v50 = vrot.slane %v5424_v29, %v5727_v47 }
 0x4ee   :  { %4702 = vmatmul.mubr.msk.bf16.vlgmr.msra.gmra.mrb[16].mxu1 %vm599_vm7, %v4429_v26  ;;  %v4430_v54 = vpack.c.bf16 %v687_v34, %v687_v34  ;;  %v5732_v26 = vsub.s32 5, %v5416_v27 }
 0x4ef   :  { %4715 = vmatprep.mubr.msk.bf16.mxu1 %vm5338_vm1, %v5337_v18  ;;  %4712 = vmatpush3.bf16.msra.mxu1 %v1141_v53 }
 0x4f0   :  { %4713 = vmatprep.subr.bf16.mxu1 %v5337_v18 }
 0x4f3   :  { %4714 = vmatpush3.bf16.msra.mxu1 %v1143_v58 }
 0x4f4   :  { %4727 = vmatprep.subr.bf16.mxu1 %v5337_v18 }
 0x4f6   :  { %4708 = vmatmul.mubr.msk.bf16.vlgmr.msra.gmra.mrb[20].mxu0 %vm599_vm7, %v4430_v54  ;;  %v1233_v54 = vrot.slane %v5424_v29, %v5732_v26 }
 0x4f7   :  { %4720 = vmatpush3.bf16.msra.mxu0 %v5125_v52  ;;  %4723 = vmatprep.mubr.msk.bf16.mxu0 %vm5338_vm1, %v5337_v18 }
 0x4f8   :  { %4721 = vmatprep.subr.bf16.mxu0 %v5337_v18 }
 0x4fb   :  { %4722 = vmatpush3.bf16.msra.mxu0 %v5128_v57 }
 0x4fc   :  { %4747 = vmatprep.subr.bf16.mxu0 %v5337_v18 }
 0x5c1   :  { %v1082_v61 = vpop.f32.mrb[16].mxu1 }
 0x5c2   :  { %v4703_v63 = vpop.f32.mrb[17].mxu1 }
 0x5c3   :  { %v1085_v56 = vpop.f32.mrb[18].mxu1  ;;  %v5129_v63 = vld [vmem:[%s6452_s2] sm:$0xff]  }
 0x5c4   :  { %v4704_v2 = vpop.f32.mrb[19].mxu1  ;;  %v5130_v56 = vld [vmem:[%s6452_s2 + $0x8] sm:$0xff]  }
 0x5c5   :  { %v5131_v2 = vld [vmem:[%s6452_s2 + $0x10] sm:$0xff]  }
 0x5c9   :  { %v1131_v36 = vpop.f32.mrb[20].mxu0 }
 0x5ca   :  { %v1139_v40 = vpack.c.bf16 %v1131_v36, %v1082_v61  ;;  %v4709_v6 = vpop.f32.mrb[21].mxu0  ;;  %v5132_v36 = vld [vmem:[%s6452_s2 + $0x18] sm:$0xff]  }
 0x5cb   :  { %v1134_v51 = vpop.f32.mrb[22].mxu0  ;;  %v5134_v6 = vld [vmem:[%s6452_s2 + $0x28] sm:$0xff]  }
 0x5cc   :  { %v4710_v55 = vpop.f32.mrb[23].mxu0  ;;  %4716 = vmatmul.mubr.msk.bf16.vlgmr.msra.gmra.mrb[20].mxu1 %vm70_vm0, %v1139_v40  ;;  %v5133_v40 = vld [vmem:[%s6452_s2 + $0x20] sm:$0xff]   ;;  %v5135_v51 = vld [vmem:[%s6452_s2 + $0x30] sm:$0xff]  }
 0x5cd   :  { %4743 = vmatprep.mubr.msk.bf16.mxu1 %vm5338_vm1, %v5337_v18  ;;  %4728 = vmatpush3.bf16.msra.mxu1 %v5129_v63  ;;  %v5136_v55 = vld [vmem:[%s6452_s2 + $0x38] sm:$0xff]  }
 0x5ce   :  { %4729 = vmatprep.subr.bf16.mxu1 %v5337_v18 }
 0x5d1   :  { %4730 = vmatpush3.bf16.msra.mxu1 %v5130_v56 }
 0x5d2   :  { %4731 = vmatprep.subr.bf16.mxu1 %v5337_v18 }
 0x5d5   :  { %4732 = vmatpush3.bf16.msra.mxu1 %v5131_v2 }
 0x5d6   :  { %4733 = vmatprep.subr.bf16.mxu1 %v5337_v18 }
 0x5d9   :  { %4734 = vmatpush3.bf16.msra.mxu1 %v5132_v36 }
 0x5da   :  { %4735 = vmatprep.subr.bf16.mxu1 %v5337_v18 }
 0x5dd   :  { %4736 = vmatpush3.bf16.msra.mxu1 %v5133_v40 }
 0x5de   :  { %4737 = vmatprep.subr.bf16.mxu1 %v5337_v18 }
 0x5e1   :  { %4738 = vmatpush3.bf16.msra.mxu1 %v5134_v6 }
 0x5e2   :  { %4739 = vmatprep.subr.bf16.mxu1 %v5337_v18 }
 0x5e5   :  { %4740 = vmatpush3.bf16.msra.mxu1 %v5135_v51 }
 0x5e6   :  { %4741 = vmatprep.subr.bf16.mxu1 %v5337_v18 }
 0x5e9   :  { %4742 = vmatpush3.bf16.msra.mxu1 %v5136_v55 }
 0x5ea   :  { %4773 = vmatprep.subr.bf16.mxu1 %v5337_v18 }
 0x69f   :  { %v1183_v9 = vpop.f32.mrb[20].mxu1 }
 0x6a0   :  { %v1190_v10 = vadd.f32 %v1183_v9, %v5384_v3  ;;  %v4717_v1 = vpop.f32.mrb[21].mxu1 }
 0x6a1   :  { %v1186_v5 = vpop.f32.mrb[22].mxu1 }
 0x6a2   :  { %v5713_v13 = vadd.f32 %v1195_v19, %v1190_v10  ;;  %v1191_v8 = vadd.f32 %v1186_v5, %v5386_v4  ;;  %v4718_v14 = vpop.f32.mrb[23].mxu1 }
 0x6a4   :  { %v5716_v15 = vadd.f32 %v1195_v19, %v1191_v8  ;;  %v1198_v16 = vsel %vm70_vm0, %v5713_v13, 0.0  ;;  %v5772_v19 = vsub.s32 6, %v5416_v27 }
 0x6a5   :  { %1199 = vadd.xlane.f32.xlu0 %v1198_v16 }
 0x6a6   :  { %v1201_v21 = vsel %vm70_vm0, %v5716_v15, 0.0  ;;  %v1240_v9 = vrot.slane %v5424_v29, %v5772_v19 }
 0x6a7   :  { %1202 = vadd.xlane.f32.xlu1 %v1201_v21 }
 0x732   :  { %v1200_v22 = vpop.xlane.xlu0 %1199 }
 0x733   :  { %v1204_v24 = vmul.f32 0.03125, %v1200_v22 }
 0x734   :  { %v1203_v3 = vpop.xlane.xlu1 %1202 }
 0x735   :  { %v1206_v25 = vsub.f32 %v5713_v13, %v1204_v24  ;;  %v1205_v7 = vmul.f32 0.03125, %v1203_v3 }
 0x737   :  { %v1207_v11 = vsub.f32 %v5716_v15, %v1205_v7  ;;  %v1208_v4 = vmul.f32 %v1206_v25, %v1206_v25 }
 0x739   :  { %v1210_v30 = vsel %vm70_vm0, %v1208_v4, 0.0  ;;  %v1209_v31 = vmul.f32 %v1207_v11, %v1207_v11 }
 0x73a   :  { %1211 = vadd.xlane.f32.xlu0 %v1210_v30 }
 0x73b   :  { %v1213_v32 = vsel %vm70_vm0, %v1209_v31, 0.0 }
 0x73e   :  { %1214 = vadd.xlane.f32.xlu0 %v1213_v32 }
 0x7c7   :  { %v1212_v35 = vpop.xlane.xlu0 %1211 }
 0x7c8   :  { %v1216_v38 = vmul.f32 0.03125, %v1212_v35 }
 0x7ca   :  { %v1218_v39 = vadd.f32 1e-05, %v1216_v38 }
 0x7cb   :  { %v1215_v41 = vpop.xlane.xlu0 %1214 }
 0x7cc   :  { %5201 = vrsqrt.f32 %v1218_v39  ;;  %v1217_v46 = vmul.f32 0.03125, %v1215_v41  ;;  %v5779_v39 = vsub.s32 7, %v5416_v27  ;;  %v5793_v27 = vld [vmem:[%s6454_s4 + $0x50] sm:$0xff] }
 0x7ce   :  { %v1219_v20 = vadd.f32 1e-05, %v1217_v46  ;;  %v1400_v41 = vrot.slane %v5424_v29, %v5779_v39  ;;  %v1405_v29 = vld [vmem:[%s6454_s4 + $0x28] sm:$0xff] }
 0x7d0   :  { %5203 = vrsqrt.f32 %v1219_v20 }
 0x7d6   :  { %v5202_v48 = vpop.eup %5201 }
 0x7d7   :  { %v1222_v12 = vmul.f32 %v5202_v48, %v1206_v25 }
 0x7d9   :  { %v1228_v34 = vmul.f32 %v1227_v50, %v1222_v12 }
 0x7da   :  { %v5204_v49 = vpop.eup %5203 }
 0x7db   :  { %v1223_v52 = vmul.f32 %v5204_v49, %v1207_v11  ;;  %v1234_v53 = vadd.f32 %v1233_v54, %v1228_v34 }
 0x7dd   :  { %v1229_v57 = vmul.f32 %v1227_v50, %v1223_v52  ;;  %v5787_v50 = vld [vmem:[%s6454_s4 + $0x48] sm:$0xff] }
 0x7df   :  { %v1235_v58 = vadd.f32 %v1233_v54, %v1229_v57  ;;  %v1406_v57 = vld [vmem:[%s6454_s4 + $0x30] sm:$0xff] }
 0x7e1   :  { %v1236_v61 = vpack.c.bf16 %v1235_v58, %v1234_v53 }
 0x7e3   :  { %4724 = vmatmul.mubr.msk.bf16.vlgmr.msra.gmra.mrb[24].mxu0 %vm70_vm0, %v1236_v61 }
 0x7e4   :  { %4751 = vmatprep.mubr.msk.bf16.mxu0 %vm5338_vm1, %v5337_v18 }
 0x8b6   :  { %v1286_v10 = vpop.f32.mrb[24].mxu0 }
 0x8b7   :  { %v1287_v1 = vadd.f32 %v1286_v10, %v1240_v9  ;;  %v4725_v5 = vpop.f32.mrb[25].mxu0 }
 0x8b8   :  { %v1289_v8 = vpop.f32.mrb[26].mxu0  ;;  %v5818_v5 = vld [vmem:[%s6451_s1 + $0x20] ss:$8 sps:$4 sm:$0xff]  }
 0x8b9   :  { %v1293_v14 = vmul.f32 -1.702, %v1287_v1  ;;  %v1290_v16 = vadd.f32 %v1289_v8, %v1240_v9  ;;  %v4726_v21 = vpop.f32.mrb[27].mxu0  ;;  %4748 = vmatpush3.bf16.msra.mxu0 %v5818_v5  ;;  %v5824_v8 = vld [vmem:[%s6451_s1 + $0x30] ss:$8 sps:$4 sm:$0xff]  }
 0x8ba   :  { %4749 = vmatprep.subr.bf16.mxu0 %v5337_v18 }
 0x8bb   :  { %v1295_v22 = vmul.f32 1.442695, %v1293_v14  ;;  %v1294_v24 = vmul.f32 -1.702, %v1290_v16 }
 0x8bd   :  { %5205 = vpow2.f32 %v1295_v22  ;;  %v1297_v3 = vmul.f32 1.442695, %v1294_v24  ;;  %4750 = vmatpush3.bf16.msra.mxu0 %v5824_v8 }
 0x8be   :  { %4755 = vmatprep.subr.bf16.mxu0 %v5337_v18 }
 0x8bf   :  { %5207 = vpow2.f32 %v1297_v3 }
 0x8c7   :  { %v5206_v25 = vpop.eup %5205 }
 0x8c8   :  { %v1299_v7 = vadd.f32 1.0, %v5206_v25  ;;  %v5832_v25 = vld [vmem:[%s6453_s3 + $0x8] sm:$0xff] }
 0x8c9   :  { %v5208_v11 = vpop.eup %5207 }
 0x8ca   :  { %5209 = vrcp.f32 %v1299_v7  ;;  %v1300_v4 = vadd.f32 1.0, %v5208_v11  ;;  %v1462_v7 = vrot.slane %v5832_v25, %v5419_v28 }
 0x8cc   :  { %5211 = vrcp.f32 %v1300_v4 }
 0x8d4   :  { %v5210_v30 = vpop.eup %5209 }
 0x8d5   :  { %v1303_v32 = vmul.f32 %v5210_v30, %v1287_v1 }
 0x8d6   :  { %v5212_v31 = vpop.eup %5211 }
 0x8d7   :  { %v1304_v35 = vmul.f32 %v5212_v31, %v1290_v16 }
 0x8d9   :  { %v1305_v38 = vpack.c.bf16 %v1304_v35, %v1303_v32  ;;  %v1468_v35 = vrot.slane %v5832_v25, %v5429_v33 }
 0x8db   :  { %4744 = vmatmul.mubr.bf16.vlgmr.msra.gmra.mrb[24].mxu1 %v1305_v38 }
 0x8dc   :  { %4775 = vmatprep.mubr.msk.bf16.mxu1 %vm5338_vm1, %v5337_v18 }
 0x9ae   :  { %v1388_v46 = vpop.f32.mrb[24].mxu1 }
 0x9af   :  { %v1395_v20 = vadd.f32 %v1388_v46, %v5713_v13  ;;  %v4745_v48 = vpop.f32.mrb[25].mxu1 }
 0x9b0   :  { %v1391_v12 = vpop.f32.mrb[26].mxu1  ;;  %v1475_v48 = vrot.slane %v5832_v25, %v5437_v42 }
 0x9b1   :  { %v1401_v49 = vadd.f32 %v1400_v41, %v1395_v20  ;;  %v1396_v34 = vadd.f32 %v1391_v12, %v5716_v15  ;;  %v4746_v52 = vpop.f32.mrb[27].mxu1 }
 0x9b3   :  { %v1403_v13 = vmul.f32 %v1401_v49, %v5787_v50  ;;  %v1402_v54 = vadd.f32 %v1400_v41, %v1396_v34 }
 0x9b5   :  { %v1404_v53 = vmul.f32 %v1402_v54, %v5793_v27  ;;  %v5803_v15 = vadd.f32 %v1405_v29, %v1403_v13 }
 0x9b7   :  { %v1433_v58 = vsel %vm70_vm0, %v5803_v15, 0.0  ;;  %v5807_v61 = vadd.f32 %v1406_v57, %v1404_v53 }
 0x9b8   :  { %1434 = vadd.xlane.f32.xlu0 %v1433_v58 }
 0x9b9   :  { %v1436_v63 = vsel %vm70_vm0, %v5807_v61, 0.0 }
 0x9ba   :  { %1437 = vadd.xlane.f32.xlu1 %v1436_v63 }
 0xa45   :  { %v1435_v56 = vpop.xlane.xlu0 %1434 }
 0xa46   :  { %v1439_v2 = vmul.f32 0.03125, %v1435_v56 }
 0xa47   :  { %v1438_v36 = vpop.xlane.xlu1 %1437 }
 0xa48   :  { %v1441_v40 = vsub.f32 %v5803_v15, %v1439_v2  ;;  %v1440_v6 = vmul.f32 0.03125, %v1438_v36 }
 0xa4a   :  { %v1442_v51 = vsub.f32 %v5807_v61, %v1440_v6  ;;  %v1443_v55 = vmul.f32 %v1441_v40, %v1441_v40 }
 0xa4c   :  { %v1445_v9 = vsel %vm70_vm0, %v1443_v55, 0.0  ;;  %v1444_v10 = vmul.f32 %v1442_v51, %v1442_v51 }
 0xa4d   :  { %1446 = vadd.xlane.f32.xlu0 %v1445_v9 }
 0xa4e   :  { %v1448_v1 = vsel %vm70_vm0, %v1444_v10, 0.0 }
 0xa4f   :  { %1449 = vadd.xlane.f32.xlu1 %v1448_v1 }
 0xada   :  { %v1447_v14 = vpop.xlane.xlu0 %1446 }
 0xadb   :  { %v1451_v16 = vmul.f32 0.03125, %v1447_v14 }
 0xadc   :  { %v1450_v21 = vpop.xlane.xlu1 %1449 }
 0xadd   :  { %v1453_v22 = vadd.f32 1e-05, %v1451_v16  ;;  %v1452_v24 = vmul.f32 0.03125, %v1450_v21 }
 0xadf   :  { %5213 = vrsqrt.f32 %v1453_v22  ;;  %v1454_v3 = vadd.f32 1e-05, %v1452_v24 }
 0xae1   :  { %5215 = vrsqrt.f32 %v1454_v3 }
 0xae9   :  { %v5214_v11 = vpop.eup %5213 }
 0xaea   :  { %v1457_v4 = vmul.f32 %v5214_v11, %v1441_v40 }
 0xaeb   :  { %v5216_v30 = vpop.eup %5215 }
 0xaec   :  { %v1463_v31 = vmul.f32 %v1462_v7, %v1457_v4  ;;  %v1458_v32 = vmul.f32 %v5216_v30, %v1442_v51 }
 0xaee   :  { %v1464_v38 = vmul.f32 %v1462_v7, %v1458_v32  ;;  %v1469_v41 = vadd.f32 %v1468_v35, %v1463_v31 }
 0xaf0   :  { %v1470_v46 = vadd.f32 %v1468_v35, %v1464_v38 }
 0xaf2   :  { %v1471_v20 = vpack.c.bf16 %v1470_v46, %v1469_v41 }
 0xaf4   :  { %4752 = vmatmul.mubr.msk.bf16.vlgmr.msra.gmra.mrb[28].mxu0 %vm70_vm0, %v1471_v20 }
 0xaf5   :  { %4757 = vmatprep.mubr.msk.bf16.mxu0 %vm5338_vm1, %v5337_v18 }
 0xbc7   :  { %v1525_v12 = vpop.f32.mrb[28].mxu0 }
 0xbc8   :  { %v1526_v49 = vadd.f32 %v1525_v12, %v1475_v48  ;;  %v4753_v34 = vpop.f32.mrb[29].mxu0 }
 0xbc9   :  { %v1528_v52 = vpop.f32.mrb[30].mxu0 }
 0xbca   :  { %v4431_v29 = vpack.c.bf16 %v1526_v49, %v1526_v49  ;;  %v1529_v13 = vadd.f32 %v1528_v52, %v1475_v48  ;;  %v4754_v54 = vpop.f32.mrb[31].mxu0 }
 0xbcc   :  { %v5843_v57 = vpack.c.bf16 %v1529_v13, %v1526_v49  ;;  %v4432_v53 = vpack.c.bf16 %v1529_v13, %v1529_v13  ;;  %1543 = vrot.lane.b32.xlu0 %v4431_v29, %s5340_s29 }
 0xbce   :  { %1592 = vrot.lane.b32.xlu1 %v4432_v53, %s5340_s29  ;;  %v1536_v36 = vsel %vm181_vm2, %v5843_v57, 0  ;;  %v1640_v40 = vsel %vm292_vm3, %v5843_v57, 0  ;;  %v1732_v55 = vsel %vm391_vm4, %v5843_v57, 0  ;;  %v1824_v1 = vsel %vm490_vm5, %v5843_v57, 0 }
 0xbcf   :  { %v4286_v6 = vcombine.low %v1536_v36, %v1536_v36  ;;  %v4293_v51 = vcombine.high %v1640_v40, %v1640_v40  ;;  %v4287_v9 = vcombine.high %v1536_v36, %v1536_v36  ;;  %v4297_v10 = vcombine.high %v1732_v55, %v1732_v55 }
 0xbd0   :  { %v4292_v14 = vcombine.low %v1640_v40, %v1640_v40  ;;  %v4301_v16 = vcombine.high %v1824_v1, %v1824_v1  ;;  %v4296_v21 = vcombine.low %v1732_v55, %v1732_v55  ;;  %v4300_v22 = vcombine.low %v1824_v1, %v1824_v1 }
 0xc3e   :  { %v1544_v58 = vpop.permute.xlu0 %1543 }
 0xc3f   :  { %v1549_v63 = vsel %vm70_vm0, %v1544_v58, 0 }
 0xc40   :  { %4756 = vmatpush3.bf16.xpose.msra.mxu0 %v1549_v63  ;;  %v1593_v56 = vpop.permute.xlu1 %1592 }
 0xc41   :  { %v1598_v2 = vsel %vm70_vm0, %v1593_v56, 0  ;;  %4761 = vmatprep.subr.bf16.mxu0 %v5337_v18 }
 0xc42   :  { %4774 = vmatpush3.bf16.xpose.msra.mxu1 %v1598_v2 }
 0xc43   :  { %4785 = vmatprep.subr.bf16.mxu1 %v5337_v18 }
 0xc47   :  { %4758 = vmatmul.mubr.msk.bf16.vlgmr.msra.gmra.mrb[32].mxu0 %vm70_vm0, %v4286_v6 }
 0xc48   :  { %4762 = vmatpush3.bf16.xpose.msra.mxu0 %v1598_v2  ;;  %4763 = vmatprep.mubr.msk.bf16.mxu0 %vm5338_vm1, %v5337_v18 }
 0xc49   :  { %4776 = vmatmul.mubr.msk.bf16.vlgmr.msra.gmra.mrb[28].mxu1 %vm70_vm0, %v4293_v51  ;;  %4767 = vmatprep.subr.bf16.mxu0 %v5337_v18 }
 0xc4a   :  { %4786 = vmatpush3.bf16.xpose.msra.mxu1 %v1598_v2  ;;  %4787 = vmatprep.mubr.msk.bf16.mxu1 %vm5338_vm1, %v5337_v18 }
 0xc4b   :  { %4797 = vmatprep.subr.bf16.mxu1 %v5337_v18 }
 0xc4f   :  { %4764 = vmatmul.mubr.msk.bf16.vlgmr.msra.gmra.mrb[36].mxu0 %vm70_vm0, %v4287_v9 }
 0xc50   :  { %4768 = vmatpush3.bf16.xpose.msra.mxu0 %v1549_v63  ;;  %4769 = vmatprep.mubr.msk.bf16.mxu0 %vm5338_vm1, %v5337_v18 }
 0xc51   :  { %4788 = vmatmul.mubr.msk.bf16.vlgmr.msra.gmra.mrb[32].mxu1 %vm70_vm0, %v4297_v10  ;;  %4779 = vmatprep.subr.bf16.mxu0 %v5337_v18 }
 0xc52   :  { %4798 = vmatpush3.bf16.xpose.msra.mxu1 %v1598_v2  ;;  %4799 = vmatprep.mubr.msk.bf16.mxu1 %vm5338_vm1, %v5337_v18 }
 0xc53   :  { %4809 = vmatprep.subr.bf16.mxu1 %v5337_v18 }
 0xc57   :  { %4770 = vmatmul.mubr.msk.bf16.vlgmr.msra.gmra.mrb[40].mxu0 %vm70_vm0, %v4292_v14 }
 0xc58   :  { %4780 = vmatpush3.bf16.xpose.msra.mxu0 %v1549_v63  ;;  %4781 = vmatprep.mubr.msk.bf16.mxu0 %vm5338_vm1, %v5337_v18 }
 0xc59   :  { %4800 = vmatmul.mubr.msk.bf16.vlgmr.msra.gmra.mrb[36].mxu1 %vm70_vm0, %v4301_v16  ;;  %4791 = vmatprep.subr.bf16.mxu0 %v5337_v18 }
 0xc5a   :  { %4811 = vmatprep.mubr.msk.bf16.mxu1 %vm5338_vm1, %v5337_v18 }
 0xc5f   :  { %4782 = vmatmul.mubr.msk.bf16.vlgmr.msra.gmra.mrb[44].mxu0 %vm70_vm0, %v4296_v21 }
 0xc60   :  { %4792 = vmatpush3.bf16.xpose.msra.mxu0 %v1549_v63  ;;  %4793 = vmatprep.mubr.msk.bf16.mxu0 %vm5338_vm1, %v5337_v18 }
 0xc61   :  { %4803 = vmatprep.subr.bf16.mxu0 %v5337_v18 }
 0xc67   :  { %4794 = vmatmul.mubr.msk.bf16.vlgmr.msra.gmra.mrb[48].mxu0 %vm70_vm0, %v4300_v22 }
 0xc68   :  { %4805 = vmatprep.mubr.msk.bf16.mxu0 %vm5338_vm1, %v5337_v18 }
 0xd1a   :  { %v1585_v24 = vpop.f32.mrb[32].mxu0 }
 0xd1b   :  { %v1916_v3 = vmul.f32 0.35355338, %v1585_v24  ;;  %v4759_v7 = vpop.f32.mrb[33].mxu0 }
 0xd1c   :  { %v1588_v11 = vpop.f32.mrb[34].mxu0  ;;  %v1726_v4 = vpop.f32.mrb[28].mxu1 }
 0xd1d   :  { %v1919_v30 = vmul.f32 0.35355338, %v1726_v4  ;;  %v4760_v31 = vpop.f32.mrb[35].mxu0  ;;  %v4777_v32 = vpop.f32.mrb[29].mxu1  ;;  %v5894_v35 = vadd.f32 %v1916_v3, %v5540_v23 }
 0xd1e   :  { %v1729_v38 = vpop.f32.mrb[30].mxu1 }
 0xd1f   :  { %v4778_v41 = vpop.f32.mrb[31].mxu1  ;;  %v1932_v46 = vsel %vm599_vm7, %v5894_v35, -inf  ;;  %v5899_v20 = vadd.f32 %v1919_v30, %v5540_v23 }
 0xd20   :  { %1933 = vmax.xlane.f32.xlu1 %v1932_v46 }
 0xd21   :  { %v1941_v34 = vsel %vm599_vm7, %v5899_v20, -inf }
 0xd22   :  { %v1634_v48 = vpop.f32.mrb[36].mxu0 }
 0xd23   :  { %v1917_v12 = vmul.f32 0.35355338, %v1634_v48  ;;  %v4765_v49 = vpop.f32.mrb[37].mxu0 }
 0xd24   :  { %v1818_v52 = vpop.f32.mrb[32].mxu1  ;;  %1942 = vmax.xlane.f32.xlu1 %v1941_v34  ;;  %v1637_v29 = vpop.f32.mrb[38].mxu0 }
 0xd25   :  { %v1921_v13 = vmul.f32 0.35355338, %v1818_v52  ;;  %v4766_v54 = vpop.f32.mrb[39].mxu0  ;;  %v4789_v53 = vpop.f32.mrb[33].mxu1  ;;  %v1925_v58 = vadd.f32 %v1917_v12, %v5540_v23 }
 0xd26   :  { %v1821_v63 = vpop.f32.mrb[34].mxu1 }
 0xd27   :  { %v4790_v56 = vpop.f32.mrb[35].mxu1  ;;  %v1935_v2 = vsel %vm599_vm7, %v1925_v58, -inf  ;;  %v1929_v36 = vadd.f32 %v1921_v13, %v5540_v23  ;;  %v2024_v13 = vsel %vm694_vm8, %v5843_v57, 0 }
 0xd28   :  { %1936 = vmax.xlane.f32.xlu0 %v1935_v2  ;;  %v4308_v53 = vcombine.high %v2024_v13, %v2024_v13  ;;  %v4306_v63 = vcombine.low %v2024_v13, %v2024_v13 }
 0xd29   :  { %v1947_v40 = vsel %vm599_vm7, %v1929_v36, -inf }
 0xd2a   :  { %1948 = vmax.xlane.f32.xlu1 %v1947_v40  ;;  %v1683_v6 = vpop.f32.mrb[40].mxu0 }
 0xd2b   :  { %v1918_v51 = vmul.f32 0.35355338, %v1683_v6  ;;  %v4771_v55 = vpop.f32.mrb[41].mxu0 }
 0xd2c   :  { %v1686_v9 = vpop.f32.mrb[42].mxu0  ;;  %v1910_v10 = vpop.f32.mrb[36].mxu1 }
 0xd2d   :  { %v1923_v1 = vmul.f32 0.35355338, %v1910_v10  ;;  %v4772_v14 = vpop.f32.mrb[43].mxu0  ;;  %v4801_v16 = vpop.f32.mrb[37].mxu1  ;;  %v1926_v21 = vadd.f32 %v1918_v51, %v5540_v23 }
 0xd2e   :  { %v1913_v22 = vpop.f32.mrb[38].mxu1 }
 0xd2f   :  { %v4802_v24 = vpop.f32.mrb[39].mxu1  ;;  %v1938_v3 = vsel %vm599_vm7, %v1926_v21, -inf  ;;  %v1931_v7 = vadd.f32 %v1923_v1, %v5540_v23 }
 0xd30   :  { %1939 = vmax.xlane.f32.xlu0 %v1938_v3 }
 0xd31   :  { %v1953_v11 = vsel %vm599_vm7, %v1931_v7, -inf }
 0xd32   :  { %1954 = vmax.xlane.f32.xlu1 %v1953_v11  ;;  %v1775_v4 = vpop.f32.mrb[44].mxu0 }
 0xd33   :  { %v1920_v30 = vmul.f32 0.35355338, %v1775_v4  ;;  %v4783_v31 = vpop.f32.mrb[45].mxu0 }
 0xd34   :  { %v1778_v32 = vpop.f32.mrb[46].mxu0 }
 0xd35   :  { %v4784_v38 = vpop.f32.mrb[47].mxu0  ;;  %v1928_v41 = vadd.f32 %v1920_v30, %v5540_v23 }
 0xd37   :  { %v1944_v46 = vsel %vm599_vm7, %v1928_v41, -inf }
 0xd38   :  { %1945 = vmax.xlane.f32.xlu0 %v1944_v46 }
 0xd3a   :  { %v1867_v48 = vpop.f32.mrb[48].mxu0 }
 0xd3b   :  { %v1922_v12 = vmul.f32 0.35355338, %v1867_v48  ;;  %v4795_v49 = vpop.f32.mrb[49].mxu0 }
 0xd3c   :  { %v1870_v34 = vpop.f32.mrb[50].mxu0 }
 0xd3d   :  { %v4796_v52 = vpop.f32.mrb[51].mxu0  ;;  %v5914_v29 = vadd.f32 %v1922_v12, %v5540_v23 }
 0xd3f   :  { %v1950_v54 = vsel %vm599_vm7, %v5914_v29, -inf }
 0xd40   :  { %1951 = vmax.xlane.f32.xlu0 %v1950_v54 }
 0xd43   :  { %2083 = vrot.lane.b32.xlu1 %v4308_v53, %s5341_s30 }
 0xd56   :  { %2034 = vrot.lane.b32.xlu0 %v4306_v63, %s5341_s30 }
 0xdad   :  { %v1934_v56 = vpop.xlane.xlu1 %1933 }
 0xdae   :  { %v1956_v2 = vsub.f32 %v5894_v35, %v1934_v56 }
 0xdb0   :  { %v1964_v40 = vmul.f32 1.442695, %v1956_v2 }
 0xdb1   :  { %v1943_v6 = vpop.xlane.xlu1 %1942 }
 0xdb2   :  { %5217 = vpow2.f32 %v1964_v40  ;;  %v1959_v51 = vsub.f32 %v5899_v20, %v1943_v6  ;;  %v2131_v6 = vsel %vm805_vm10, %v5843_v57, 0 }
 0xdb4   :  { %v1970_v55 = vmul.f32 1.442695, %v1959_v51  ;;  %v4314_v51 = vcombine.high %v2131_v6, %v2131_v6 }
 0xdb5   :  { %v1937_v9 = vpop.xlane.xlu0 %1936 }
 0xdb6   :  { %5219 = vpow2.f32 %v1970_v55  ;;  %v1957_v10 = vsub.f32 %v1925_v58, %v1937_v9  ;;  %v2240_v55 = vsel %vm917_vm11, %v5843_v57, 0 }
 0xdb7   :  { %v1949_v1 = vpop.xlane.xlu1 %1948  ;;  %v4318_v9 = vcombine.low %v2240_v55, %v2240_v55 }
 0xdb8   :  { %v1966_v14 = vmul.f32 1.442695, %v1957_v10  ;;  %v1961_v16 = vsub.f32 %v1929_v36, %v1949_v1  ;;  %v4320_v10 = vcombine.high %v2240_v55, %v2240_v55  ;;  %v4312_v1 = vcombine.low %v2131_v6, %v2131_v6 }
 0xdba   :  { %5221 = vpow2.f32 %v1966_v14  ;;  %v1974_v22 = vmul.f32 1.442695, %v1961_v16  ;;  %v2349_v14 = vsel %vm1029_vm12, %v5843_v57, 0 }
 0xdbb   :  { %v4324_v16 = vcombine.low %v2349_v14, %v2349_v14 }
 0xdbc   :  { %v5925_v24 = vpop.eup %5217  ;;  %5223 = vpow2.f32 %v1974_v22 }
 0xdbd   :  { %v1940_v3 = vpop.xlane.xlu0 %1939  ;;  %v1980_v35 = vsel %vm599_vm7, %v5925_v24, 0.0 }
 0xdbe   :  { %v1958_v11 = vsub.f32 %v1926_v21, %v1940_v3  ;;  %1981 = vadd.xlane.f32.xlu0 %v1980_v35 }
 0xdbf   :  { %v1955_v4 = vpop.xlane.xlu1 %1954 }
 0xdc0   :  { %v5929_v20 = vpop.eup %5219  ;;  %v1968_v30 = vmul.f32 1.442695, %v1958_v11  ;;  %v1963_v31 = vsub.f32 %v1931_v7, %v1955_v4  ;;  %v4326_v4 = vcombine.high %v2349_v14, %v2349_v14 }
 0xdc1   :  { %v1989_v58 = vsel %vm599_vm7, %v5929_v20, 0.0 }
 0xdc2   :  { %5225 = vpow2.f32 %v1968_v30  ;;  %v1978_v36 = vmul.f32 1.442695, %v1963_v31  ;;  %1990 = vadd.xlane.f32.xlu1 %v1989_v58 }
 0xdc3   :  { %v2084_v32 = vpop.permute.xlu1 %2083 }
 0xdc4   :  { %v5933_v38 = vpop.eup %5221  ;;  %5227 = vpow2.f32 %v1978_v36  ;;  %v2089_v46 = vsel %vm710_vm9, %v2084_v32, 0 }
 0xdc5   :  { %4810 = vmatpush3.bf16.msra.mxu1 %v2089_v46  ;;  %v1946_v21 = vpop.xlane.xlu0 %1945  ;;  %v1983_v48 = vsel %vm599_vm7, %v5933_v38, 0.0 }
 0xdc6   :  { %v5938_v12 = vpop.eup %5223  ;;  %v1960_v7 = vsub.f32 %v1928_v41, %v1946_v21  ;;  %1984 = vadd.xlane.f32.xlu1 %v1983_v48  ;;  %4821 = vmatprep.subr.bf16.mxu1 %v5337_v18 }
 0xdc7   :  { %v1995_v34 = vsel %vm599_vm7, %v5938_v12, 0.0 }
 0xdc8   :  { %v1972_v49 = vmul.f32 1.442695, %v1960_v7 }
 0xdca   :  { %5229 = vpow2.f32 %v1972_v49  ;;  %1996 = vadd.xlane.f32.xlu1 %v1995_v34 }
 0xdcc   :  { %v5943_v52 = vpop.eup %5225 }
 0xdcd   :  { %v1952_v13 = vpop.xlane.xlu0 %1951  ;;  %v1986_v54 = vsel %vm599_vm7, %v5943_v52, 0.0 }
 0xdce   :  { %v5947_v53 = vpop.eup %5227  ;;  %1987 = vadd.xlane.f32.xlu0 %v1986_v54  ;;  %v1962_v22 = vsub.f32 %v5914_v29, %v1952_v13 }
 0xdcf   :  { %v2001_v41 = vsel %vm599_vm7, %v5947_v53, 0.0 }
 0xdd0   :  { %v1976_v3 = vmul.f32 1.442695, %v1962_v22 }
 0xdd1   :  { %v2035_v63 = vpop.permute.xlu0 %2034 }
 0xdd2   :  { %v2040_v56 = vsel %vm710_vm9, %v2035_v63, 0  ;;  %2002 = vadd.xlane.f32.xlu0 %v2001_v41  ;;  %5231 = vpow2.f32 %v1976_v3 }
 0xdd3   :  { %4804 = vmatpush3.bf16.msra.mxu0 %v2040_v56 }
 0xdd4   :  { %v5952_v2 = vpop.eup %5229  ;;  %4815 = vmatprep.subr.bf16.mxu0 %v5337_v18 }
 0xdd5   :  { %v1992_v40 = vsel %vm599_vm7, %v5952_v2, 0.0 }
 0xdd6   :  { %1993 = vadd.xlane.f32.xlu0 %v1992_v40 }
 0xddb   :  { %2190 = vrot.lane.b32.xlu1 %v4314_v51, %s5341_s30 }
 0xddc   :  { %v5974_v35 = vpop.eup %5231 }
 0xddd   :  { %v1998_v11 = vsel %vm599_vm7, %v5974_v35, 0.0 }
 0xddf   :  { %2250 = vrot.lane.b32.xlu1 %v4318_v9, %s5341_s30 }
 0xde3   :  { %2299 = vrot.lane.b32.xlu1 %v4320_v10, %s5341_s30 }
 0xdec   :  { %2141 = vrot.lane.b32.xlu0 %v4312_v1, %s5341_s30 }
 0xdf0   :  { %2359 = vrot.lane.b32.xlu0 %v4324_v16, %s5341_s30 }
 0xdf4   :  { %2459 = vrot.lane.b32.xlu0 %v5818_v5, %s5343_s6 }
 0xe07   :  { %1999 = vadd.xlane.f32.xlu1 %v1998_v11 }
 0xe18   :  { %2408 = vrot.lane.b32.xlu1 %v4326_v4, %s5341_s30 }
 0xe1c   :  { %2461 = vrot.lane.b32.xlu1 %v5824_v8, %s5343_s6 }
 0xe4b   :  { %v1982_v57 = vpop.xlane.xlu0 %1981 }
 0xe4c   :  { %5233 = vrcp.f32 %v1982_v57 }
 0xe4f   :  { %v1991_v29 = vpop.xlane.xlu1 %1990 }
 0xe53   :  { %v1985_v30 = vpop.xlane.xlu1 %1984 }
 0xe54   :  { %5235 = vrcp.f32 %v1985_v30 }
 0xe55   :  { %5237 = vrcp.f32 %v1991_v29 }
 0xe56   :  { %v5234_v5 = vpop.eup %5233 }
 0xe57   :  { %v2012_v31 = vmul.f32 %v5234_v5, %v5925_v24  ;;  %v1997_v36 = vpop.xlane.xlu1 %1996 }
 0xe59   :  { %v4433_v58 = vpack.c.bf16 %v2012_v31, %v2012_v31 }
 0xe5b   :  { %4806 = vmatmul.mubr.msk.bf16.vlgmr.msra.gmra.mrb[52].mxu0 %vm599_vm7, %v4433_v58  ;;  %v1988_v32 = vpop.xlane.xlu0 %1987  ;;  %v2191_v48 = vpop.permute.xlu1 %2190 }
 0xe5c   :  { %5239 = vrcp.f32 %v1988_v32  ;;  %4817 = vmatprep.mubr.msk.bf16.mxu0 %vm5338_vm1, %v5337_v18  ;;  %v2196_v49 = vsel %vm710_vm9, %v2191_v48, 0 }
 0xe5e   :  { %v5236_v46 = vpop.eup %5235 }
 0xe5f   :  { %v2013_v8 = vmul.f32 %v5236_v46, %v5933_v38  ;;  %v2003_v21 = vpop.xlane.xlu0 %2002  ;;  %v5238_v34 = vpop.eup %5237 }
 0xe60   :  { %v2251_v54 = vpop.permute.xlu1 %2250  ;;  %v2015_v56 = vmul.f32 %v5238_v34, %v5929_v20 }
 0xe61   :  { %v4434_v7 = vpack.c.bf16 %v2013_v8, %v2013_v8  ;;  %v2256_v6 = vsel %vm710_vm9, %v2251_v54, 0 }
 0xe62   :  { %v4436_v55 = vpack.c.bf16 %v2015_v56, %v2015_v56 }
 0xe63   :  { %4812 = vmatmul.mubr.msk.bf16.vlgmr.msra.gmra.mrb[40].mxu1 %vm599_vm7, %v4434_v7  ;;  %v1994_v24 = vpop.xlane.xlu0 %1993 }
 0xe64   :  { %4822 = vmatpush3.bf16.msra.mxu1 %v2196_v49  ;;  %4823 = vmatprep.mubr.msk.bf16.mxu1 %vm5338_vm1, %v5337_v18  ;;  %5241 = vrcp.f32 %v1994_v24  ;;  %v2300_v51 = vpop.permute.xlu1 %2299  ;;  %v2514_v24 = vrot.slane %v5832_v25, %v5708_v17 }
 0xe65   :  { %4833 = vmatprep.subr.bf16.mxu1 %v5337_v18  ;;  %5243 = vrcp.f32 %v1997_v36  ;;  %v2305_v9 = vsel %vm710_vm9, %v2300_v51, 0 }
 0xe66   :  { %v5240_v13 = vpop.eup %5239  ;;  %5245 = vrcp.f32 %v2003_v21 }
 0xe67   :  { %v2014_v38 = vmul.f32 %v5240_v13, %v5943_v52  ;;  %v2142_v63 = vpop.permute.xlu0 %2141 }
 0xe68   :  { %v2147_v41 = vsel %vm710_vm9, %v2142_v63, 0 }
 0xe69   :  { %4816 = vmatpush3.bf16.msra.mxu0 %v2147_v41  ;;  %v4435_v40 = vpack.c.bf16 %v2014_v38, %v2014_v38 }
 0xe6a   :  { %4827 = vmatprep.subr.bf16.mxu0 %v5337_v18 }
 0xe6b   :  { %v2360_v14 = vpop.permute.xlu0 %2359 }
 0xe6c   :  { %4818 = vmatmul.mubr.msk.bf16.vlgmr.msra.gmra.mrb[52].mxu0 %vm599_vm7, %v4435_v40  ;;  %v2365_v22 = vsel %vm710_vm9, %v2360_v14, 0 }
 0xe6d   :  { %4828 = vmatpush3.bf16.msra.mxu0 %v2256_v6  ;;  %4829 = vmatprep.mubr.msk.bf16.mxu0 %vm5338_vm1, %v5337_v18 }
 0xe6e   :  { %4839 = vmatprep.subr.bf16.mxu0 %v5337_v18  ;;  %v5242_v52 = vpop.eup %5241 }
 0xe6f   :  { %4824 = vmatmul.mubr.msk.bf16.vlgmr.msra.gmra.mrb[40].mxu1 %vm599_vm7, %v4436_v55  ;;  %v5244_v20 = vpop.eup %5243  ;;  %v2016_v10 = vmul.f32 %v5242_v52, %v5952_v2 }
 0xe70   :  { %4834 = vmatpush3.bf16.msra.mxu1 %v2305_v9  ;;  %4835 = vmatprep.mubr.msk.bf16.mxu1 %vm5338_vm1, %v5337_v18  ;;  %v2017_v1 = vmul.f32 %v5244_v20, %v5938_v12  ;;  %v5246_v12 = vpop.eup %5245 }
 0xe71   :  { %4845 = vmatprep.subr.bf16.mxu1 %v5337_v18  ;;  %v4437_v16 = vpack.c.bf16 %v2016_v10, %v2016_v10  ;;  %v2019_v11 = vmul.f32 %v5246_v12, %v5947_v53  ;;  %v2460_v53 = vpop.permute.xlu0 %2459 }
 0xe72   :  { %v4438_v3 = vpack.c.bf16 %v2017_v1, %v2017_v1 }
 0xe73   :  { %v4440_v29 = vpack.c.bf16 %v2019_v11, %v2019_v11 }
 0xe78   :  { %4830 = vmatmul.mubr.msk.bf16.vlgmr.msra.gmra.mrb[52].mxu0 %vm599_vm7, %v4437_v16 }
 0xe79   :  { %4840 = vmatpush3.bf16.msra.mxu0 %v2365_v22  ;;  %4841 = vmatprep.mubr.msk.bf16.mxu0 %vm5338_vm1, %v5337_v18  ;;  %v5141_v22 = vld [vmem:[%s6451_s1 + $0x24] ss:$8 sps:$4 sm:$0xff]  }
 0xe7a   :  { %4851 = vmatprep.subr.bf16.mxu0 %v5337_v18 }
 0xe7b   :  { %4836 = vmatmul.mubr.msk.bf16.vlgmr.msra.gmra.mrb[40].mxu1 %vm599_vm7, %v4438_v3  ;;  %v5142_v3 = vld [vmem:[%s6451_s1 + $0x34] ss:$8 sps:$4 sm:$0xff]  }
 0xe7c   :  { %4847 = vmatprep.mubr.msk.bf16.mxu1 %vm5338_vm1, %v5337_v18 }
 0xe94   :  { %v2000_v2 = vpop.xlane.xlu1 %1999 }
 0xe95   :  { %5247 = vrcp.f32 %v2000_v2 }
 0xe98   :  { %v2409_v4 = vpop.permute.xlu1 %2408 }
 0xe99   :  { %v2414_v57 = vsel %vm710_vm9, %v2409_v4, 0 }
 0xe9a   :  { %4846 = vmatpush3.bf16.msra.mxu1 %v2414_v57 }
 0xe9b   :  { %4859 = vmatprep.subr.bf16.mxu1 %v5337_v18 }
 0xe9c   :  { %v2462_v58 = vpop.permute.xlu1 %2461 }
 0xe9d   :  { %4848 = vmatmul.mubr.msk.bf16.vlgmr.msra.gmra.mrb[40].mxu1 %vm599_vm7, %v4440_v29 }
 0xe9e   :  { %4863 = vmatprep.mubr.msk.bf16.mxu1 %vm5338_vm1, %v5337_v18  ;;  %4860 = vmatpush3.bf16.msra.mxu1 %v5141_v22 }
 0xe9f   :  { %v5248_v30 = vpop.eup %5247  ;;  %4861 = vmatprep.subr.bf16.mxu1 %v5337_v18 }
 0xea0   :  { %v2018_v5 = vmul.f32 %v5248_v30, %v5974_v35 }
 0xea2   :  { %v4439_v31 = vpack.c.bf16 %v2018_v5, %v2018_v5  ;;  %4862 = vmatpush3.bf16.msra.mxu1 %v5142_v3  ;;  %v2546_v5 = vrot.slane %v5832_v25, %v5727_v47 }
 0xea3   :  { %4887 = vmatprep.subr.bf16.mxu1 %v5337_v18 }
 0xea4   :  { %4842 = vmatmul.mubr.msk.bf16.vlgmr.msra.gmra.mrb[52].mxu0 %vm599_vm7, %v4439_v31 }
 0xea5   :  { %4855 = vmatprep.mubr.msk.bf16.mxu0 %vm5338_vm1, %v5337_v18  ;;  %4852 = vmatpush3.bf16.msra.mxu0 %v2460_v53 }
 0xea6   :  { %4853 = vmatprep.subr.bf16.mxu0 %v5337_v18 }
 0xea9   :  { %4854 = vmatpush3.bf16.msra.mxu0 %v2462_v58 }
 0xeaa   :  { %4867 = vmatprep.subr.bf16.mxu0 %v5337_v18 }
 0xf70   :  { %v2450_v36 = vpop.f32.mrb[40].mxu1 }
 0xf71   :  { %v4849_v32 = vpop.f32.mrb[41].mxu1 }
 0xf72   :  { %v2453_v46 = vpop.f32.mrb[42].mxu1  ;;  %v2552_v32 = vrot.slane %v5832_v25, %v5732_v26 }
 0xf73   :  { %v4850_v8 = vpop.f32.mrb[43].mxu1 }
 0xf77   :  { %v2401_v21 = vpop.f32.mrb[52].mxu0 }
 0xf78   :  { %v2458_v35 = vpack.c.bf16 %v2450_v36, %v2401_v21  ;;  %v4843_v48 = vpop.f32.mrb[53].mxu0 }
 0xf79   :  { %v2404_v7 = vpop.f32.mrb[54].mxu0  ;;  %v5143_v48 = vld [vmem:[%s6452_s2 + $0x40] sm:$0xff]  }
 0xf7a   :  { %v4844_v49 = vpop.f32.mrb[55].mxu0  ;;  %4856 = vmatmul.mubr.msk.bf16.vlgmr.msra.gmra.mrb[56].mxu0 %vm70_vm0, %v2458_v35  ;;  %v5144_v7 = vld [vmem:[%s6452_s2 + $0x48] sm:$0xff]  }
 0xf7b   :  { %4883 = vmatprep.mubr.msk.bf16.mxu0 %vm5338_vm1, %v5337_v18  ;;  %4868 = vmatpush3.bf16.msra.mxu0 %v5143_v48  ;;  %v5145_v49 = vld [vmem:[%s6452_s2 + $0x50] sm:$0xff]  }
 0xf7c   :  { %4869 = vmatprep.subr.bf16.mxu0 %v5337_v18 }
 0xf7f   :  { %4870 = vmatpush3.bf16.msra.mxu0 %v5144_v7 }
 0xf80   :  { %4871 = vmatprep.subr.bf16.mxu0 %v5337_v18 }
 0xf83   :  { %4872 = vmatpush3.bf16.msra.mxu0 %v5145_v49 }
 0xf84   :  { %4873 = vmatprep.subr.bf16.mxu0 %v5337_v18 }
0x104d   :  { %v2502_v34 = vpop.f32.mrb[56].mxu0 }
0x104e   :  { %v2509_v13 = vadd.f32 %v2502_v34, %v5803_v15  ;;  %v4857_v54 = vpop.f32.mrb[57].mxu0  ;;  %v5147_v34 = vld [vmem:[%s6452_s2 + $0x60] sm:$0xff]  }
0x104f   :  { %v2505_v38 = vpop.f32.mrb[58].mxu0  ;;  %v5149_v54 = vld [vmem:[%s6452_s2 + $0x70] sm:$0xff]  }
0x1050   :  { %v6033_v63 = vadd.f32 %v2514_v24, %v2509_v13  ;;  %v2510_v41 = vadd.f32 %v2505_v38, %v5807_v61  ;;  %v4858_v56 = vpop.f32.mrb[59].mxu0  ;;  %v5148_v13 = vld [vmem:[%s6452_s2 + $0x68] sm:$0xff]   ;;  %v5150_v38 = vld [vmem:[%s6452_s2 + $0x78] sm:$0xff]  }
0x1052   :  { %v6036_v40 = vadd.f32 %v2514_v24, %v2510_v41  ;;  %v2517_v6 = vsel %vm70_vm0, %v6033_v63, 0.0  ;;  %v5146_v24 = vld [vmem:[%s6452_s2 + $0x58] sm:$0xff]   ;;  %v2559_v41 = vrot.slane %v5832_v25, %v5772_v19 }
0x1053   :  { %2518 = vadd.xlane.f32.xlu0 %v2517_v6  ;;  %4874 = vmatpush3.bf16.msra.mxu0 %v5146_v24 }
0x1054   :  { %v2520_v51 = vsel %vm70_vm0, %v6036_v40, 0.0  ;;  %4875 = vmatprep.subr.bf16.mxu0 %v5337_v18 }
0x1055   :  { %2521 = vadd.xlane.f32.xlu1 %v2520_v51 }
0x1057   :  { %4876 = vmatpush3.bf16.msra.mxu0 %v5147_v34 }
0x1058   :  { %4877 = vmatprep.subr.bf16.mxu0 %v5337_v18 }
0x105b   :  { %4878 = vmatpush3.bf16.msra.mxu0 %v5148_v13 }
0x105c   :  { %4879 = vmatprep.subr.bf16.mxu0 %v5337_v18 }
0x105f   :  { %4880 = vmatpush3.bf16.msra.mxu0 %v5149_v54 }
0x1060   :  { %4881 = vmatprep.subr.bf16.mxu0 %v5337_v18 }
0x1063   :  { %4882 = vmatpush3.bf16.msra.mxu0 %v5150_v38 }
0x1064   :  { %4913 = vmatprep.subr.bf16.mxu0 %v5337_v18 }
0x10e0   :  { %v2519_v55 = vpop.xlane.xlu0 %2518 }
0x10e1   :  { %v2523_v52 = vmul.f32 0.03125, %v2519_v55 }
0x10e2   :  { %v2522_v15 = vpop.xlane.xlu1 %2521 }
0x10e3   :  { %v2525_v9 = vsub.f32 %v6033_v63, %v2523_v52  ;;  %v2524_v20 = vmul.f32 0.03125, %v2522_v15 }
0x10e5   :  { %v2526_v10 = vsub.f32 %v6036_v40, %v2524_v20  ;;  %v2527_v61 = vmul.f32 %v2525_v9, %v2525_v9 }
0x10e7   :  { %v2529_v1 = vsel %vm70_vm0, %v2527_v61, 0.0  ;;  %v2528_v14 = vmul.f32 %v2526_v10, %v2526_v10 }
0x10e8   :  { %2530 = vadd.xlane.f32.xlu0 %v2529_v1 }
0x10e9   :  { %v2532_v16 = vsel %vm70_vm0, %v2528_v14, 0.0 }
0x10ec   :  { %2533 = vadd.xlane.f32.xlu0 %v2532_v16 }
0x1175   :  { %v2531_v12 = vpop.xlane.xlu0 %2530 }
0x1176   :  { %v2535_v2 = vmul.f32 0.03125, %v2531_v12 }
0x1178   :  { %v2537_v11 = vadd.f32 1e-05, %v2535_v2 }
0x1179   :  { %v2534_v4 = vpop.xlane.xlu0 %2533 }
0x117a   :  { %5249 = vrsqrt.f32 %v2537_v11  ;;  %v2536_v57 = vmul.f32 0.03125, %v2534_v4 }
0x117c   :  { %v2538_v29 = vadd.f32 1e-05, %v2536_v57  ;;  %v2719_v57 = vrot.slane %v5832_v25, %v5779_v39  ;;  %v2725_v25 = vld [vmem:[%s6454_s4 + $0x40] sm:$0xff] }
0x117e   :  { %5251 = vrsqrt.f32 %v2538_v29 }
0x1184   :  { %v5250_v30 = vpop.eup %5249 }
0x1185   :  { %v2541_v31 = vmul.f32 %v5250_v30, %v2525_v9 }
0x1187   :  { %v2547_v58 = vmul.f32 %v2546_v5, %v2541_v31 }
0x1188   :  { %v5252_v53 = vpop.eup %5251 }
0x1189   :  { %v2542_v36 = vmul.f32 %v5252_v53, %v2526_v10  ;;  %v2553_v8 = vadd.f32 %v2552_v32, %v2547_v58 }
0x118b   :  { %v2548_v46 = vmul.f32 %v2546_v5, %v2542_v36 }
0x118d   :  { %v2554_v21 = vadd.f32 %v2552_v32, %v2548_v46  ;;  %v2724_v32 = vld [vmem:[%s6454_s4 + $0x38] sm:$0xff] }
0x118f   :  { %v2555_v35 = vpack.c.bf16 %v2554_v21, %v2553_v8 }
0x1191   :  { %4864 = vmatmul.mubr.msk.bf16.vlgmr.msra.gmra.mrb[44].mxu1 %vm70_vm0, %v2555_v35 }
0x1192   :  { %4891 = vmatprep.mubr.msk.bf16.mxu1 %vm5338_vm1, %v5337_v18 }
0x1264   :  { %v2605_v56 = vpop.f32.mrb[44].mxu1 }
0x1265   :  { %v2606_v6 = vadd.f32 %v2605_v56, %v2559_v41  ;;  %v4865_v51 = vpop.f32.mrb[45].mxu1  ;;  %v6124_v56 = vld [vmem:[%s6451_s1 + $0x40] ss:$8 sps:$4 sm:$0xff]  }
0x1266   :  { %v2608_v55 = vpop.f32.mrb[46].mxu1  ;;  %4888 = vmatpush3.bf16.msra.mxu1 %v6124_v56 }
0x1267   :  { %v2612_v52 = vmul.f32 -1.702, %v2606_v6  ;;  %v2609_v15 = vadd.f32 %v2608_v55, %v2559_v41  ;;  %v4866_v9 = vpop.f32.mrb[47].mxu1  ;;  %4889 = vmatprep.subr.bf16.mxu1 %v5337_v18 }
0x1269   :  { %v2614_v20 = vmul.f32 1.442695, %v2612_v52  ;;  %v2613_v10 = vmul.f32 -1.702, %v2609_v15 }
0x126b   :  { %5253 = vpow2.f32 %v2614_v20  ;;  %v2616_v61 = vmul.f32 1.442695, %v2613_v10  ;;  %v6138_v10 = vld [vmem:[%s6453_s3 + $0x10] sm:$0xff] }
0x126d   :  { %5255 = vpow2.f32 %v2616_v61  ;;  %v2781_v61 = vrot.slane %v6138_v10, %v5419_v28  ;;  %v2794_v28 = vrot.slane %v6138_v10, %v5437_v42 }
0x1275   :  { %v5254_v1 = vpop.eup %5253 }
0x1276   :  { %v2618_v14 = vadd.f32 1.0, %v5254_v1 }
0x1277   :  { %v5256_v16 = vpop.eup %5255 }
0x1278   :  { %5257 = vrcp.f32 %v2618_v14  ;;  %v2619_v22 = vadd.f32 1.0, %v5256_v16 }
0x127a   :  { %5259 = vrcp.f32 %v2619_v22 }
0x1282   :  { %v5258_v3 = vpop.eup %5257 }
0x1283   :  { %v2622_v2 = vmul.f32 %v5258_v3, %v2606_v6  ;;  %v6130_v6 = vld [vmem:[%s6451_s1 + $0x50] ss:$8 sps:$4 sm:$0xff]  }
0x1284   :  { %v5260_v12 = vpop.eup %5259  ;;  %4890 = vmatpush3.bf16.msra.mxu1 %v6130_v6 }
0x1285   :  { %v2623_v11 = vmul.f32 %v5260_v12, %v2609_v15  ;;  %4895 = vmatprep.subr.bf16.mxu1 %v5337_v18  ;;  %v2787_v12 = vrot.slane %v6138_v10, %v5429_v33 }
0x1287   :  { %v2624_v4 = vpack.c.bf16 %v2623_v11, %v2622_v2 }
0x1289   :  { %4884 = vmatmul.mubr.bf16.vlgmr.msra.gmra.mrb[60].mxu0 %v2624_v4 }
0x128a   :  { %4915 = vmatprep.mubr.msk.bf16.mxu0 %vm5338_vm1, %v5337_v18 }
0x135c   :  { %v2707_v29 = vpop.f32.mrb[60].mxu0 }
0x135d   :  { %v2714_v30 = vadd.f32 %v2707_v29, %v6033_v63  ;;  %v4885_v5 = vpop.f32.mrb[61].mxu0 }
0x135e   :  { %v2710_v31 = vpop.f32.mrb[62].mxu0 }
0x135f   :  { %v2720_v53 = vadd.f32 %v2719_v57, %v2714_v30  ;;  %v2715_v58 = vadd.f32 %v2710_v31, %v6036_v40  ;;  %v4886_v36 = vpop.f32.mrb[63].mxu0 }
0x1361   :  { %v2722_v46 = vmul.f32 %v2720_v53, %v5787_v50  ;;  %v2721_v8 = vadd.f32 %v2719_v57, %v2715_v58 }
0x1363   :  { %v2723_v21 = vmul.f32 %v2721_v8, %v5793_v27  ;;  %v6109_v63 = vadd.f32 %v2724_v32, %v2722_v46 }
0x1365   :  { %v2752_v35 = vsel %vm70_vm0, %v6109_v63, 0.0  ;;  %v6113_v40 = vadd.f32 %v2725_v25, %v2723_v21 }
0x1366   :  { %2753 = vadd.xlane.f32.xlu0 %v2752_v35 }
0x1367   :  { %v2755_v48 = vsel %vm70_vm0, %v6113_v40, 0.0 }
0x1368   :  { %2756 = vadd.xlane.f32.xlu1 %v2755_v48 }
0x13f3   :  { %v2754_v50 = vpop.xlane.xlu0 %2753 }
0x13f4   :  { %v2758_v7 = vmul.f32 0.03125, %v2754_v50 }
0x13f5   :  { %v2757_v49 = vpop.xlane.xlu1 %2756 }
0x13f6   :  { %v2760_v24 = vsub.f32 %v6109_v63, %v2758_v7  ;;  %v2759_v34 = vmul.f32 0.03125, %v2757_v49 }
0x13f8   :  { %v2761_v27 = vsub.f32 %v6113_v40, %v2759_v34  ;;  %v2762_v13 = vmul.f32 %v2760_v24, %v2760_v24 }
0x13fa   :  { %v2764_v54 = vsel %vm70_vm0, %v2762_v13, 0.0  ;;  %v2763_v38 = vmul.f32 %v2761_v27, %v2761_v27 }
0x13fb   :  { %2765 = vadd.xlane.f32.xlu0 %v2764_v54 }
0x13fc   :  { %v2767_v41 = vsel %vm70_vm0, %v2763_v38, 0.0 }
0x13fd   :  { %2768 = vadd.xlane.f32.xlu1 %v2767_v41 }
0x1488   :  { %v2766_v51 = vpop.xlane.xlu0 %2765 }
0x1489   :  { %v2770_v55 = vmul.f32 0.03125, %v2766_v51 }
0x148a   :  { %v2769_v52 = vpop.xlane.xlu1 %2768 }
0x148b   :  { %v2772_v15 = vadd.f32 1e-05, %v2770_v55  ;;  %v2771_v9 = vmul.f32 0.03125, %v2769_v52 }
0x148d   :  { %5261 = vrsqrt.f32 %v2772_v15  ;;  %v2773_v20 = vadd.f32 1e-05, %v2771_v9 }
0x148f   :  { %5263 = vrsqrt.f32 %v2773_v20 }
0x1497   :  { %v5262_v1 = vpop.eup %5261 }
0x1498   :  { %v2776_v14 = vmul.f32 %v5262_v1, %v2760_v24 }
0x1499   :  { %v5264_v16 = vpop.eup %5263 }
0x149a   :  { %v2782_v22 = vmul.f32 %v2781_v61, %v2776_v14  ;;  %v2777_v3 = vmul.f32 %v5264_v16, %v2761_v27 }
0x149c   :  { %v2783_v2 = vmul.f32 %v2781_v61, %v2777_v3  ;;  %v2788_v11 = vadd.f32 %v2787_v12, %v2782_v22 }
0x149e   :  { %v2789_v4 = vadd.f32 %v2787_v12, %v2783_v2 }
0x14a0   :  { %v2790_v57 = vpack.c.bf16 %v2789_v4, %v2788_v11 }
0x14a2   :  { %4892 = vmatmul.mubr.msk.bf16.vlgmr.msra.gmra.mrb[48].mxu1 %vm70_vm0, %v2790_v57 }
0x14a3   :  { %4897 = vmatprep.mubr.msk.bf16.mxu1 %vm5338_vm1, %v5337_v18 }
0x1575   :  { %v2844_v29 = vpop.f32.mrb[48].mxu1 }
0x1576   :  { %v2845_v30 = vadd.f32 %v2844_v29, %v2794_v28  ;;  %v4893_v5 = vpop.f32.mrb[49].mxu1 }
0x1577   :  { %v2847_v31 = vpop.f32.mrb[50].mxu1 }
0x1578   :  { %v4441_v53 = vpack.c.bf16 %v2845_v30, %v2845_v30  ;;  %v2848_v58 = vadd.f32 %v2847_v31, %v2794_v28  ;;  %v4894_v36 = vpop.f32.mrb[51].mxu1 }
0x157a   :  { %v6149_v33 = vpack.c.bf16 %v2848_v58, %v2845_v30  ;;  %v4442_v32 = vpack.c.bf16 %v2848_v58, %v2848_v58  ;;  %2862 = vrot.lane.b32.xlu0 %v4441_v53, %s5340_s29 }
0x157c   :  { %2911 = vrot.lane.b32.xlu1 %v4442_v32, %s5340_s29  ;;  %v2855_v21 = vsel %vm181_vm2, %v6149_v33, 0  ;;  %v2959_v35 = vsel %vm292_vm3, %v6149_v33, 0  ;;  %v3051_v59 = vsel %vm391_vm4, %v6149_v33, 0  ;;  %v3143_v62 = vsel %vm490_vm5, %v6149_v33, 0 }
0x157d   :  { %v4364_v48 = vcombine.low %v2855_v21, %v2855_v21  ;;  %v4371_v50 = vcombine.high %v2959_v35, %v2959_v35  ;;  %v4365_v60 = vcombine.high %v2855_v21, %v2855_v21  ;;  %v4375_v7 = vcombine.high %v3051_v59, %v3051_v59 }
0x157e   :  { %v4370_v49 = vcombine.low %v2959_v35, %v2959_v35  ;;  %v4379_v24 = vcombine.high %v3143_v62, %v3143_v62  ;;  %v4374_v34 = vcombine.low %v3051_v59, %v3051_v59  ;;  %v4378_v0 = vcombine.low %v3143_v62, %v3143_v62 }
0x15ec   :  { %v2863_v46 = vpop.permute.xlu0 %2862 }
0x15ed   :  { %v2868_v8 = vsel %vm70_vm0, %v2863_v46, 0 }
0x15ee   :  { %4896 = vmatpush3.bf16.xpose.msra.mxu1 %v2868_v8  ;;  %v2912_v25 = vpop.permute.xlu1 %2911 }
0x15ef   :  { %v2917_v42 = vsel %vm70_vm0, %v2912_v25, 0  ;;  %4901 = vmatprep.subr.bf16.mxu1 %v5337_v18 }
0x15f0   :  { %4914 = vmatpush3.bf16.xpose.msra.mxu0 %v2917_v42 }
0x15f1   :  { %4925 = vmatprep.subr.bf16.mxu0 %v5337_v18 }
0x15f5   :  { %4898 = vmatmul.mubr.msk.bf16.vlgmr.msra.gmra.mrb[52].mxu1 %vm70_vm0, %v4364_v48 }
0x15f6   :  { %4902 = vmatpush3.bf16.xpose.msra.mxu1 %v2917_v42  ;;  %4903 = vmatprep.mubr.msk.bf16.mxu1 %vm5338_vm1, %v5337_v18 }
0x15f7   :  { %4916 = vmatmul.mubr.msk.bf16.vlgmr.msra.gmra.mrb[64].mxu0 %vm70_vm0, %v4371_v50  ;;  %4907 = vmatprep.subr.bf16.mxu1 %v5337_v18 }
0x15f8   :  { %4926 = vmatpush3.bf16.xpose.msra.mxu0 %v2917_v42  ;;  %4927 = vmatprep.mubr.msk.bf16.mxu0 %vm5338_vm1, %v5337_v18 }
0x15f9   :  { %4937 = vmatprep.subr.bf16.mxu0 %v5337_v18 }
0x15fd   :  { %4904 = vmatmul.mubr.msk.bf16.vlgmr.msra.gmra.mrb[56].mxu1 %vm70_vm0, %v4365_v60 }
0x15fe   :  { %4908 = vmatpush3.bf16.xpose.msra.mxu1 %v2868_v8  ;;  %4909 = vmatprep.mubr.msk.bf16.mxu1 %vm5338_vm1, %v5337_v18 }
0x15ff   :  { %4928 = vmatmul.mubr.msk.bf16.vlgmr.msra.gmra.mrb[68].mxu0 %vm70_vm0, %v4375_v7  ;;  %4919 = vmatprep.subr.bf16.mxu1 %v5337_v18 }
0x1600   :  { %4938 = vmatpush3.bf16.xpose.msra.mxu0 %v2917_v42  ;;  %4939 = vmatprep.mubr.msk.bf16.mxu0 %vm5338_vm1, %v5337_v18 }
0x1601   :  { %4949 = vmatprep.subr.bf16.mxu0 %v5337_v18 }
0x1605   :  { %4910 = vmatmul.mubr.msk.bf16.vlgmr.msra.gmra.mrb[60].mxu1 %vm70_vm0, %v4370_v49 }
0x1606   :  { %4920 = vmatpush3.bf16.xpose.msra.mxu1 %v2868_v8  ;;  %4921 = vmatprep.mubr.msk.bf16.mxu1 %vm5338_vm1, %v5337_v18 }
0x1607   :  { %4940 = vmatmul.mubr.msk.bf16.vlgmr.msra.gmra.mrb[72].mxu0 %vm70_vm0, %v4379_v24  ;;  %4931 = vmatprep.subr.bf16.mxu1 %v5337_v18 }
0x1608   :  { %4951 = vmatprep.mubr.msk.bf16.mxu0 %vm5338_vm1, %v5337_v18 }
0x160d   :  { %4922 = vmatmul.mubr.msk.bf16.vlgmr.msra.gmra.mrb[64].mxu1 %vm70_vm0, %v4374_v34 }
0x160e   :  { %4932 = vmatpush3.bf16.xpose.msra.mxu1 %v2868_v8  ;;  %4933 = vmatprep.mubr.msk.bf16.mxu1 %vm5338_vm1, %v5337_v18 }
0x160f   :  { %4943 = vmatprep.subr.bf16.mxu1 %v5337_v18 }
0x1615   :  { %4934 = vmatmul.mubr.msk.bf16.vlgmr.msra.gmra.mrb[68].mxu1 %vm70_vm0, %v4378_v0 }
0x1616   :  { %4945 = vmatprep.mubr.msk.bf16.mxu1 %vm5338_vm1, %v5337_v18 }
0x16c8   :  { %v2904_v27 = vpop.f32.mrb[52].mxu1 }
0x16c9   :  { %v3235_v13 = vmul.f32 0.35355338, %v2904_v27  ;;  %v4899_v54 = vpop.f32.mrb[53].mxu1 }
0x16ca   :  { %v2907_v38 = vpop.f32.mrb[54].mxu1  ;;  %v3045_v41 = vpop.f32.mrb[64].mxu0 }
0x16cb   :  { %v3238_v51 = vmul.f32 0.35355338, %v3045_v41  ;;  %v4900_v55 = vpop.f32.mrb[55].mxu1  ;;  %v4917_v52 = vpop.f32.mrb[65].mxu0  ;;  %v6200_v15 = vadd.f32 %v3235_v13, %v5540_v23 }
0x16cc   :  { %v3048_v9 = vpop.f32.mrb[66].mxu0 }
0x16cd   :  { %v4918_v20 = vpop.f32.mrb[67].mxu0  ;;  %v3251_v61 = vsel %vm599_vm7, %v6200_v15, -inf  ;;  %v6205_v1 = vadd.f32 %v3238_v51, %v5540_v23  ;;  %v3343_v9 = vsel %vm694_vm8, %v6149_v33, 0 }
0x16ce   :  { %3252 = vmax.xlane.f32.xlu1 %v3251_v61  ;;  %v4386_v61 = vcombine.high %v3343_v9, %v3343_v9 }
0x16cf   :  { %v3260_v3 = vsel %vm599_vm7, %v6205_v1, -inf }
0x16d0   :  { %v2953_v14 = vpop.f32.mrb[56].mxu1 }
0x16d1   :  { %v3236_v16 = vmul.f32 0.35355338, %v2953_v14  ;;  %v4905_v22 = vpop.f32.mrb[57].mxu1  ;;  %v4384_v14 = vcombine.low %v3343_v9, %v3343_v9 }
0x16d2   :  { %v2956_v12 = vpop.f32.mrb[58].mxu1  ;;  %3261 = vmax.xlane.f32.xlu1 %v3260_v3  ;;  %v3137_v2 = vpop.f32.mrb[68].mxu0 }
0x16d3   :  { %v3240_v11 = vmul.f32 0.35355338, %v3137_v2  ;;  %v4906_v4 = vpop.f32.mrb[59].mxu1  ;;  %v4929_v57 = vpop.f32.mrb[69].mxu0  ;;  %v3244_v28 = vadd.f32 %v3236_v16, %v5540_v23 }
0x16d4   :  { %v3140_v29 = vpop.f32.mrb[70].mxu0 }
0x16d5   :  { %v4930_v30 = vpop.f32.mrb[71].mxu0  ;;  %v3254_v5 = vsel %vm599_vm7, %v3244_v28, -inf  ;;  %v3248_v31 = vadd.f32 %v3240_v11, %v5540_v23 }
0x16d6   :  { %3255 = vmax.xlane.f32.xlu0 %v3254_v5 }
0x16d7   :  { %v3266_v53 = vsel %vm599_vm7, %v3248_v31, -inf }
0x16d8   :  { %v3002_v58 = vpop.f32.mrb[60].mxu1  ;;  %3267 = vmax.xlane.f32.xlu1 %v3266_v53 }
0x16d9   :  { %v3237_v36 = vmul.f32 0.35355338, %v3002_v58  ;;  %v4911_v32 = vpop.f32.mrb[61].mxu1 }
0x16da   :  { %v3005_v46 = vpop.f32.mrb[62].mxu1  ;;  %v3229_v8 = vpop.f32.mrb[72].mxu0 }
0x16db   :  { %v3242_v25 = vmul.f32 0.35355338, %v3229_v8  ;;  %v4912_v42 = vpop.f32.mrb[63].mxu1  ;;  %v4941_v21 = vpop.f32.mrb[73].mxu0  ;;  %v3245_v35 = vadd.f32 %v3237_v36, %v5540_v23 }
0x16dc   :  { %v3232_v48 = vpop.f32.mrb[74].mxu0 }
0x16dd   :  { %v4942_v50 = vpop.f32.mrb[75].mxu0  ;;  %v3257_v59 = vsel %vm599_vm7, %v3245_v35, -inf  ;;  %v3250_v60 = vadd.f32 %v3242_v25, %v5540_v23 }
0x16de   :  { %3258 = vmax.xlane.f32.xlu0 %v3257_v59 }
0x16df   :  { %v3272_v7 = vsel %vm599_vm7, %v3250_v60, -inf }
0x16e0   :  { %v3094_v62 = vpop.f32.mrb[64].mxu1  ;;  %3273 = vmax.xlane.f32.xlu1 %v3272_v7 }
0x16e1   :  { %v3239_v49 = vmul.f32 0.35355338, %v3094_v62  ;;  %v4923_v24 = vpop.f32.mrb[65].mxu1 }
0x16e2   :  { %v3097_v34 = vpop.f32.mrb[66].mxu1 }
0x16e3   :  { %v4924_v0 = vpop.f32.mrb[67].mxu1  ;;  %v3247_v27 = vadd.f32 %v3239_v49, %v5540_v23 }
0x16e5   :  { %v3263_v13 = vsel %vm599_vm7, %v3247_v27, -inf }
0x16e6   :  { %3264 = vmax.xlane.f32.xlu0 %v3263_v13 }
0x16e8   :  { %v3186_v54 = vpop.f32.mrb[68].mxu1 }
0x16e9   :  { %v3241_v38 = vmul.f32 0.35355338, %v3186_v54  ;;  %v4935_v41 = vpop.f32.mrb[69].mxu1 }
0x16ea   :  { %v3189_v51 = vpop.f32.mrb[70].mxu1 }
0x16eb   :  { %v4936_v55 = vpop.f32.mrb[71].mxu1  ;;  %v6220_v52 = vadd.f32 %v3241_v38, %v5540_v23  ;;  %v3450_v38 = vsel %vm805_vm10, %v6149_v33, 0  ;;  %v3559_v51 = vsel %vm917_vm11, %v6149_v33, 0 }
0x16ec   :  { %v4392_v41 = vcombine.high %v3450_v38, %v3450_v38  ;;  %v4396_v55 = vcombine.low %v3559_v51, %v3559_v51  ;;  %v4398_v9 = vcombine.high %v3559_v51, %v3559_v51 }
0x16ed   :  { %v3269_v20 = vsel %vm599_vm7, %v6220_v52, -inf }
0x16ee   :  { %3270 = vmax.xlane.f32.xlu0 %v3269_v20  ;;  %v4390_v20 = vcombine.low %v3450_v38, %v3450_v38 }
0x16f1   :  { %3402 = vrot.lane.b32.xlu1 %v4386_v61, %s5341_s30  ;;  %v3668_v61 = vsel %vm1029_vm12, %v6149_v33, 0 }
0x16f2   :  { %v4402_v43 = vcombine.low %v3668_v61, %v3668_v61  ;;  %v4404_v45 = vcombine.high %v3668_v61, %v3668_v61 }
0x1704   :  { %3353 = vrot.lane.b32.xlu0 %v4384_v14, %s5341_s30 }
0x175b   :  { %v3253_v16 = vpop.xlane.xlu1 %3252 }
0x175c   :  { %v3275_v22 = vsub.f32 %v6200_v15, %v3253_v16 }
0x175e   :  { %v3283_v3 = vmul.f32 1.442695, %v3275_v22 }
0x175f   :  { %v3262_v23 = vpop.xlane.xlu1 %3261 }
0x1760   :  { %5265 = vpow2.f32 %v3283_v3  ;;  %v3278_v12 = vsub.f32 %v6205_v1, %v3262_v23 }
0x1762   :  { %v3289_v37 = vmul.f32 1.442695, %v3278_v12 }
0x1763   :  { %v3256_v2 = vpop.xlane.xlu0 %3255 }
0x1764   :  { %5267 = vpow2.f32 %v3289_v37  ;;  %v3276_v11 = vsub.f32 %v3244_v28, %v3256_v2 }
0x1765   :  { %v3268_v4 = vpop.xlane.xlu1 %3267 }
0x1766   :  { %v3285_v57 = vmul.f32 1.442695, %v3276_v11  ;;  %v3280_v29 = vsub.f32 %v3248_v31, %v3268_v4 }
0x1768   :  { %5269 = vpow2.f32 %v3285_v57  ;;  %v3293_v30 = vmul.f32 1.442695, %v3280_v29 }
0x176a   :  { %v6231_v5 = vpop.eup %5265  ;;  %5271 = vpow2.f32 %v3293_v30 }
0x176b   :  { %v3259_v53 = vpop.xlane.xlu0 %3258  ;;  %v3299_v15 = vsel %vm599_vm7, %v6231_v5, 0.0 }
0x176c   :  { %v3277_v58 = vsub.f32 %v3245_v35, %v3259_v53  ;;  %3300 = vadd.xlane.f32.xlu0 %v3299_v15 }
0x176d   :  { %v3274_v36 = vpop.xlane.xlu1 %3273 }
0x176e   :  { %v6235_v1 = vpop.eup %5267  ;;  %v3287_v32 = vmul.f32 1.442695, %v3277_v58  ;;  %v3282_v46 = vsub.f32 %v3250_v60, %v3274_v36 }
0x176f   :  { %v3308_v28 = vsel %vm599_vm7, %v6235_v1, 0.0 }
0x1770   :  { %5273 = vpow2.f32 %v3287_v32  ;;  %v3297_v31 = vmul.f32 1.442695, %v3282_v46  ;;  %3309 = vadd.xlane.f32.xlu1 %v3308_v28 }
0x1771   :  { %v3403_v8 = vpop.permute.xlu1 %3402 }
0x1772   :  { %v6239_v25 = vpop.eup %5269  ;;  %5275 = vpow2.f32 %v3297_v31  ;;  %v3408_v42 = vsel %vm710_vm9, %v3403_v8, 0 }
0x1773   :  { %v3265_v21 = vpop.xlane.xlu0 %3264  ;;  %4950 = vmatpush3.bf16.msra.mxu0 %v3408_v42  ;;  %v3302_v35 = vsel %vm599_vm7, %v6239_v25, 0.0 }
0x1774   :  { %v6244_v48 = vpop.eup %5271  ;;  %v3279_v50 = vsub.f32 %v3247_v27, %v3265_v21  ;;  %3303 = vadd.xlane.f32.xlu1 %v3302_v35  ;;  %4961 = vmatprep.subr.bf16.mxu0 %v5337_v18 }
0x1775   :  { %v3314_v60 = vsel %vm599_vm7, %v6244_v48, 0.0 }
0x1776   :  { %v3291_v59 = vmul.f32 1.442695, %v3279_v50 }
0x1778   :  { %5277 = vpow2.f32 %v3291_v59  ;;  %3315 = vadd.xlane.f32.xlu1 %v3314_v60 }
0x177a   :  { %v6249_v7 = vpop.eup %5273 }
0x177b   :  { %v3271_v62 = vpop.xlane.xlu0 %3270  ;;  %v3305_v49 = vsel %vm599_vm7, %v6249_v7, 0.0 }
0x177c   :  { %v6253_v24 = vpop.eup %5275  ;;  %3306 = vadd.xlane.f32.xlu0 %v3305_v49  ;;  %v3281_v44 = vsub.f32 %v6220_v52, %v3271_v62 }
0x177d   :  { %v3320_v0 = vsel %vm599_vm7, %v6253_v24, 0.0 }
0x177e   :  { %v3295_v14 = vmul.f32 1.442695, %v3281_v44 }
0x177f   :  { %v3354_v34 = vpop.permute.xlu0 %3353 }
0x1780   :  { %v3359_v27 = vsel %vm710_vm9, %v3354_v34, 0  ;;  %3321 = vadd.xlane.f32.xlu0 %v3320_v0  ;;  %5279 = vpow2.f32 %v3295_v14 }
0x1781   :  { %4944 = vmatpush3.bf16.msra.mxu1 %v3359_v27 }
0x1782   :  { %v6258_v13 = vpop.eup %5277  ;;  %4955 = vmatprep.subr.bf16.mxu1 %v5337_v18 }
0x1783   :  { %v3311_v54 = vsel %vm599_vm7, %v6258_v13, 0.0 }
0x1784   :  { %3312 = vadd.xlane.f32.xlu0 %v3311_v54 }
0x1789   :  { %3509 = vrot.lane.b32.xlu1 %v4392_v41, %s5341_s30 }
0x178a   :  { %v6280_v16 = vpop.eup %5279 }
0x178b   :  { %v3317_v22 = vsel %vm599_vm7, %v6280_v16, 0.0 }
0x178d   :  { %3569 = vrot.lane.b32.xlu1 %v4396_v55, %s5341_s30 }
0x1791   :  { %3618 = vrot.lane.b32.xlu1 %v4398_v9, %s5341_s30 }
0x179a   :  { %3460 = vrot.lane.b32.xlu0 %v4390_v20, %s5341_s30 }
0x179e   :  { %3678 = vrot.lane.b32.xlu0 %v4402_v43, %s5341_s30 }
0x17a2   :  { %3778 = vrot.lane.b32.xlu0 %v6124_v56, %s5343_s6 }
0x17b5   :  { %3318 = vadd.xlane.f32.xlu1 %v3317_v22 }
0x17c6   :  { %3727 = vrot.lane.b32.xlu1 %v4404_v45, %s5341_s30 }
0x17ca   :  { %3780 = vrot.lane.b32.xlu1 %v6130_v6, %s5343_s6 }
0x17f9   :  { %v3301_v33 = vpop.xlane.xlu0 %3300 }
0x17fa   :  { %5281 = vrcp.f32 %v3301_v33  ;;  %v3833_v33 = vrot.slane %v6138_v10, %v5708_v17 }
0x17fd   :  { %v3310_v52 = vpop.xlane.xlu1 %3309 }
0x1801   :  { %v3304_v3 = vpop.xlane.xlu1 %3303 }
0x1802   :  { %5283 = vrcp.f32 %v3304_v3 }
0x1803   :  { %5285 = vrcp.f32 %v3310_v52 }
0x1804   :  { %v5282_v56 = vpop.eup %5281 }
0x1805   :  { %v3331_v23 = vmul.f32 %v5282_v56, %v6231_v5  ;;  %v3316_v37 = vpop.xlane.xlu1 %3315 }
0x1807   :  { %v4443_v12 = vpack.c.bf16 %v3331_v23, %v3331_v23 }
0x1809   :  { %4946 = vmatmul.mubr.msk.bf16.vlgmr.msra.gmra.mrb[72].mxu1 %vm599_vm7, %v4443_v12  ;;  %v3307_v2 = vpop.xlane.xlu0 %3306  ;;  %v3510_v57 = vpop.permute.xlu1 %3509 }
0x180a   :  { %5287 = vrcp.f32 %v3307_v2  ;;  %4957 = vmatprep.mubr.msk.bf16.mxu1 %vm5338_vm1, %v5337_v18  ;;  %v3515_v30 = vsel %vm710_vm9, %v3510_v57, 0 }
0x180c   :  { %v5284_v11 = vpop.eup %5283 }
0x180d   :  { %v3332_v6 = vmul.f32 %v5284_v11, %v6239_v25  ;;  %v3322_v4 = vpop.xlane.xlu0 %3321  ;;  %v5286_v5 = vpop.eup %5285 }
0x180e   :  { %v3570_v58 = vpop.permute.xlu1 %3569  ;;  %v3334_v28 = vmul.f32 %v5286_v5, %v6235_v1 }
0x180f   :  { %v4444_v29 = vpack.c.bf16 %v3332_v6, %v3332_v6  ;;  %v3575_v8 = vsel %vm710_vm9, %v3570_v58, 0 }
0x1810   :  { %v4446_v42 = vpack.c.bf16 %v3334_v28, %v3334_v28 }
0x1811   :  { %v3313_v53 = vpop.xlane.xlu0 %3312  ;;  %4952 = vmatmul.mubr.msk.bf16.vlgmr.msra.gmra.mrb[76].mxu0 %vm599_vm7, %v4444_v29 }
0x1812   :  { %4962 = vmatpush3.bf16.msra.mxu0 %v3515_v30  ;;  %4963 = vmatprep.mubr.msk.bf16.mxu0 %vm5338_vm1, %v5337_v18  ;;  %5289 = vrcp.f32 %v3313_v53  ;;  %v3619_v25 = vpop.permute.xlu1 %3618 }
0x1813   :  { %4973 = vmatprep.subr.bf16.mxu0 %v5337_v18  ;;  %5291 = vrcp.f32 %v3316_v37  ;;  %v3624_v35 = vsel %vm710_vm9, %v3619_v25, 0 }
0x1814   :  { %v5288_v15 = vpop.eup %5287  ;;  %5293 = vrcp.f32 %v3322_v4 }
0x1815   :  { %v3333_v36 = vmul.f32 %v5288_v15, %v6249_v7  ;;  %v3461_v32 = vpop.permute.xlu0 %3460 }
0x1816   :  { %v3466_v46 = vsel %vm710_vm9, %v3461_v32, 0  ;;  %v5156_v32 = vld [vmem:[%s6451_s1 + $0x54] ss:$8 sps:$4 sm:$0xff]  }
0x1817   :  { %4956 = vmatpush3.bf16.msra.mxu1 %v3466_v46  ;;  %v4445_v31 = vpack.c.bf16 %v3333_v36, %v3333_v36  ;;  %v5155_v36 = vld [vmem:[%s6451_s1 + $0x44] ss:$8 sps:$4 sm:$0xff]  }
0x1818   :  { %4967 = vmatprep.subr.bf16.mxu1 %v5337_v18 }
0x1819   :  { %v3679_v60 = vpop.permute.xlu0 %3678 }
0x181a   :  { %4958 = vmatmul.mubr.msk.bf16.vlgmr.msra.gmra.mrb[72].mxu1 %vm599_vm7, %v4445_v31  ;;  %v3684_v62 = vsel %vm710_vm9, %v3679_v60, 0 }
0x181b   :  { %4968 = vmatpush3.bf16.msra.mxu1 %v3575_v8  ;;  %4969 = vmatprep.mubr.msk.bf16.mxu1 %vm5338_vm1, %v5337_v18 }
0x181c   :  { %4979 = vmatprep.subr.bf16.mxu1 %v5337_v18  ;;  %v5290_v21 = vpop.eup %5289 }
0x181d   :  { %4964 = vmatmul.mubr.msk.bf16.vlgmr.msra.gmra.mrb[76].mxu0 %vm599_vm7, %v4446_v42  ;;  %v5292_v1 = vpop.eup %5291  ;;  %v3335_v50 = vmul.f32 %v5290_v21, %v6258_v13 }
0x181e   :  { %4974 = vmatpush3.bf16.msra.mxu0 %v3624_v35  ;;  %4975 = vmatprep.mubr.msk.bf16.mxu0 %vm5338_vm1, %v5337_v18  ;;  %v3336_v59 = vmul.f32 %v5292_v1, %v6244_v48  ;;  %v5294_v48 = vpop.eup %5293  ;;  %v3865_v35 = vrot.slane %v6138_v10, %v5727_v47  ;;  %v5157_v47 = vld [vmem:[%s6452_s2 + $0x80] sm:$0xff]  }
0x181f   :  { %4985 = vmatprep.subr.bf16.mxu0 %v5337_v18  ;;  %v4447_v7 = vpack.c.bf16 %v3335_v50, %v3335_v50  ;;  %v3338_v0 = vmul.f32 %v5294_v48, %v6253_v24  ;;  %v3779_v24 = vpop.permute.xlu0 %3778 }
0x1820   :  { %v4448_v49 = vpack.c.bf16 %v3336_v59, %v3336_v59 }
0x1821   :  { %v4450_v54 = vpack.c.bf16 %v3338_v0, %v3338_v0  ;;  %v5159_v0 = vld [vmem:[%s6452_s2 + $0x90] sm:$0xff]  }
0x1826   :  { %4970 = vmatmul.mubr.msk.bf16.vlgmr.msra.gmra.mrb[72].mxu1 %vm599_vm7, %v4447_v7  ;;  %v3871_v7 = vrot.slane %v6138_v10, %v5732_v26  ;;  %v5158_v26 = vld [vmem:[%s6452_s2 + $0x88] sm:$0xff]  }
0x1827   :  { %4980 = vmatpush3.bf16.msra.mxu1 %v3684_v62  ;;  %4981 = vmatprep.mubr.msk.bf16.mxu1 %vm5338_vm1, %v5337_v18 }
0x1828   :  { %4991 = vmatprep.subr.bf16.mxu1 %v5337_v18 }
0x1829   :  { %4976 = vmatmul.mubr.msk.bf16.vlgmr.msra.gmra.mrb[76].mxu0 %vm599_vm7, %v4448_v49 }
0x182a   :  { %4987 = vmatprep.mubr.msk.bf16.mxu0 %vm5338_vm1, %v5337_v18 }
0x1842   :  { %v3319_v34 = vpop.xlane.xlu1 %3318 }
0x1843   :  { %5295 = vrcp.f32 %v3319_v34 }
0x1846   :  { %v3728_v27 = vpop.permute.xlu1 %3727 }
0x1847   :  { %v3733_v13 = vsel %vm710_vm9, %v3728_v27, 0  ;;  %v5160_v27 = vld [vmem:[%s6452_s2 + $0x98] sm:$0xff]  }
0x1848   :  { %4986 = vmatpush3.bf16.msra.mxu0 %v3733_v13  ;;  %v5161_v13 = vld [vmem:[%s6452_s2 + $0xa0] sm:$0xff]  }
0x1849   :  { %4999 = vmatprep.subr.bf16.mxu0 %v5337_v18 }
0x184a   :  { %v3781_v55 = vpop.permute.xlu1 %3780 }
0x184b   :  { %4988 = vmatmul.mubr.msk.bf16.vlgmr.msra.gmra.mrb[76].mxu0 %vm599_vm7, %v4450_v54  ;;  %v5162_v54 = vld [vmem:[%s6452_s2 + $0xa8] sm:$0xff]  }
0x184c   :  { %5003 = vmatprep.mubr.msk.bf16.mxu0 %vm5338_vm1, %v5337_v18  ;;  %5000 = vmatpush3.bf16.msra.mxu0 %v5155_v36 }
0x184d   :  { %v5296_v38 = vpop.eup %5295  ;;  %5001 = vmatprep.subr.bf16.mxu0 %v5337_v18 }
0x184e   :  { %v3337_v41 = vmul.f32 %v5296_v38, %v6280_v16  ;;  %v5163_v38 = vld [vmem:[%s6452_s2 + $0xb0] sm:$0xff]  }
0x1850   :  { %v4449_v51 = vpack.c.bf16 %v3337_v41, %v3337_v41  ;;  %5002 = vmatpush3.bf16.msra.mxu0 %v5156_v32  ;;  %v5164_v41 = vld [vmem:[%s6452_s2 + $0xb8] sm:$0xff]  }
0x1851   :  { %5027 = vmatprep.subr.bf16.mxu0 %v5337_v18 }
0x1852   :  { %4982 = vmatmul.mubr.msk.bf16.vlgmr.msra.gmra.mrb[72].mxu1 %vm599_vm7, %v4449_v51  ;;  %v3878_v51 = vrot.slane %v6138_v10, %v5772_v19 }
0x1853   :  { %4995 = vmatprep.mubr.msk.bf16.mxu1 %vm5338_vm1, %v5337_v18  ;;  %4992 = vmatpush3.bf16.msra.mxu1 %v3779_v24 }
0x1854   :  { %4993 = vmatprep.subr.bf16.mxu1 %v5337_v18 }
0x1857   :  { %4994 = vmatpush3.bf16.msra.mxu1 %v3781_v55 }
0x1858   :  { %5007 = vmatprep.subr.bf16.mxu1 %v5337_v18 }
0x191e   :  { %v3769_v9 = vpop.f32.mrb[76].mxu0 }
0x191f   :  { %v4989_v20 = vpop.f32.mrb[77].mxu0 }
0x1920   :  { %v3772_v61 = vpop.f32.mrb[78].mxu0 }
0x1921   :  { %v4990_v43 = vpop.f32.mrb[79].mxu0 }
0x1925   :  { %v3720_v44 = vpop.f32.mrb[72].mxu1 }
0x1926   :  { %v3777_v14 = vpack.c.bf16 %v3769_v9, %v3720_v44  ;;  %v4983_v16 = vpop.f32.mrb[73].mxu1 }
0x1927   :  { %v3723_v22 = vpop.f32.mrb[74].mxu1 }
0x1928   :  { %v4984_v45 = vpop.f32.mrb[75].mxu1  ;;  %4996 = vmatmul.mubr.msk.bf16.vlgmr.msra.gmra.mrb[76].mxu1 %vm70_vm0, %v3777_v14 }
0x1929   :  { %5023 = vmatprep.mubr.msk.bf16.mxu1 %vm5338_vm1, %v5337_v18  ;;  %5008 = vmatpush3.bf16.msra.mxu1 %v5157_v47 }
0x192a   :  { %5009 = vmatprep.subr.bf16.mxu1 %v5337_v18 }
0x192d   :  { %5010 = vmatpush3.bf16.msra.mxu1 %v5158_v26 }
0x192e   :  { %5011 = vmatprep.subr.bf16.mxu1 %v5337_v18 }
0x1931   :  { %5012 = vmatpush3.bf16.msra.mxu1 %v5159_v0 }
0x1932   :  { %5013 = vmatprep.subr.bf16.mxu1 %v5337_v18 }
0x1935   :  { %5014 = vmatpush3.bf16.msra.mxu1 %v5160_v27 }
0x1936   :  { %5015 = vmatprep.subr.bf16.mxu1 %v5337_v18 }
0x1939   :  { %5016 = vmatpush3.bf16.msra.mxu1 %v5161_v13  ;;  %v4047_v13 = vld [vmem:[%s6454_s4 + $0x8] sm:$0xff] }
0x193a   :  { %5017 = vmatprep.subr.bf16.mxu1 %v5337_v18 }
0x193d   :  { %5018 = vmatpush3.bf16.msra.mxu1 %v5162_v54  ;;  %v4048_v54 = vld [vmem:[%s6454_s4 + $0x10] sm:$0xff] }
0x193e   :  { %5019 = vmatprep.subr.bf16.mxu1 %v5337_v18 }
0x1941   :  { %5020 = vmatpush3.bf16.msra.mxu1 %v5163_v38  ;;  %v4051_v38 = vpack.c.bf16 %v4048_v54, %v4047_v13 }
0x1942   :  { %5021 = vmatprep.subr.bf16.mxu1 %v5337_v18 }
0x1945   :  { %5022 = vmatpush3.bf16.msra.mxu1 %v5164_v41  ;;  %v4049_v41 = vld [vmem:[%s6454_s4 + $0x18] sm:$0xff] }
0x19fb   :  { %v3821_v52 = vpop.f32.mrb[76].mxu1 }
0x19fc   :  { %v3828_v3 = vadd.f32 %v3821_v52, %v6109_v63  ;;  %v4997_v56 = vpop.f32.mrb[77].mxu1 }
0x19fd   :  { %v3824_v23 = vpop.f32.mrb[78].mxu1 }
0x19fe   :  { %v6339_v12 = vadd.f32 %v3833_v33, %v3828_v3  ;;  %v3829_v37 = vadd.f32 %v3824_v23, %v6113_v40  ;;  %v4998_v2 = vpop.f32.mrb[79].mxu1 }
0x1a00   :  { %v6342_v11 = vadd.f32 %v3833_v33, %v3829_v37  ;;  %v3836_v6 = vsel %vm70_vm0, %v6339_v12, 0.0 }
0x1a01   :  { %3837 = vadd.xlane.f32.xlu0 %v3836_v6  ;;  %v4038_v6 = vrot.slane %v6138_v10, %v5779_v39 }
0x1a02   :  { %v3839_v4 = vsel %vm70_vm0, %v6342_v11, 0.0 }
0x1a03   :  { %3840 = vadd.xlane.f32.xlu1 %v3839_v4 }
0x1a8e   :  { %v3838_v17 = vpop.xlane.xlu0 %3837 }
0x1a8f   :  { %v3842_v57 = vmul.f32 0.03125, %v3838_v17 }
0x1a90   :  { %v3841_v63 = vpop.xlane.xlu1 %3840 }
0x1a91   :  { %v3844_v29 = vsub.f32 %v6339_v12, %v3842_v57  ;;  %v3843_v30 = vmul.f32 0.03125, %v3841_v63  ;;  %v4041_v63 = vld [vmem:[%s6454_s4 + $0x58] sm:$0xff] }
0x1a93   :  { %v3845_v53 = vsub.f32 %v6342_v11, %v3843_v30  ;;  %v3846_v40 = vmul.f32 %v3844_v29, %v3844_v29 }
0x1a95   :  { %v3848_v5 = vsel %vm70_vm0, %v3846_v40, 0.0  ;;  %v3847_v15 = vmul.f32 %v3845_v53, %v3845_v53 }
0x1a96   :  { %3849 = vadd.xlane.f32.xlu0 %v3848_v5  ;;  %v4042_v5 = vld [vmem:[%s6454_s4 + $0x60] sm:$0xff] }
0x1a97   :  { %v3851_v58 = vsel %vm70_vm0, %v3847_v15, 0.0 }
0x1a9a   :  { %3852 = vadd.xlane.f32.xlu0 %v3851_v58 }
0x1b23   :  { %v3850_v46 = vpop.xlane.xlu0 %3849 }
0x1b24   :  { %v3854_v28 = vmul.f32 0.03125, %v3850_v46 }
0x1b26   :  { %v3856_v31 = vadd.f32 1e-05, %v3854_v28 }
0x1b27   :  { %v3853_v8 = vpop.xlane.xlu0 %3852 }
0x1b28   :  { %5297 = vrsqrt.f32 %v3856_v31  ;;  %v3855_v25 = vmul.f32 0.03125, %v3853_v8 }
0x1b2a   :  { %v3857_v42 = vadd.f32 1e-05, %v3855_v25 }
0x1b2c   :  { %5299 = vrsqrt.f32 %v3857_v42 }
0x1b32   :  { %v5298_v21 = vpop.eup %5297 }
0x1b33   :  { %v3860_v1 = vmul.f32 %v5298_v21, %v3844_v29 }
0x1b35   :  { %v3866_v59 = vmul.f32 %v3865_v35, %v3860_v1 }
0x1b36   :  { %v5300_v50 = vpop.eup %5299 }
0x1b37   :  { %v3861_v60 = vmul.f32 %v5300_v50, %v3845_v53  ;;  %v3872_v49 = vadd.f32 %v3871_v7, %v3866_v59 }
0x1b39   :  { %v3867_v62 = vmul.f32 %v3865_v35, %v3861_v60 }
0x1b3b   :  { %v3873_v48 = vadd.f32 %v3871_v7, %v3867_v62 }
0x1b3d   :  { %v3874_v34 = vpack.c.bf16 %v3873_v48, %v3872_v49 }
0x1b3f   :  { %5004 = vmatmul.mubr.msk.bf16.vlgmr.msra.gmra.mrb[80].mxu0 %vm70_vm0, %v3874_v34 }
0x1b40   :  { %5031 = vmatprep.mubr.msk.bf16.mxu0 %vm5338_vm1, %v5337_v18  ;;  %5028 = vmatpush3.bf16.msra.mxu0 %v4051_v38 }
0x1b41   :  { %5029 = vmatprep.subr.bf16.mxu0 %v5337_v18 }
0x1c12   :  { %v3924_v24 = vpop.f32.mrb[80].mxu0 }
0x1c13   :  { %v3925_v55 = vadd.f32 %v3924_v24, %v3878_v51  ;;  %v5005_v9 = vpop.f32.mrb[81].mxu0 }
0x1c14   :  { %v3927_v20 = vpop.f32.mrb[82].mxu0 }
0x1c15   :  { %v3931_v61 = vmul.f32 -1.702, %v3925_v55  ;;  %v3928_v43 = vadd.f32 %v3927_v20, %v3878_v51  ;;  %v5006_v44 = vpop.f32.mrb[83].mxu0  ;;  %v4050_v51 = vld [vmem:[%s6454_s4 + $0x20] sm:$0xff] }
0x1c16   :  { %v4052_v24 = vpack.c.bf16 %v4050_v51, %v4049_v41 }
0x1c17   :  { %v3933_v14 = vmul.f32 1.442695, %v3931_v61  ;;  %v3932_v16 = vmul.f32 -1.702, %v3928_v43 }
0x1c18   :  { %5030 = vmatpush3.bf16.msra.mxu0 %v4052_v24 }
0x1c19   :  { %5301 = vpow2.f32 %v3933_v14  ;;  %v3935_v22 = vmul.f32 1.442695, %v3932_v16  ;;  %5035 = vmatprep.subr.bf16.mxu0 %v5337_v18  ;;  %v4418_v14 = vld [vmem:[%s6453_s3 + $0x18] sm:$0xff]  ;;  %s5344_s3 = smov [#allocation2]  }
0x1c1a   :  { %s4197_s4 = sshll.u32 %s5344_s3, 4  ;;  %s4198_s4 = int_to_ptr.vmem [resolvable:$true] %s4197_s4 }
0x1c1b   :  { %5303 = vpow2.f32 %v3935_v22  ;;  %s5313_s26 = scalar_lea.vmem %s4198_s4, 32  ;;  %p5318_p1 = scmp.lt.s32.totalorder %s4198_s4, %s4198_s4 }
0x1c1c   :  { %p5314_p0 = scmp.ne.s32.totalorder %s4198_s4, %s5313_s26  ;;  %p5319_p2 = scmp.lt.s32.totalorder %s5313_s26, %s5313_s26 }
0x1c1e   :  { %p5320_p3 = por %p5319_p2, %p5318_p1 }
0x1c20   :  { %p5321_p4 = pnand %p5320_p3, %p5314_p0 }
0x1c23   :  { %v5302_v45 = vpop.eup %5301 }
0x1c24   :  { %v3937_v33 = vadd.f32 1.0, %v5302_v45  ;;  %v4075_v45 = vrot.slane %v4418_v14, 1 }
0x1c25   :  { %v5304_v52 = vpop.eup %5303 }
0x1c26   :  { %5305 = vrcp.f32 %v3937_v33  ;;  %v3938_v3 = vadd.f32 1.0, %v5304_v52 }
0x1c28   :  { %5307 = vrcp.f32 %v3938_v3 }
0x1c30   :  { %v5306_v56 = vpop.eup %5305 }
0x1c31   :  { %v3941_v23 = vmul.f32 %v5306_v56, %v3925_v55 }
0x1c32   :  { %v5308_v19 = vpop.eup %5307 }
0x1c33   :  { %v3942_v37 = vmul.f32 %v5308_v19, %v3928_v43 }
0x1c35   :  { %v3943_v2 = vpack.c.bf16 %v3942_v37, %v3941_v23 }
0x1c37   :  { %5024 = vmatmul.mubr.bf16.vlgmr.msra.gmra.mrb[80].mxu1 %v3943_v2 }
0x1d0a   :  { %v4026_v4 = vpop.f32.mrb[80].mxu1 }
0x1d0b   :  { %v4033_v17 = vadd.f32 %v4026_v4, %v6339_v12  ;;  %v5025_v57 = vpop.f32.mrb[81].mxu1 }
0x1d0c   :  { %v4029_v29 = vpop.f32.mrb[82].mxu1 }
0x1d0d   :  { %v4039_v30 = vadd.f32 %v4038_v6, %v4033_v17  ;;  %v4034_v53 = vadd.f32 %v4029_v29, %v6342_v11  ;;  %v5026_v40 = vpop.f32.mrb[83].mxu1 }
0x1d0f   :  { %v4043_v15 = vmul.f32 %v4041_v63, %v4039_v30  ;;  %v4040_v58 = vadd.f32 %v4038_v6, %v4034_v53 }
0x1d11   :  { %v4053_v39 = vsel %vm70_vm0, %v4043_v15, 0.0  ;;  %v4044_v10 = vmul.f32 %v4042_v5, %v4040_v58 }
0x1d12   :  { %v4054_v12 = vrot.slane %v4053_v39, 4 }
0x1d13   :  { %v4124_v36 = vsel %vm70_vm0, %v4044_v10, 0.0 }
0x1d14   :  { %v4055_v32 = vadd.f32 %v4054_v12, %v4053_v39  ;;  %v4125_v46 = vrot.slane %v4124_v36, 4 }
0x1d16   :  { %v4126_v28 = vadd.f32 %v4125_v46, %v4124_v36  ;;  %v4056_v31 = vrot.slane %v4055_v32, 2 }
0x1d18   :  { %v4057_v8 = vadd.f32 %v4056_v31, %v4055_v32  ;;  %v4127_v25 = vrot.slane %v4126_v28, 2 }
0x1d1a   :  { %v4058_v11 = vrot.slane %v4057_v8, 1  ;;  %v4128_v42 = vadd.f32 %v4127_v25, %v4126_v28 }
0x1d1c   :  { %v4059_v21 = vadd.f32 %v4058_v11, %v4057_v8  ;;  %v4129_v35 = vrot.slane %v4128_v42, 1 }
0x1d1e   :  { %v4060_v1 = vsel %vm70_vm0, %v4059_v21, 0.0  ;;  %v4130_v50 = vadd.f32 %v4129_v35, %v4128_v42 }
0x1d1f   :  { %4061 = vadd.xlane.f32.xlu0 %v4060_v1 }
0x1d20   :  { %v4131_v59 = vsel %vm70_vm0, %v4130_v50, 0.0 }
0x1d21   :  { %4132 = vadd.xlane.f32.xlu1 %v4131_v59 }
0x1dac   :  { %v4062_v60 = vpop.xlane.xlu0 %4061 }
0x1dad   :  { %v4063_v7 = vmul.f32 0.03125, %v4062_v60 }
0x1dae   :  { %v4133_v62 = vpop.xlane.xlu1 %4132 }
0x1daf   :  { %v4064_v49 = vsub.f32 %v4059_v21, %v4063_v7  ;;  %v4134_v48 = vmul.f32 0.03125, %v4133_v62 }
0x1db1   :  { %v4135_v34 = vsub.f32 %v4130_v50, %v4134_v48  ;;  %v4065_v47 = vmul.f32 %v4064_v49, %v4064_v49 }
0x1db3   :  { %v4066_v26 = vsel %vm70_vm0, %v4065_v47, 0.0  ;;  %v4136_v0 = vmul.f32 %v4135_v34, %v4135_v34 }
0x1db4   :  { %4067 = vadd.xlane.f32.xlu0 %v4066_v26 }
0x1db5   :  { %v4137_v27 = vsel %vm70_vm0, %v4136_v0, 0.0 }
0x1db6   :  { %4138 = vadd.xlane.f32.xlu1 %v4137_v27 }
0x1e41   :  { %v4068_v55 = vpop.xlane.xlu0 %4067 }
0x1e42   :  { %v4069_v9 = vmul.f32 0.03125, %v4068_v55 }
0x1e43   :  { %v4139_v20 = vpop.xlane.xlu1 %4138 }
0x1e44   :  { %v4070_v61 = vadd.f32 1e-05, %v4069_v9  ;;  %v4140_v43 = vmul.f32 0.03125, %v4139_v20 }
0x1e46   :  { %5309 = vrsqrt.f32 %v4070_v61  ;;  %v4141_v44 = vadd.f32 1e-05, %v4140_v43 }
0x1e48   :  { %5311 = vrsqrt.f32 %v4141_v44 }
0x1e50   :  { %v5310_v16 = vpop.eup %5309 }
0x1e51   :  { %v4072_v22 = vmul.f32 %v5310_v16, %v4064_v49 }
0x1e52   :  { %v5312_v33 = vpop.eup %5311 }
0x1e53   :  { %v4073_v52 = vmul.f32 %v4418_v14, %v4072_v22  ;;  %v4143_v3 = vmul.f32 %v5312_v33, %v4135_v34 }
0x1e55   :  { %v4077_v56 = vadd.f32 %v4075_v45, %v4073_v52  ;;  %v4144_v19 = vmul.f32 %v4418_v14, %v4143_v3 }
0x1e57   :  { %v4078_v23 = vpack.c.bf16 %v4077_v56, %v4077_v56  ;;  %v4145_v37 = vadd.f32 %v4144_v19, %v4075_v45 }
0x1e59   :  { %5032 = vmatmul.mubr.msk.bf16.vlgmr.msra.gmra.mrb[84].mxu0 %vm70_vm0, %v4078_v23  ;;  %v4146_v2 = vpack.c.bf16 %v4145_v37, %v4145_v37 }
0x1e5a   :  { %5036 = vmatpush3.bf16.msra.mxu0 %v4051_v38  ;;  %5039 = vmatprep.mubr.msk.bf16.mxu0 %vm5338_vm1, %v5337_v18 }
0x1e5b   :  { %5037 = vmatprep.subr.bf16.mxu0 %v5337_v18 }
0x1e5e   :  { %5038 = vmatpush3.bf16.msra.mxu0 %v4052_v24 }
0x1e61   :  { %5040 = vmatmul.mubr.msk.bf16.vlgmr.msra.gmra.mrb[88].mxu0 %vm70_vm0, %v4146_v2 }
0x1f2c   :  { %v4116_v6 = vpop.f32.mrb[84].mxu0 }
0x1f2d   :  { %4123 = vst.msk [vmem:[#allocation2] sm:$0x1] %vm4122_vm13, %v4116_v6  ;;  %v5033_v4 = vpop.f32.mrb[85].mxu0 }
0x1f2e   :  { %v4119_v17 = vpop.f32.mrb[86].mxu0 }
0x1f2f   :  { %v5034_v57 = vpop.f32.mrb[87].mxu0 }
0x1f34   :  { %v4184_v63 = vpop.f32.mrb[88].mxu0 }
0x1f35   :  { %4190 = vst.msk [vmem:[#allocation2 + $0x1] sm:$0x1] %vm4122_vm13, %v4184_v63  ;;  %v5041_v29 = vpop.f32.mrb[89].mxu0 }
0x1f36   :  { %v4187_v30 = vpop.f32.mrb[90].mxu0 }
0x1f37   :  { %5324 = shalt.err (!%p5321_p4)
}
0x1f38   :  { %s5325_s7 = scalar_lea.hbm %s6455_s5, 32 }
0x1f39   :  { %p5326_p5 = scmp.ne.s32.totalorder %s6455_s5, %s5325_s7  ;;  %p5329_p6 = scmp.lt.u32.totalorder %s5325_s7, %s6455_s5 }
0x1f3b   :  { %p5331_p7 = pnand %p5329_p6, %p5326_p5 }
0x1f3d   :  { %5334 = shalt.err (!%p5331_p7)
}
0x1f3e   :  { %4200 = dma.vmem_to_hbm [thread:$0]  %s4198_s4, 32, %s6455_s5, [#allocation3]   ;;  %v5042_v18 = vpop.f32.mrb[91].mxu0 }
0x1f3f   :  { %5335 = dma.done.wait [#allocation3], 32  }
0x1f40   :  { %5336 = vsyncadd [#allocation3], 4294967264 }
0x1f41   :  { %4204 = vsyncpa [#allocation3], 1 }

</bundles_post_ra>
